<compile_context>
chip_gen: v7x
topology: tpu7x:2x2x1
jax: 0.10.0
libtpu: 0.0.40
codegen_flags: <defaults>
</compile_context>

<pallas_src>
import jax
import jax.numpy as jnp
from jax.experimental import pallas as pl
from jax.experimental.pallas import tpu as pltpu

D_MODEL = 128
N_HEAD = 2
HEAD_DIM = D_MODEL // N_HEAD
D_FF = 2048
N_LAYERS = 2
EPS = 1e-5


def _layer_norm(v, g, beta):
    mu = jnp.mean(v, axis=-1, keepdims=True)
    var = jnp.mean((v - mu) * (v - mu), axis=-1, keepdims=True)
    return (v - mu) * jax.lax.rsqrt(var + EPS) * g + beta


# ---------------------------------------------------------------------------
# Fused encoder kernel: one encoder (inter or vital) per grid step, whole batch.
# ---------------------------------------------------------------------------
def fused_encoder_kernel(mask_ref,                    # SMEM (2, B) int32 (prefetched)
                         x_ref,                       # (1, B, S, Dpad) f32
                         embed_w_ref, embed_b_ref,    # (1,Dpad,128) bf16, (1,1,128) f32
                         qkv_w_ref, qkv_b_ref,        # (1,L,128,384) bf16, (1,L,1,384) f32
                         out_w_ref, out_b_ref,        # (1,L,128,128) bf16, (1,L,1,128) f32
                         ln1_g_ref, ln1_b_ref,        # (1,L,1,128) f32 x2
                         ff1_w_ref, ff1_b_ref,        # (1,L,128,2048) bf16, (1,L,1,2048) f32
                         ff2_w_ref, ff2_b_ref,        # (1,L,2048,128) bf16, (1,L,1,128) f32
                         ln2_g_ref, ln2_b_ref,        # (1,L,1,128) f32 x2
                         o_ref):                      # (1, B, 128) f32
    e = pl.program_id(0)
    B, S, dpad = x_ref.shape[1], x_ref.shape[2], x_ref.shape[3]
    scale = 1.0 / jnp.sqrt(jnp.float32(HEAD_DIM))

    # ---- embed -> ReLU (whole batch as B*S rows) ----
    x2d = x_ref[0].reshape(B * S, dpad)                                  # (B*S, Dpad) f32
    h = jnp.dot(x2d.astype(jnp.bfloat16), embed_w_ref[0],
                preferred_element_type=jnp.float32) + embed_b_ref[0]
    h = jnp.maximum(h, 0.0)                                              # (B*S, 128) f32

    # key j is valid iff j <= mask[e, b]   (torch: masked when arange > mask)
    key_thresh = jnp.zeros((B, 1, 1), jnp.int32)
    b_idx = jax.lax.broadcasted_iota(jnp.int32, (B, 1, 1), 0)
    for b in range(B):
        key_thresh = jnp.where(b_idx == b, mask_ref[e, b], key_thresh)
    key_valid = (jax.lax.broadcasted_iota(jnp.int32, (B, 1, S), 2)
                 <= key_thresh)                                          # (B, 1, S) bool

    for l in range(N_LAYERS):
        # --- fused Q/K/V projection: one MXU pass instead of three ---
        qkv = jnp.dot(h.astype(jnp.bfloat16), qkv_w_ref[0, l],
                      preferred_element_type=jnp.float32) + qkv_b_ref[0, l]   # (B*S, 384)
        q = qkv[:, 0 * D_MODEL:1 * D_MODEL].reshape(B, S, D_MODEL)
        k = qkv[:, 1 * D_MODEL:2 * D_MODEL].reshape(B, S, D_MODEL)
        v = qkv[:, 2 * D_MODEL:3 * D_MODEL].reshape(B, S, D_MODEL)

        # --- attention: batched over B via einsum; small Python loop over 2 heads ---
        head_outs = []
        for hh in range(N_HEAD):
            lo, hi = hh * HEAD_DIM, (hh + 1) * HEAD_DIM
            qh, kh, vh = q[:, :, lo:hi], k[:, :, lo:hi], v[:, :, lo:hi]      # (B,S,64)
            sc = jnp.einsum('bqd,bkd->bqk', qh, kh,
                            preferred_element_type=jnp.float32) * scale      # (B,S,S)
            sc = jnp.where(key_valid, sc, -1e30)
            m = jnp.max(sc, axis=-1, keepdims=True)
            p = jnp.exp(sc - m)
            p = p * pl.reciprocal(jnp.sum(p, axis=-1, keepdims=True), approx=True)
            head_outs.append(jnp.einsum('bqk,bkd->bqd', p, vh,
                                        preferred_element_type=jnp.float32))  # (B,S,64)
        attn = jnp.concatenate(head_outs, axis=-1).reshape(B * S, D_MODEL)
        attn = jnp.dot(attn.astype(jnp.bfloat16), out_w_ref[0, l],
                       preferred_element_type=jnp.float32) + out_b_ref[0, l]

        h = _layer_norm(h + attn, ln1_g_ref[0, l], ln1_b_ref[0, l])

        # --- feed-forward ---
        ff = jnp.dot(h.astype(jnp.bfloat16), ff1_w_ref[0, l],
                     preferred_element_type=jnp.float32) + ff1_b_ref[0, l]
        ff = jnp.maximum(ff, 0.0)
        ff = jnp.dot(ff.astype(jnp.bfloat16), ff2_w_ref[0, l],
                     preferred_element_type=jnp.float32) + ff2_b_ref[0, l]

        h = _layer_norm(h + ff, ln2_g_ref[0, l], ln2_b_ref[0, l])

    # torch: permute back then sum over seq dim (ALL positions, incl. padded ones)
    o_ref[...] = jnp.sum(h.reshape(B, S, D_MODEL), axis=1).reshape(1, B, D_MODEL)


def fused_transformer_encoders(x_all, mask_all, packed_params):
    """x_all: (2,B,S,Dpad) f32, mask_all: (2,B) int32 -> (2,B,128) f32."""
    n_enc, B, S, dpad = x_all.shape

    def wspec(shape):
        nd = len(shape)
        return pl.BlockSpec((1,) + tuple(shape[1:]),
                            lambda e, m, _nd=nd: (e,) + (0,) * (_nd - 1))

    in_specs = [pl.BlockSpec((1, B, S, dpad), lambda e, m: (e, 0, 0, 0))]
    in_specs += [wspec(p.shape) for p in packed_params]

    grid_spec = pltpu.PrefetchScalarGridSpec(
        num_scalar_prefetch=1,
        grid=(n_enc,),
        in_specs=in_specs,
        out_specs=pl.BlockSpec((1, B, D_MODEL), lambda e, m: (e, 0, 0)),
    )

    return pl.pallas_call(
        fused_encoder_kernel,
        out_shape=jax.ShapeDtypeStruct((n_enc, B, D_MODEL), jnp.float32),
        grid_spec=grid_spec,
        compiler_params=pltpu.CompilerParams(
            # the two encoders are independent -> shard across the 2 TCs on v7x
            dimension_semantics=("parallel",),
            vmem_limit_bytes=32 << 20,
        ),
    )(mask_all, x_all, *packed_params)


# ---------------------------------------------------------------------------
# Pooling head kernel: max(inter, vital) -> fc1 -> ReLU -> fc2
# ---------------------------------------------------------------------------
def head_kernel(enc_ref, w1_ref, b1_ref, w2_ref, b2_ref, o_ref):
    c = jnp.maximum(enc_ref[0], enc_ref[1])                                   # (B,128)
    c = jnp.dot(c, w1_ref[...], preferred_element_type=jnp.float32) + b1_ref[...]
    c = jnp.maximum(c, 0.0)
    # (B,2) output is a lane-sparse masked store; acceptable at this size.
    o_ref[...] = jnp.dot(c, w2_ref[...], preferred_element_type=jnp.float32) + b2_ref[...]


def pooling_head(enc_out, head_params):
    B = enc_out.shape[1]
    vmem = pl.BlockSpec(memory_space=pltpu.MemorySpace.VMEM)
    return pl.pallas_call(
        head_kernel,
        out_shape=jax.ShapeDtypeStruct((B, 2), jnp.float32),
        in_specs=[vmem] * 5,
        out_specs=vmem,
    )(enc_out, *head_params)


# ---------------------------------------------------------------------------
# Parameter initialization (deterministic, synthetic) and packing
# ---------------------------------------------------------------------------
def init_encoder_params(key, dim):
    ks = jax.random.split(key, 10)
    s = 0.05
    L = N_LAYERS
    return dict(
        embed_w=(jax.random.normal(ks[0], (dim, D_MODEL)) * s).astype(jnp.float32),
        embed_b=(jax.random.normal(ks[1], (1, D_MODEL)) * s).astype(jnp.float32),
        in_w=(jax.random.normal(ks[2], (L, 3, D_MODEL, D_MODEL)) * s).astype(jnp.float32),
        in_b=(jax.random.normal(ks[3], (L, 3, 1, D_MODEL)) * s).astype(jnp.float32),
        out_w=(jax.random.normal(ks[4], (L, D_MODEL, D_MODEL)) * s).astype(jnp.float32),
        out_b=(jax.random.normal(ks[5], (L, 1, D_MODEL)) * s).astype(jnp.float32),
        ln1_g=jnp.ones((L, 1, D_MODEL), jnp.float32),
        ln1_b=jnp.zeros((L, 1, D_MODEL), jnp.float32),
        ff1_w=(jax.random.normal(ks[6], (L, D_MODEL, D_FF)) * s).astype(jnp.float32),
        ff1_b=(jax.random.normal(ks[7], (L, 1, D_FF)) * s).astype(jnp.float32),
        ff2_w=(jax.random.normal(ks[8], (L, D_FF, D_MODEL)) * s).astype(jnp.float32),
        ff2_b=(jax.random.normal(ks[9], (L, 1, D_MODEL)) * s).astype(jnp.float32),
        ln2_g=jnp.ones((L, 1, D_MODEL), jnp.float32),
        ln2_b=jnp.zeros((L, 1, D_MODEL), jnp.float32),
    )


def init_head_params(key):
    ks = jax.random.split(key, 4)
    s = 0.05
    fc1_w = (jax.random.normal(ks[0], (D_MODEL, D_MODEL)) * s).astype(jnp.float32)
    fc1_b = (jax.random.normal(ks[1], (1, D_MODEL)) * s).astype(jnp.float32)
    fc2_w = (jax.random.normal(ks[2], (D_MODEL, 2)) * s).astype(jnp.float32)
    fc2_b = (jax.random.normal(ks[3], (1, 2)) * s).astype(jnp.float32)
    return (fc1_w, fc1_b, fc2_w, fc2_b)


def pack_encoder_params(enc_params_list, dpad):
    """Stack per-encoder params along a leading encoder axis, zero-pad the embed
    input dim to `dpad`, fuse Q/K/V into one (128,384) weight, and cast the large
    matmul weights to bf16 (f32 accumulation is requested at every dot site)."""
    def pad_embed(w):
        return jnp.pad(w, ((0, dpad - w.shape[0]), (0, 0)))

    def stack(name, bf16=False):
        a = jnp.stack([p[name] for p in enc_params_list], axis=0)
        return a.astype(jnp.bfloat16) if bf16 else a

    embed_w = jnp.stack([pad_embed(p["embed_w"]) for p in enc_params_list],
                        axis=0).astype(jnp.bfloat16)                      # (2,Dpad,128)
    embed_b = stack("embed_b")                                            # (2,1,128)
    qkv_w = jnp.stack(
        [jnp.concatenate([p["in_w"][:, i] for i in range(3)], axis=-1)
         for p in enc_params_list], axis=0).astype(jnp.bfloat16)          # (2,L,128,384)
    qkv_b = jnp.stack(
        [jnp.concatenate([p["in_b"][:, i] for i in range(3)], axis=-1)
         for p in enc_params_list], axis=0)                               # (2,L,1,384)
    return (
        embed_w, embed_b,
        qkv_w, qkv_b,
        stack("out_w", True), stack("out_b"),
        stack("ln1_g"), stack("ln1_b"),
        stack("ff1_w", True), stack("ff1_b"),
        stack("ff2_w", True), stack("ff2_b"),
        stack("ln2_g"), stack("ln2_b"),
    )


# ---------------------------------------------------------------------------
# Full model forward (matches LF_pool_Transformer.forward; `neg` is unused there)
# ---------------------------------------------------------------------------
def lf_pool_transformer_forward(pos, neg, packed_enc_params, head_params, dpad):
    inter, vital, inter_mask, vital_mask = pos
    del neg  # the PyTorch forward unpacks `neg` but never uses it

    def pad_feat(x):
        return jnp.pad(x, ((0, 0), (0, 0), (0, dpad - x.shape[-1])))

    x_all = jnp.stack([pad_feat(inter), pad_feat(vital)], axis=0)          # (2,B,S,Dpad)
    mask_all = jnp.stack([inter_mask, vital_mask], axis=0).astype(jnp.int32)   # (2,B)

    enc_out = fused_transformer_encoders(x_all, mask_all, packed_enc_params)   # (2,B,128)
    return pooling_head(enc_out, head_params)                                  # (B,2)


if __name__ == "__main__":
    key = jax.random.PRNGKey(0)
    k1, k2, k3, k4, k5 = jax.random.split(key, 5)

    B, S = 2, 8
    inter_dim, vital_dim = 4, 6
    dpad = 8  # common padded feature dim for both encoders

    inter = jax.random.normal(k1, (B, S, inter_dim), jnp.float32)
    vital = jax.random.normal(k2, (B, S, vital_dim), jnp.float32)
    inter_mask = jnp.array([5, 7], jnp.int32)   # valid key positions: j <= mask[b]
    vital_mask = jnp.array([3, 6], jnp.int32)

    pos = (inter, vital, inter_mask, vital_mask)
    neg = (inter, vital, inter_mask, vital_mask)  # unused by the forward pass

    inter_params = init_encoder_params(k3, inter_dim)
    vital_params = init_encoder_params(k4, vital_dim)
    packed_enc_params = pack_encoder_params([inter_params, vital_params], dpad)
    head_params = init_head_params(k5)

    out = lf_pool_transformer_forward(pos, neg, packed_enc_params, head_params, dpad)
    jax.block_until_ready(out)
    assert out.shape == (B, 2) and out.dtype == jnp.float32
    print("KERNEL_OK")
</pallas_src>

<mosaic_0001>
module attributes {stable_mosaic.version = 11 : i64} {
  func.func @fused_encoder_kernel(%arg0: i32, %arg1: memref<2x2xi32, #tpu.memory_space<smem>>, %arg2: memref<1x2x8x8xf32, #tpu.memory_space<vmem>>, %arg3: memref<1x8x128xbf16, #tpu.memory_space<vmem>>, %arg4: memref<1x1x128xf32, #tpu.memory_space<vmem>>, %arg5: memref<1x2x128x384xbf16, #tpu.memory_space<vmem>>, %arg6: memref<1x2x1x384xf32, #tpu.memory_space<vmem>>, %arg7: memref<1x2x128x128xbf16, #tpu.memory_space<vmem>>, %arg8: memref<1x2x1x128xf32, #tpu.memory_space<vmem>>, %arg9: memref<1x2x1x128xf32, #tpu.memory_space<vmem>>, %arg10: memref<1x2x1x128xf32, #tpu.memory_space<vmem>>, %arg11: memref<1x2x128x2048xbf16, #tpu.memory_space<vmem>>, %arg12: memref<1x2x1x2048xf32, #tpu.memory_space<vmem>>, %arg13: memref<1x2x2048x128xbf16, #tpu.memory_space<vmem>>, %arg14: memref<1x2x1x128xf32, #tpu.memory_space<vmem>>, %arg15: memref<1x2x1x128xf32, #tpu.memory_space<vmem>>, %arg16: memref<1x2x1x128xf32, #tpu.memory_space<vmem>>, %arg17: memref<1x2x128xf32, #tpu.memory_space<vmem>>) attributes {dimension_semantics = [#tpu.dimension_semantics<parallel>], iteration_bounds = array<i64: 2>, scalar_prefetch = 1 : i64, scratch_operands = 0 : i64, tpu.core_type = #tpu.core_type<tc>, window_params = [{transform_indices = @transform_0, window_bounds = array<i64: 1, 2, 8, 8>}, {transform_indices = @transform_1, window_bounds = array<i64: 1, 8, 128>}, {transform_indices = @transform_2, window_bounds = array<i64: 1, 1, 128>}, {transform_indices = @transform_3, window_bounds = array<i64: 1, 2, 128, 384>}, {transform_indices = @transform_4, window_bounds = array<i64: 1, 2, 1, 384>}, {transform_indices = @transform_5, window_bounds = array<i64: 1, 2, 128, 128>}, {transform_indices = @transform_6, window_bounds = array<i64: 1, 2, 1, 128>}, {transform_indices = @transform_7, window_bounds = array<i64: 1, 2, 1, 128>}, {transform_indices = @transform_8, window_bounds = array<i64: 1, 2, 1, 128>}, {transform_indices = @transform_9, window_bounds = array<i64: 1, 2, 128, 2048>}, {transform_indices = @transform_10, window_bounds = array<i64: 1, 2, 1, 2048>}, {transform_indices = @transform_11, window_bounds = array<i64: 1, 2, 2048, 128>}, {transform_indices = @transform_12, window_bounds = array<i64: 1, 2, 1, 128>}, {transform_indices = @transform_13, window_bounds = array<i64: 1, 2, 1, 128>}, {transform_indices = @transform_14, window_bounds = array<i64: 1, 2, 1, 128>}, {transform_indices = @transform_15, window_bounds = array<i64: 1, 2, 128>}]} {
    %cst = arith.constant 6.400000e+01 : f32
    %0 = math.sqrt %cst : f32
    %cst_0 = arith.constant 1.000000e+00 : f32
    %1 = arith.divf %cst_0, %0 : f32
    %c0 = arith.constant 0 : index
    %c0_1 = arith.constant 0 : index
    %c0_2 = arith.constant 0 : index
    %c0_3 = arith.constant 0 : index
    %2 = vector.load %arg2[%c0, %c0_1, %c0_2, %c0_3] : memref<1x2x8x8xf32, #tpu.memory_space<vmem>>, vector<1x2x8x8xf32>
    %3 = vector.shape_cast %2 : vector<1x2x8x8xf32> to vector<2x8x8xf32>
    %4 = vector.shape_cast %3 : vector<2x8x8xf32> to vector<16x8xf32>
    %5 = arith.truncf %4 : vector<16x8xf32> to vector<16x8xbf16>
    %c0_4 = arith.constant 0 : index
    %c0_5 = arith.constant 0 : index
    %c0_6 = arith.constant 0 : index
    %6 = vector.load %arg3[%c0_4, %c0_5, %c0_6] : memref<1x8x128xbf16, #tpu.memory_space<vmem>>, vector<1x8x128xbf16>
    %7 = vector.shape_cast %6 : vector<1x8x128xbf16> to vector<8x128xbf16>
    %cst_7 = arith.constant dense<0.000000e+00> : vector<16x128xf32>
    %8 = tpu.matmul %5, %7, %cst_7 {dimension_numbers = #tpu.dot_dimension_numbers<[1], [0], [0], [1], [0, 0, 1, 1], [], []>} : vector<16x8xbf16>, vector<8x128xbf16>, vector<16x128xf32> -> vector<16x128xf32>
    %c0_8 = arith.constant 0 : index
    %c0_9 = arith.constant 0 : index
    %c0_10 = arith.constant 0 : index
    %9 = vector.load %arg4[%c0_8, %c0_9, %c0_10] : memref<1x1x128xf32, #tpu.memory_space<vmem>>, vector<1x1x128xf32>
    %10 = vector.shape_cast %9 : vector<1x1x128xf32> to vector<1x128xf32>
    %11 = vector.broadcast %10 : vector<1x128xf32> to vector<16x128xf32>
    %12 = arith.addf %8, %11 : vector<16x128xf32>
    %cst_11 = arith.constant 0.000000e+00 : f32
    %13 = vector.broadcast %cst_11 : f32 to vector<16x128xf32>
    %14 = arith.maximumf %12, %13 : vector<16x128xf32>
    %c0_i32 = arith.constant 0 : i32
    %15 = vector.broadcast %c0_i32 : i32 to vector<2x1x1xi32>
    %16 = tpu.iota {dimensions = array<i32: 0>} : vector<2x1x1xi32>
    %c0_i32_12 = arith.constant 0 : i32
    %17 = vector.broadcast %c0_i32_12 : i32 to vector<2x1x1xi32>
    %18 = arith.cmpi eq, %16, %17 : vector<2x1x1xi32>
    %19 = arith.index_cast %arg0 : i32 to index
    %c0_13 = arith.constant 0 : index
    %20 = memref.load %arg1[%19, %c0_13] : memref<2x2xi32, #tpu.memory_space<smem>>
    %21 = vector.broadcast %20 : i32 to vector<2x1x1xi32>
    %22 = arith.select %18, %21, %15 : vector<2x1x1xi1>, vector<2x1x1xi32>
    %c1_i32 = arith.constant 1 : i32
    %23 = vector.broadcast %c1_i32 : i32 to vector<2x1x1xi32>
    %24 = arith.cmpi eq, %16, %23 : vector<2x1x1xi32>
    %25 = arith.index_cast %arg0 : i32 to index
    %c1 = arith.constant 1 : index
    %26 = memref.load %arg1[%25, %c1] : memref<2x2xi32, #tpu.memory_space<smem>>
    %27 = vector.broadcast %26 : i32 to vector<2x1x1xi32>
    %28 = arith.select %24, %27, %22 : vector<2x1x1xi1>, vector<2x1x1xi32>
    %29 = tpu.iota {dimensions = array<i32: 2>} : vector<2x1x8xi32>
    %30 = vector.broadcast %28 : vector<2x1x1xi32> to vector<2x1x8xi32>
    %31 = arith.cmpi sle, %29, %30 : vector<2x1x8xi32>
    %32 = arith.truncf %14 : vector<16x128xf32> to vector<16x128xbf16>
    %c0_14 = arith.constant 0 : index
    %c0_15 = arith.constant 0 : index
    %c0_16 = arith.constant 0 : index
    %c0_17 = arith.constant 0 : index
    %33 = vector.load %arg5[%c0_14, %c0_15, %c0_16, %c0_17] : memref<1x2x128x384xbf16, #tpu.memory_space<vmem>>, vector<1x1x128x384xbf16>
    %34 = vector.shape_cast %33 : vector<1x1x128x384xbf16> to vector<128x384xbf16>
    %cst_18 = arith.constant dense<0.000000e+00> : vector<16x384xf32>
    %35 = tpu.matmul %32, %34, %cst_18 {dimension_numbers = #tpu.dot_dimension_numbers<[1], [0], [0], [1], [0, 0, 1, 1], [], []>} : vector<16x128xbf16>, vector<128x384xbf16>, vector<16x384xf32> -> vector<16x384xf32>
    %c0_19 = arith.constant 0 : index
    %c0_20 = arith.constant 0 : index
    %c0_21 = arith.constant 0 : index
    %c0_22 = arith.constant 0 : index
    %36 = vector.load %arg6[%c0_19, %c0_20, %c0_21, %c0_22] : memref<1x2x1x384xf32, #tpu.memory_space<vmem>>, vector<1x1x1x384xf32>
    %37 = vector.shape_cast %36 : vector<1x1x1x384xf32> to vector<1x384xf32>
    %38 = vector.broadcast %37 : vector<1x384xf32> to vector<16x384xf32>
    %39 = arith.addf %35, %38 : vector<16x384xf32>
    %40 = vector.extract_strided_slice %39 {offsets = [0, 0], sizes = [16, 128], strides = [1, 1]} : vector<16x384xf32> to vector<16x128xf32>
    %41 = vector.shape_cast %40 : vector<16x128xf32> to vector<2x8x128xf32>
    %42 = vector.extract_strided_slice %39 {offsets = [0, 128], sizes = [16, 128], strides = [1, 1]} : vector<16x384xf32> to vector<16x128xf32>
    %43 = vector.shape_cast %42 : vector<16x128xf32> to vector<2x8x128xf32>
    %44 = vector.extract_strided_slice %39 {offsets = [0, 256], sizes = [16, 128], strides = [1, 1]} : vector<16x384xf32> to vector<16x128xf32>
    %45 = vector.shape_cast %44 : vector<16x128xf32> to vector<2x8x128xf32>
    %46 = vector.extract_strided_slice %41 {offsets = [0, 0, 0], sizes = [2, 8, 64], strides = [1, 1, 1]} : vector<2x8x128xf32> to vector<2x8x64xf32>
    %47 = vector.extract_strided_slice %43 {offsets = [0, 0, 0], sizes = [2, 8, 64], strides = [1, 1, 1]} : vector<2x8x128xf32> to vector<2x8x64xf32>
    %48 = vector.extract_strided_slice %45 {offsets = [0, 0, 0], sizes = [2, 8, 64], strides = [1, 1, 1]} : vector<2x8x128xf32> to vector<2x8x64xf32>
    "tpu.trace_start"() <{level = 10 : i32, message = "bqd,bkd->bqk"}> : () -> ()
    %cst_23 = arith.constant dense<0.000000e+00> : vector<2x8x8xf32>
    %49 = tpu.matmul %46, %47, %cst_23 {dimension_numbers = #tpu.dot_dimension_numbers<[2], [2], [1], [1], [0, 0, 0, 1, 1, 1], [0], [0]>} : vector<2x8x64xf32>, vector<2x8x64xf32>, vector<2x8x8xf32> -> vector<2x8x8xf32>
    "tpu.trace_stop"() : () -> ()
    %50 = vector.broadcast %1 : f32 to vector<2x8x8xf32>
    %51 = arith.mulf %49, %50 : vector<2x8x8xf32>
    %cst_24 = arith.constant -1.000000e+30 : f32
    %52 = vector.shape_cast %31 : vector<2x1x8xi1> to vector<2x1x8xi1>
    %53 = vector.broadcast %52 : vector<2x1x8xi1> to vector<2x8x8xi1>
    %54 = vector.broadcast %cst_24 : f32 to vector<2x8x8xf32>
    %55 = arith.select %53, %51, %54 : vector<2x8x8xi1>, vector<2x8x8xf32>
    %cst_25 = arith.constant dense<0xFF800000> : vector<2x8xf32>
    %56 = vector.multi_reduction <maximumf>, %55, %cst_25 [2] : vector<2x8x8xf32> to vector<2x8xf32>
    %57 = vector.shape_cast %56 : vector<2x8xf32> to vector<2x8x1xf32>
    %58 = vector.broadcast %57 : vector<2x8x1xf32> to vector<2x8x8xf32>
    %59 = arith.subf %55, %58 : vector<2x8x8xf32>
    %60 = math.exp %59 : vector<2x8x8xf32>
    %cst_26 = arith.constant dense<0.000000e+00> : vector<2x8xf32>
    %61 = vector.multi_reduction <add>, %60, %cst_26 [2] : vector<2x8x8xf32> to vector<2x8xf32>
    %62 = vector.shape_cast %61 : vector<2x8xf32> to vector<2x8x1xf32>
    %63 = tpu.reciprocal %62 {approx = true} : vector<2x8x1xf32> -> vector<2x8x1xf32>
    %64 = vector.broadcast %63 : vector<2x8x1xf32> to vector<2x8x8xf32>
    %65 = arith.mulf %60, %64 : vector<2x8x8xf32>
    "tpu.trace_start"() <{level = 10 : i32, message = "bqk,bkd->bqd"}> : () -> ()
    %cst_27 = arith.constant dense<0.000000e+00> : vector<2x8x64xf32>
    %66 = tpu.matmul %65, %48, %cst_27 {dimension_numbers = #tpu.dot_dimension_numbers<[2], [1], [1], [2], [0, 0, 0, 1, 1, 2], [0], [0]>} : vector<2x8x8xf32>, vector<2x8x64xf32>, vector<2x8x64xf32> -> vector<2x8x64xf32>
    "tpu.trace_stop"() : () -> ()
    %67 = vector.extract_strided_slice %41 {offsets = [0, 0, 64], sizes = [2, 8, 64], strides = [1, 1, 1]} : vector<2x8x128xf32> to vector<2x8x64xf32>
    %68 = vector.extract_strided_slice %43 {offsets = [0, 0, 64], sizes = [2, 8, 64], strides = [1, 1, 1]} : vector<2x8x128xf32> to vector<2x8x64xf32>
    %69 = vector.extract_strided_slice %45 {offsets = [0, 0, 64], sizes = [2, 8, 64], strides = [1, 1, 1]} : vector<2x8x128xf32> to vector<2x8x64xf32>
    "tpu.trace_start"() <{level = 10 : i32, message = "bqd,bkd->bqk"}> : () -> ()
    %cst_28 = arith.constant dense<0.000000e+00> : vector<2x8x8xf32>
    %70 = tpu.matmul %67, %68, %cst_28 {dimension_numbers = #tpu.dot_dimension_numbers<[2], [2], [1], [1], [0, 0, 0, 1, 1, 1], [0], [0]>} : vector<2x8x64xf32>, vector<2x8x64xf32>, vector<2x8x8xf32> -> vector<2x8x8xf32>
    "tpu.trace_stop"() : () -> ()
    %71 = vector.broadcast %1 : f32 to vector<2x8x8xf32>
    %72 = arith.mulf %70, %71 : vector<2x8x8xf32>
    %cst_29 = arith.constant -1.000000e+30 : f32
    %73 = vector.shape_cast %31 : vector<2x1x8xi1> to vector<2x1x8xi1>
    %74 = vector.broadcast %73 : vector<2x1x8xi1> to vector<2x8x8xi1>
    %75 = vector.broadcast %cst_29 : f32 to vector<2x8x8xf32>
    %76 = arith.select %74, %72, %75 : vector<2x8x8xi1>, vector<2x8x8xf32>
    %cst_30 = arith.constant dense<0xFF800000> : vector<2x8xf32>
    %77 = vector.multi_reduction <maximumf>, %76, %cst_30 [2] : vector<2x8x8xf32> to vector<2x8xf32>
    %78 = vector.shape_cast %77 : vector<2x8xf32> to vector<2x8x1xf32>
    %79 = vector.broadcast %78 : vector<2x8x1xf32> to vector<2x8x8xf32>
    %80 = arith.subf %76, %79 : vector<2x8x8xf32>
    %81 = math.exp %80 : vector<2x8x8xf32>
    %cst_31 = arith.constant dense<0.000000e+00> : vector<2x8xf32>
    %82 = vector.multi_reduction <add>, %81, %cst_31 [2] : vector<2x8x8xf32> to vector<2x8xf32>
    %83 = vector.shape_cast %82 : vector<2x8xf32> to vector<2x8x1xf32>
    %84 = tpu.reciprocal %83 {approx = true} : vector<2x8x1xf32> -> vector<2x8x1xf32>
    %85 = vector.broadcast %84 : vector<2x8x1xf32> to vector<2x8x8xf32>
    %86 = arith.mulf %81, %85 : vector<2x8x8xf32>
    "tpu.trace_start"() <{level = 10 : i32, message = "bqk,bkd->bqd"}> : () -> ()
    %cst_32 = arith.constant dense<0.000000e+00> : vector<2x8x64xf32>
    %87 = tpu.matmul %86, %69, %cst_32 {dimension_numbers = #tpu.dot_dimension_numbers<[2], [1], [1], [2], [0, 0, 0, 1, 1, 2], [0], [0]>} : vector<2x8x8xf32>, vector<2x8x64xf32>, vector<2x8x64xf32> -> vector<2x8x64xf32>
    "tpu.trace_stop"() : () -> ()
    %88 = tpu.concatenate %66, %87 in 2 : vector<2x8x64xf32>, vector<2x8x64xf32> -> vector<2x8x128xf32>
    %89 = vector.shape_cast %88 : vector<2x8x128xf32> to vector<16x128xf32>
    %90 = arith.truncf %89 : vector<16x128xf32> to vector<16x128xbf16>
    %c0_33 = arith.constant 0 : index
    %c0_34 = arith.constant 0 : index
    %c0_35 = arith.constant 0 : index
    %c0_36 = arith.constant 0 : index
    %91 = vector.load %arg7[%c0_33, %c0_34, %c0_35, %c0_36] : memref<1x2x128x128xbf16, #tpu.memory_space<vmem>>, vector<1x1x128x128xbf16>
    %92 = vector.shape_cast %91 : vector<1x1x128x128xbf16> to vector<128x128xbf16>
    %cst_37 = arith.constant dense<0.000000e+00> : vector<16x128xf32>
    %93 = tpu.matmul %90, %92, %cst_37 {dimension_numbers = #tpu.dot_dimension_numbers<[1], [0], [0], [1], [0, 0, 1, 1], [], []>} : vector<16x128xbf16>, vector<128x128xbf16>, vector<16x128xf32> -> vector<16x128xf32>
    %c0_38 = arith.constant 0 : index
    %c0_39 = arith.constant 0 : index
    %c0_40 = arith.constant 0 : index
    %c0_41 = arith.constant 0 : index
    %94 = vector.load %arg8[%c0_38, %c0_39, %c0_40, %c0_41] : memref<1x2x1x128xf32, #tpu.memory_space<vmem>>, vector<1x1x1x128xf32>
    %95 = vector.shape_cast %94 : vector<1x1x1x128xf32> to vector<1x128xf32>
    %96 = vector.broadcast %95 : vector<1x128xf32> to vector<16x128xf32>
    %97 = arith.addf %93, %96 : vector<16x128xf32>
    %98 = arith.addf %14, %97 : vector<16x128xf32>
    %c0_42 = arith.constant 0 : index
    %c0_43 = arith.constant 0 : index
    %c0_44 = arith.constant 0 : index
    %c0_45 = arith.constant 0 : index
    %99 = vector.load %arg9[%c0_42, %c0_43, %c0_44, %c0_45] : memref<1x2x1x128xf32, #tpu.memory_space<vmem>>, vector<1x1x1x128xf32>
    %100 = vector.shape_cast %99 : vector<1x1x1x128xf32> to vector<1x128xf32>
    %c0_46 = arith.constant 0 : index
    %c0_47 = arith.constant 0 : index
    %c0_48 = arith.constant 0 : index
    %c0_49 = arith.constant 0 : index
    %101 = vector.load %arg10[%c0_46, %c0_47, %c0_48, %c0_49] : memref<1x2x1x128xf32, #tpu.memory_space<vmem>>, vector<1x1x1x128xf32>
    %102 = vector.shape_cast %101 : vector<1x1x1x128xf32> to vector<1x128xf32>
    %cst_50 = arith.constant dense<0.000000e+00> : vector<16xf32>
    %103 = vector.multi_reduction <add>, %98, %cst_50 [1] : vector<16x128xf32> to vector<16xf32>
    %104 = vector.shape_cast %103 : vector<16xf32> to vector<16x1xf32>
    %cst_51 = arith.constant 1.280000e+02 : f32
    %105 = vector.broadcast %cst_51 : f32 to vector<16x1xf32>
    %106 = arith.divf %104, %105 : vector<16x1xf32>
    %107 = vector.broadcast %106 : vector<16x1xf32> to vector<16x128xf32>
    %108 = arith.subf %98, %107 : vector<16x128xf32>
    %109 = vector.broadcast %106 : vector<16x1xf32> to vector<16x128xf32>
    %110 = arith.subf %98, %109 : vector<16x128xf32>
    %111 = arith.mulf %108, %110 : vector<16x128xf32>
    %cst_52 = arith.constant dense<0.000000e+00> : vector<16xf32>
    %112 = vector.multi_reduction <add>, %111, %cst_52 [1] : vector<16x128xf32> to vector<16xf32>
    %113 = vector.shape_cast %112 : vector<16xf32> to vector<16x1xf32>
    %cst_53 = arith.constant 1.280000e+02 : f32
    %114 = vector.broadcast %cst_53 : f32 to vector<16x1xf32>
    %115 = arith.divf %113, %114 : vector<16x1xf32>
    %116 = vector.broadcast %106 : vector<16x1xf32> to vector<16x128xf32>
    %117 = arith.subf %98, %116 : vector<16x128xf32>
    %cst_54 = arith.constant 9.99999974E-6 : f32
    %118 = vector.broadcast %cst_54 : f32 to vector<16x1xf32>
    %119 = arith.addf %115, %118 : vector<16x1xf32>
    %120 = math.rsqrt %119 : vector<16x1xf32>
    %121 = vector.broadcast %120 : vector<16x1xf32> to vector<16x128xf32>
    %122 = arith.mulf %117, %121 : vector<16x128xf32>
    %123 = vector.broadcast %100 : vector<1x128xf32> to vector<16x128xf32>
    %124 = arith.mulf %122, %123 : vector<16x128xf32>
    %125 = vector.broadcast %102 : vector<1x128xf32> to vector<16x128xf32>
    %126 = arith.addf %124, %125 : vector<16x128xf32>
    %127 = arith.truncf %126 : vector<16x128xf32> to vector<16x128xbf16>
    %c0_55 = arith.constant 0 : index
    %c0_56 = arith.constant 0 : index
    %c0_57 = arith.constant 0 : index
    %c0_58 = arith.constant 0 : index
    %128 = vector.load %arg11[%c0_55, %c0_56, %c0_57, %c0_58] : memref<1x2x128x2048xbf16, #tpu.memory_space<vmem>>, vector<1x1x128x2048xbf16>
    %129 = vector.shape_cast %128 : vector<1x1x128x2048xbf16> to vector<128x2048xbf16>
    %cst_59 = arith.constant dense<0.000000e+00> : vector<16x2048xf32>
    %130 = tpu.matmul %127, %129, %cst_59 {dimension_numbers = #tpu.dot_dimension_numbers<[1], [0], [0], [1], [0, 0, 1, 1], [], []>} : vector<16x128xbf16>, vector<128x2048xbf16>, vector<16x2048xf32> -> vector<16x2048xf32>
    %c0_60 = arith.constant 0 : index
    %c0_61 = arith.constant 0 : index
    %c0_62 = arith.constant 0 : index
    %c0_63 = arith.constant 0 : index
    %131 = vector.load %arg12[%c0_60, %c0_61, %c0_62, %c0_63] : memref<1x2x1x2048xf32, #tpu.memory_space<vmem>>, vector<1x1x1x2048xf32>
    %132 = vector.shape_cast %131 : vector<1x1x1x2048xf32> to vector<1x2048xf32>
    %133 = vector.broadcast %132 : vector<1x2048xf32> to vector<16x2048xf32>
    %134 = arith.addf %130, %133 : vector<16x2048xf32>
    %cst_64 = arith.constant 0.000000e+00 : f32
    %135 = vector.broadcast %cst_64 : f32 to vector<16x2048xf32>
    %136 = arith.maximumf %134, %135 : vector<16x2048xf32>
    %137 = arith.truncf %136 : vector<16x2048xf32> to vector<16x2048xbf16>
    %c0_65 = arith.constant 0 : index
    %c0_66 = arith.constant 0 : index
    %c0_67 = arith.constant 0 : index
    %c0_68 = arith.constant 0 : index
    %138 = vector.load %arg13[%c0_65, %c0_66, %c0_67, %c0_68] : memref<1x2x2048x128xbf16, #tpu.memory_space<vmem>>, vector<1x1x2048x128xbf16>
    %139 = vector.shape_cast %138 : vector<1x1x2048x128xbf16> to vector<2048x128xbf16>
    %cst_69 = arith.constant dense<0.000000e+00> : vector<16x128xf32>
    %140 = tpu.matmul %137, %139, %cst_69 {dimension_numbers = #tpu.dot_dimension_numbers<[1], [0], [0], [1], [0, 0, 1, 1], [], []>} : vector<16x2048xbf16>, vector<2048x128xbf16>, vector<16x128xf32> -> vector<16x128xf32>
    %c0_70 = arith.constant 0 : index
    %c0_71 = arith.constant 0 : index
    %c0_72 = arith.constant 0 : index
    %c0_73 = arith.constant 0 : index
    %141 = vector.load %arg14[%c0_70, %c0_71, %c0_72, %c0_73] : memref<1x2x1x128xf32, #tpu.memory_space<vmem>>, vector<1x1x1x128xf32>
    %142 = vector.shape_cast %141 : vector<1x1x1x128xf32> to vector<1x128xf32>
    %143 = vector.broadcast %142 : vector<1x128xf32> to vector<16x128xf32>
    %144 = arith.addf %140, %143 : vector<16x128xf32>
    %145 = arith.addf %126, %144 : vector<16x128xf32>
    %c0_74 = arith.constant 0 : index
    %c0_75 = arith.constant 0 : index
    %c0_76 = arith.constant 0 : index
    %c0_77 = arith.constant 0 : index
    %146 = vector.load %arg15[%c0_74, %c0_75, %c0_76, %c0_77] : memref<1x2x1x128xf32, #tpu.memory_space<vmem>>, vector<1x1x1x128xf32>
    %147 = vector.shape_cast %146 : vector<1x1x1x128xf32> to vector<1x128xf32>
    %c0_78 = arith.constant 0 : index
    %c0_79 = arith.constant 0 : index
    %c0_80 = arith.constant 0 : index
    %c0_81 = arith.constant 0 : index
    %148 = vector.load %arg16[%c0_78, %c0_79, %c0_80, %c0_81] : memref<1x2x1x128xf32, #tpu.memory_space<vmem>>, vector<1x1x1x128xf32>
    %149 = vector.shape_cast %148 : vector<1x1x1x128xf32> to vector<1x128xf32>
    %cst_82 = arith.constant dense<0.000000e+00> : vector<16xf32>
    %150 = vector.multi_reduction <add>, %145, %cst_82 [1] : vector<16x128xf32> to vector<16xf32>
    %151 = vector.shape_cast %150 : vector<16xf32> to vector<16x1xf32>
    %cst_83 = arith.constant 1.280000e+02 : f32
    %152 = vector.broadcast %cst_83 : f32 to vector<16x1xf32>
    %153 = arith.divf %151, %152 : vector<16x1xf32>
    %154 = vector.broadcast %153 : vector<16x1xf32> to vector<16x128xf32>
    %155 = arith.subf %145, %154 : vector<16x128xf32>
    %156 = vector.broadcast %153 : vector<16x1xf32> to vector<16x128xf32>
    %157 = arith.subf %145, %156 : vector<16x128xf32>
    %158 = arith.mulf %155, %157 : vector<16x128xf32>
    %cst_84 = arith.constant dense<0.000000e+00> : vector<16xf32>
    %159 = vector.multi_reduction <add>, %158, %cst_84 [1] : vector<16x128xf32> to vector<16xf32>
    %160 = vector.shape_cast %159 : vector<16xf32> to vector<16x1xf32>
    %cst_85 = arith.constant 1.280000e+02 : f32
    %161 = vector.broadcast %cst_85 : f32 to vector<16x1xf32>
    %162 = arith.divf %160, %161 : vector<16x1xf32>
    %163 = vector.broadcast %153 : vector<16x1xf32> to vector<16x128xf32>
    %164 = arith.subf %145, %163 : vector<16x128xf32>
    %cst_86 = arith.constant 9.99999974E-6 : f32
    %165 = vector.broadcast %cst_86 : f32 to vector<16x1xf32>
    %166 = arith.addf %162, %165 : vector<16x1xf32>
    %167 = math.rsqrt %166 : vector<16x1xf32>
    %168 = vector.broadcast %167 : vector<16x1xf32> to vector<16x128xf32>
    %169 = arith.mulf %164, %168 : vector<16x128xf32>
    %170 = vector.broadcast %147 : vector<1x128xf32> to vector<16x128xf32>
    %171 = arith.mulf %169, %170 : vector<16x128xf32>
    %172 = vector.broadcast %149 : vector<1x128xf32> to vector<16x128xf32>
    %173 = arith.addf %171, %172 : vector<16x128xf32>
    %174 = arith.truncf %173 : vector<16x128xf32> to vector<16x128xbf16>
    %c0_87 = arith.constant 0 : index
    %c1_88 = arith.constant 1 : index
    %c0_89 = arith.constant 0 : index
    %c0_90 = arith.constant 0 : index
    %175 = vector.load %arg5[%c0_87, %c1_88, %c0_89, %c0_90] : memref<1x2x128x384xbf16, #tpu.memory_space<vmem>>, vector<1x1x128x384xbf16>
    %176 = vector.shape_cast %175 : vector<1x1x128x384xbf16> to vector<128x384xbf16>
    %cst_91 = arith.constant dense<0.000000e+00> : vector<16x384xf32>
    %177 = tpu.matmul %174, %176, %cst_91 {dimension_numbers = #tpu.dot_dimension_numbers<[1], [0], [0], [1], [0, 0, 1, 1], [], []>} : vector<16x128xbf16>, vector<128x384xbf16>, vector<16x384xf32> -> vector<16x384xf32>
    %c0_92 = arith.constant 0 : index
    %c1_93 = arith.constant 1 : index
    %c0_94 = arith.constant 0 : index
    %c0_95 = arith.constant 0 : index
    %178 = vector.load %arg6[%c0_92, %c1_93, %c0_94, %c0_95] : memref<1x2x1x384xf32, #tpu.memory_space<vmem>>, vector<1x1x1x384xf32>
    %179 = vector.shape_cast %178 : vector<1x1x1x384xf32> to vector<1x384xf32>
    %180 = vector.broadcast %179 : vector<1x384xf32> to vector<16x384xf32>
    %181 = arith.addf %177, %180 : vector<16x384xf32>
    %182 = vector.extract_strided_slice %181 {offsets = [0, 0], sizes = [16, 128], strides = [1, 1]} : vector<16x384xf32> to vector<16x128xf32>
    %183 = vector.shape_cast %182 : vector<16x128xf32> to vector<2x8x128xf32>
    %184 = vector.extract_strided_slice %181 {offsets = [0, 128], sizes = [16, 128], strides = [1, 1]} : vector<16x384xf32> to vector<16x128xf32>
    %185 = vector.shape_cast %184 : vector<16x128xf32> to vector<2x8x128xf32>
    %186 = vector.extract_strided_slice %181 {offsets = [0, 256], sizes = [16, 128], strides = [1, 1]} : vector<16x384xf32> to vector<16x128xf32>
    %187 = vector.shape_cast %186 : vector<16x128xf32> to vector<2x8x128xf32>
    %188 = vector.extract_strided_slice %183 {offsets = [0, 0, 0], sizes = [2, 8, 64], strides = [1, 1, 1]} : vector<2x8x128xf32> to vector<2x8x64xf32>
    %189 = vector.extract_strided_slice %185 {offsets = [0, 0, 0], sizes = [2, 8, 64], strides = [1, 1, 1]} : vector<2x8x128xf32> to vector<2x8x64xf32>
    %190 = vector.extract_strided_slice %187 {offsets = [0, 0, 0], sizes = [2, 8, 64], strides = [1, 1, 1]} : vector<2x8x128xf32> to vector<2x8x64xf32>
    "tpu.trace_start"() <{level = 10 : i32, message = "bqd,bkd->bqk"}> : () -> ()
    %cst_96 = arith.constant dense<0.000000e+00> : vector<2x8x8xf32>
    %191 = tpu.matmul %188, %189, %cst_96 {dimension_numbers = #tpu.dot_dimension_numbers<[2], [2], [1], [1], [0, 0, 0, 1, 1, 1], [0], [0]>} : vector<2x8x64xf32>, vector<2x8x64xf32>, vector<2x8x8xf32> -> vector<2x8x8xf32>
    "tpu.trace_stop"() : () -> ()
    %192 = vector.broadcast %1 : f32 to vector<2x8x8xf32>
    %193 = arith.mulf %191, %192 : vector<2x8x8xf32>
    %cst_97 = arith.constant -1.000000e+30 : f32
    %194 = vector.shape_cast %31 : vector<2x1x8xi1> to vector<2x1x8xi1>
    %195 = vector.broadcast %194 : vector<2x1x8xi1> to vector<2x8x8xi1>
    %196 = vector.broadcast %cst_97 : f32 to vector<2x8x8xf32>
    %197 = arith.select %195, %193, %196 : vector<2x8x8xi1>, vector<2x8x8xf32>
    %cst_98 = arith.constant dense<0xFF800000> : vector<2x8xf32>
    %198 = vector.multi_reduction <maximumf>, %197, %cst_98 [2] : vector<2x8x8xf32> to vector<2x8xf32>
    %199 = vector.shape_cast %198 : vector<2x8xf32> to vector<2x8x1xf32>
    %200 = vector.broadcast %199 : vector<2x8x1xf32> to vector<2x8x8xf32>
    %201 = arith.subf %197, %200 : vector<2x8x8xf32>
    %202 = math.exp %201 : vector<2x8x8xf32>
    %cst_99 = arith.constant dense<0.000000e+00> : vector<2x8xf32>
    %203 = vector.multi_reduction <add>, %202, %cst_99 [2] : vector<2x8x8xf32> to vector<2x8xf32>
    %204 = vector.shape_cast %203 : vector<2x8xf32> to vector<2x8x1xf32>
    %205 = tpu.reciprocal %204 {approx = true} : vector<2x8x1xf32> -> vector<2x8x1xf32>
    %206 = vector.broadcast %205 : vector<2x8x1xf32> to vector<2x8x8xf32>
    %207 = arith.mulf %202, %206 : vector<2x8x8xf32>
    "tpu.trace_start"() <{level = 10 : i32, message = "bqk,bkd->bqd"}> : () -> ()
    %cst_100 = arith.constant dense<0.000000e+00> : vector<2x8x64xf32>
    %208 = tpu.matmul %207, %190, %cst_100 {dimension_numbers = #tpu.dot_dimension_numbers<[2], [1], [1], [2], [0, 0, 0, 1, 1, 2], [0], [0]>} : vector<2x8x8xf32>, vector<2x8x64xf32>, vector<2x8x64xf32> -> vector<2x8x64xf32>
    "tpu.trace_stop"() : () -> ()
    %209 = vector.extract_strided_slice %183 {offsets = [0, 0, 64], sizes = [2, 8, 64], strides = [1, 1, 1]} : vector<2x8x128xf32> to vector<2x8x64xf32>
    %210 = vector.extract_strided_slice %185 {offsets = [0, 0, 64], sizes = [2, 8, 64], strides = [1, 1, 1]} : vector<2x8x128xf32> to vector<2x8x64xf32>
    %211 = vector.extract_strided_slice %187 {offsets = [0, 0, 64], sizes = [2, 8, 64], strides = [1, 1, 1]} : vector<2x8x128xf32> to vector<2x8x64xf32>
    "tpu.trace_start"() <{level = 10 : i32, message = "bqd,bkd->bqk"}> : () -> ()
    %cst_101 = arith.constant dense<0.000000e+00> : vector<2x8x8xf32>
    %212 = tpu.matmul %209, %210, %cst_101 {dimension_numbers = #tpu.dot_dimension_numbers<[2], [2], [1], [1], [0, 0, 0, 1, 1, 1], [0], [0]>} : vector<2x8x64xf32>, vector<2x8x64xf32>, vector<2x8x8xf32> -> vector<2x8x8xf32>
    "tpu.trace_stop"() : () -> ()
    %213 = vector.broadcast %1 : f32 to vector<2x8x8xf32>
    %214 = arith.mulf %212, %213 : vector<2x8x8xf32>
    %cst_102 = arith.constant -1.000000e+30 : f32
    %215 = vector.shape_cast %31 : vector<2x1x8xi1> to vector<2x1x8xi1>
    %216 = vector.broadcast %215 : vector<2x1x8xi1> to vector<2x8x8xi1>
    %217 = vector.broadcast %cst_102 : f32 to vector<2x8x8xf32>
    %218 = arith.select %216, %214, %217 : vector<2x8x8xi1>, vector<2x8x8xf32>
    %cst_103 = arith.constant dense<0xFF800000> : vector<2x8xf32>
    %219 = vector.multi_reduction <maximumf>, %218, %cst_103 [2] : vector<2x8x8xf32> to vector<2x8xf32>
    %220 = vector.shape_cast %219 : vector<2x8xf32> to vector<2x8x1xf32>
    %221 = vector.broadcast %220 : vector<2x8x1xf32> to vector<2x8x8xf32>
    %222 = arith.subf %218, %221 : vector<2x8x8xf32>
    %223 = math.exp %222 : vector<2x8x8xf32>
    %cst_104 = arith.constant dense<0.000000e+00> : vector<2x8xf32>
    %224 = vector.multi_reduction <add>, %223, %cst_104 [2] : vector<2x8x8xf32> to vector<2x8xf32>
    %225 = vector.shape_cast %224 : vector<2x8xf32> to vector<2x8x1xf32>
    %226 = tpu.reciprocal %225 {approx = true} : vector<2x8x1xf32> -> vector<2x8x1xf32>
    %227 = vector.broadcast %226 : vector<2x8x1xf32> to vector<2x8x8xf32>
    %228 = arith.mulf %223, %227 : vector<2x8x8xf32>
    "tpu.trace_start"() <{level = 10 : i32, message = "bqk,bkd->bqd"}> : () -> ()
    %cst_105 = arith.constant dense<0.000000e+00> : vector<2x8x64xf32>
    %229 = tpu.matmul %228, %211, %cst_105 {dimension_numbers = #tpu.dot_dimension_numbers<[2], [1], [1], [2], [0, 0, 0, 1, 1, 2], [0], [0]>} : vector<2x8x8xf32>, vector<2x8x64xf32>, vector<2x8x64xf32> -> vector<2x8x64xf32>
    "tpu.trace_stop"() : () -> ()
    %230 = tpu.concatenate %208, %229 in 2 : vector<2x8x64xf32>, vector<2x8x64xf32> -> vector<2x8x128xf32>
    %231 = vector.shape_cast %230 : vector<2x8x128xf32> to vector<16x128xf32>
    %232 = arith.truncf %231 : vector<16x128xf32> to vector<16x128xbf16>
    %c0_106 = arith.constant 0 : index
    %c1_107 = arith.constant 1 : index
    %c0_108 = arith.constant 0 : index
    %c0_109 = arith.constant 0 : index
    %233 = vector.load %arg7[%c0_106, %c1_107, %c0_108, %c0_109] : memref<1x2x128x128xbf16, #tpu.memory_space<vmem>>, vector<1x1x128x128xbf16>
    %234 = vector.shape_cast %233 : vector<1x1x128x128xbf16> to vector<128x128xbf16>
    %cst_110 = arith.constant dense<0.000000e+00> : vector<16x128xf32>
    %235 = tpu.matmul %232, %234, %cst_110 {dimension_numbers = #tpu.dot_dimension_numbers<[1], [0], [0], [1], [0, 0, 1, 1], [], []>} : vector<16x128xbf16>, vector<128x128xbf16>, vector<16x128xf32> -> vector<16x128xf32>
    %c0_111 = arith.constant 0 : index
    %c1_112 = arith.constant 1 : index
    %c0_113 = arith.constant 0 : index
    %c0_114 = arith.constant 0 : index
    %236 = vector.load %arg8[%c0_111, %c1_112, %c0_113, %c0_114] : memref<1x2x1x128xf32, #tpu.memory_space<vmem>>, vector<1x1x1x128xf32>
    %237 = vector.shape_cast %236 : vector<1x1x1x128xf32> to vector<1x128xf32>
    %238 = vector.broadcast %237 : vector<1x128xf32> to vector<16x128xf32>
    %239 = arith.addf %235, %238 : vector<16x128xf32>
    %240 = arith.addf %173, %239 : vector<16x128xf32>
    %c0_115 = arith.constant 0 : index
    %c1_116 = arith.constant 1 : index
    %c0_117 = arith.constant 0 : index
    %c0_118 = arith.constant 0 : index
    %241 = vector.load %arg9[%c0_115, %c1_116, %c0_117, %c0_118] : memref<1x2x1x128xf32, #tpu.memory_space<vmem>>, vector<1x1x1x128xf32>
    %242 = vector.shape_cast %241 : vector<1x1x1x128xf32> to vector<1x128xf32>
    %c0_119 = arith.constant 0 : index
    %c1_120 = arith.constant 1 : index
    %c0_121 = arith.constant 0 : index
    %c0_122 = arith.constant 0 : index
    %243 = vector.load %arg10[%c0_119, %c1_120, %c0_121, %c0_122] : memref<1x2x1x128xf32, #tpu.memory_space<vmem>>, vector<1x1x1x128xf32>
    %244 = vector.shape_cast %243 : vector<1x1x1x128xf32> to vector<1x128xf32>
    %cst_123 = arith.constant dense<0.000000e+00> : vector<16xf32>
    %245 = vector.multi_reduction <add>, %240, %cst_123 [1] : vector<16x128xf32> to vector<16xf32>
    %246 = vector.shape_cast %245 : vector<16xf32> to vector<16x1xf32>
    %cst_124 = arith.constant 1.280000e+02 : f32
    %247 = vector.broadcast %cst_124 : f32 to vector<16x1xf32>
    %248 = arith.divf %246, %247 : vector<16x1xf32>
    %249 = vector.broadcast %248 : vector<16x1xf32> to vector<16x128xf32>
    %250 = arith.subf %240, %249 : vector<16x128xf32>
    %251 = vector.broadcast %248 : vector<16x1xf32> to vector<16x128xf32>
    %252 = arith.subf %240, %251 : vector<16x128xf32>
    %253 = arith.mulf %250, %252 : vector<16x128xf32>
    %cst_125 = arith.constant dense<0.000000e+00> : vector<16xf32>
    %254 = vector.multi_reduction <add>, %253, %cst_125 [1] : vector<16x128xf32> to vector<16xf32>
    %255 = vector.shape_cast %254 : vector<16xf32> to vector<16x1xf32>
    %cst_126 = arith.constant 1.280000e+02 : f32
    %256 = vector.broadcast %cst_126 : f32 to vector<16x1xf32>
    %257 = arith.divf %255, %256 : vector<16x1xf32>
    %258 = vector.broadcast %248 : vector<16x1xf32> to vector<16x128xf32>
    %259 = arith.subf %240, %258 : vector<16x128xf32>
    %cst_127 = arith.constant 9.99999974E-6 : f32
    %260 = vector.broadcast %cst_127 : f32 to vector<16x1xf32>
    %261 = arith.addf %257, %260 : vector<16x1xf32>
    %262 = math.rsqrt %261 : vector<16x1xf32>
    %263 = vector.broadcast %262 : vector<16x1xf32> to vector<16x128xf32>
    %264 = arith.mulf %259, %263 : vector<16x128xf32>
    %265 = vector.broadcast %242 : vector<1x128xf32> to vector<16x128xf32>
    %266 = arith.mulf %264, %265 : vector<16x128xf32>
    %267 = vector.broadcast %244 : vector<1x128xf32> to vector<16x128xf32>
    %268 = arith.addf %266, %267 : vector<16x128xf32>
    %269 = arith.truncf %268 : vector<16x128xf32> to vector<16x128xbf16>
    %c0_128 = arith.constant 0 : index
    %c1_129 = arith.constant 1 : index
    %c0_130 = arith.constant 0 : index
    %c0_131 = arith.constant 0 : index
    %270 = vector.load %arg11[%c0_128, %c1_129, %c0_130, %c0_131] : memref<1x2x128x2048xbf16, #tpu.memory_space<vmem>>, vector<1x1x128x2048xbf16>
    %271 = vector.shape_cast %270 : vector<1x1x128x2048xbf16> to vector<128x2048xbf16>
    %cst_132 = arith.constant dense<0.000000e+00> : vector<16x2048xf32>
    %272 = tpu.matmul %269, %271, %cst_132 {dimension_numbers = #tpu.dot_dimension_numbers<[1], [0], [0], [1], [0, 0, 1, 1], [], []>} : vector<16x128xbf16>, vector<128x2048xbf16>, vector<16x2048xf32> -> vector<16x2048xf32>
    %c0_133 = arith.constant 0 : index
    %c1_134 = arith.constant 1 : index
    %c0_135 = arith.constant 0 : index
    %c0_136 = arith.constant 0 : index
    %273 = vector.load %arg12[%c0_133, %c1_134, %c0_135, %c0_136] : memref<1x2x1x2048xf32, #tpu.memory_space<vmem>>, vector<1x1x1x2048xf32>
    %274 = vector.shape_cast %273 : vector<1x1x1x2048xf32> to vector<1x2048xf32>
    %275 = vector.broadcast %274 : vector<1x2048xf32> to vector<16x2048xf32>
    %276 = arith.addf %272, %275 : vector<16x2048xf32>
    %cst_137 = arith.constant 0.000000e+00 : f32
    %277 = vector.broadcast %cst_137 : f32 to vector<16x2048xf32>
    %278 = arith.maximumf %276, %277 : vector<16x2048xf32>
    %279 = arith.truncf %278 : vector<16x2048xf32> to vector<16x2048xbf16>
    %c0_138 = arith.constant 0 : index
    %c1_139 = arith.constant 1 : index
    %c0_140 = arith.constant 0 : index
    %c0_141 = arith.constant 0 : index
    %280 = vector.load %arg13[%c0_138, %c1_139, %c0_140, %c0_141] : memref<1x2x2048x128xbf16, #tpu.memory_space<vmem>>, vector<1x1x2048x128xbf16>
    %281 = vector.shape_cast %280 : vector<1x1x2048x128xbf16> to vector<2048x128xbf16>
    %cst_142 = arith.constant dense<0.000000e+00> : vector<16x128xf32>
    %282 = tpu.matmul %279, %281, %cst_142 {dimension_numbers = #tpu.dot_dimension_numbers<[1], [0], [0], [1], [0, 0, 1, 1], [], []>} : vector<16x2048xbf16>, vector<2048x128xbf16>, vector<16x128xf32> -> vector<16x128xf32>
    %c0_143 = arith.constant 0 : index
    %c1_144 = arith.constant 1 : index
    %c0_145 = arith.constant 0 : index
    %c0_146 = arith.constant 0 : index
    %283 = vector.load %arg14[%c0_143, %c1_144, %c0_145, %c0_146] : memref<1x2x1x128xf32, #tpu.memory_space<vmem>>, vector<1x1x1x128xf32>
    %284 = vector.shape_cast %283 : vector<1x1x1x128xf32> to vector<1x128xf32>
    %285 = vector.broadcast %284 : vector<1x128xf32> to vector<16x128xf32>
    %286 = arith.addf %282, %285 : vector<16x128xf32>
    %287 = arith.addf %268, %286 : vector<16x128xf32>
    %c0_147 = arith.constant 0 : index
    %c1_148 = arith.constant 1 : index
    %c0_149 = arith.constant 0 : index
    %c0_150 = arith.constant 0 : index
    %288 = vector.load %arg15[%c0_147, %c1_148, %c0_149, %c0_150] : memref<1x2x1x128xf32, #tpu.memory_space<vmem>>, vector<1x1x1x128xf32>
    %289 = vector.shape_cast %288 : vector<1x1x1x128xf32> to vector<1x128xf32>
    %c0_151 = arith.constant 0 : index
    %c1_152 = arith.constant 1 : index
    %c0_153 = arith.constant 0 : index
    %c0_154 = arith.constant 0 : index
    %290 = vector.load %arg16[%c0_151, %c1_152, %c0_153, %c0_154] : memref<1x2x1x128xf32, #tpu.memory_space<vmem>>, vector<1x1x1x128xf32>
    %291 = vector.shape_cast %290 : vector<1x1x1x128xf32> to vector<1x128xf32>
    %cst_155 = arith.constant dense<0.000000e+00> : vector<16xf32>
    %292 = vector.multi_reduction <add>, %287, %cst_155 [1] : vector<16x128xf32> to vector<16xf32>
    %293 = vector.shape_cast %292 : vector<16xf32> to vector<16x1xf32>
    %cst_156 = arith.constant 1.280000e+02 : f32
    %294 = vector.broadcast %cst_156 : f32 to vector<16x1xf32>
    %295 = arith.divf %293, %294 : vector<16x1xf32>
    %296 = vector.broadcast %295 : vector<16x1xf32> to vector<16x128xf32>
    %297 = arith.subf %287, %296 : vector<16x128xf32>
    %298 = vector.broadcast %295 : vector<16x1xf32> to vector<16x128xf32>
    %299 = arith.subf %287, %298 : vector<16x128xf32>
    %300 = arith.mulf %297, %299 : vector<16x128xf32>
    %cst_157 = arith.constant dense<0.000000e+00> : vector<16xf32>
    %301 = vector.multi_reduction <add>, %300, %cst_157 [1] : vector<16x128xf32> to vector<16xf32>
    %302 = vector.shape_cast %301 : vector<16xf32> to vector<16x1xf32>
    %cst_158 = arith.constant 1.280000e+02 : f32
    %303 = vector.broadcast %cst_158 : f32 to vector<16x1xf32>
    %304 = arith.divf %302, %303 : vector<16x1xf32>
    %305 = vector.broadcast %295 : vector<16x1xf32> to vector<16x128xf32>
    %306 = arith.subf %287, %305 : vector<16x128xf32>
    %cst_159 = arith.constant 9.99999974E-6 : f32
    %307 = vector.broadcast %cst_159 : f32 to vector<16x1xf32>
    %308 = arith.addf %304, %307 : vector<16x1xf32>
    %309 = math.rsqrt %308 : vector<16x1xf32>
    %310 = vector.broadcast %309 : vector<16x1xf32> to vector<16x128xf32>
    %311 = arith.mulf %306, %310 : vector<16x128xf32>
    %312 = vector.broadcast %289 : vector<1x128xf32> to vector<16x128xf32>
    %313 = arith.mulf %311, %312 : vector<16x128xf32>
    %314 = vector.broadcast %291 : vector<1x128xf32> to vector<16x128xf32>
    %315 = arith.addf %313, %314 : vector<16x128xf32>
    %316 = vector.shape_cast %315 : vector<16x128xf32> to vector<2x8x128xf32>
    %cst_160 = arith.constant dense<0.000000e+00> : vector<2x128xf32>
    %317 = vector.multi_reduction <add>, %316, %cst_160 [1] : vector<2x8x128xf32> to vector<2x128xf32>
    %318 = vector.shape_cast %317 : vector<2x128xf32> to vector<1x2x128xf32>
    %c0_161 = arith.constant 0 : index
    %c0_162 = arith.constant 0 : index
    %c0_163 = arith.constant 0 : index
    %319 = vector.load %arg17[%c0_161, %c0_162, %c0_163] : memref<1x2x128xf32, #tpu.memory_space<vmem>>, vector<1x2x128xf32>
    tpu.vector_store %arg17[%c0_161, %c0_162, %c0_163], %318 {strides = array<i32>} : memref<1x2x128xf32, #tpu.memory_space<vmem>>, vector<1x2x128xf32>,
    return
  }
  func.func @transform_0(%arg0: i32, %arg1: memref<2x2xi32, #tpu.memory_space<smem>>) -> (i32, i32, i32, i32) {
    %c0_i32 = arith.constant 0 : i32
    %c0_i32_0 = arith.constant 0 : i32
    %c0_i32_1 = arith.constant 0 : i32
    %c0_i32_2 = arith.constant 0 : i32
    return %arg0, %c0_i32, %c0_i32_0, %c0_i32_1 : i32, i32, i32, i32
  }
  func.func @transform_1(%arg0: i32, %arg1: memref<2x2xi32, #tpu.memory_space<smem>>) -> (i32, i32, i32) {
    %c0_i32 = arith.constant 0 : i32
    %c0_i32_0 = arith.constant 0 : i32
    %c0_i32_1 = arith.constant 0 : i32
    return %arg0, %c0_i32, %c0_i32_0 : i32, i32, i32
  }
  func.func @transform_2(%arg0: i32, %arg1: memref<2x2xi32, #tpu.memory_space<smem>>) -> (i32, i32, i32) {
    %c0_i32 = arith.constant 0 : i32
    %c0_i32_0 = arith.constant 0 : i32
    %c0_i32_1 = arith.constant 0 : i32
    return %arg0, %c0_i32, %c0_i32_0 : i32, i32, i32
  }
  func.func @transform_3(%arg0: i32, %arg1: memref<2x2xi32, #tpu.memory_space<smem>>) -> (i32, i32, i32, i32) {
    %c0_i32 = arith.constant 0 : i32
    %c0_i32_0 = arith.constant 0 : i32
    %c0_i32_1 = arith.constant 0 : i32
    %c0_i32_2 = arith.constant 0 : i32
    return %arg0, %c0_i32, %c0_i32_0, %c0_i32_1 : i32, i32, i32, i32
  }
  func.func @transform_4(%arg0: i32, %arg1: memref<2x2xi32, #tpu.memory_space<smem>>) -> (i32, i32, i32, i32) {
    %c0_i32 = arith.constant 0 : i32
    %c0_i32_0 = arith.constant 0 : i32
    %c0_i32_1 = arith.constant 0 : i32
    %c0_i32_2 = arith.constant 0 : i32
    return %arg0, %c0_i32, %c0_i32_0, %c0_i32_1 : i32, i32, i32, i32
  }
  func.func @transform_5(%arg0: i32, %arg1: memref<2x2xi32, #tpu.memory_space<smem>>) -> (i32, i32, i32, i32) {
    %c0_i32 = arith.constant 0 : i32
    %c0_i32_0 = arith.constant 0 : i32
    %c0_i32_1 = arith.constant 0 : i32
    %c0_i32_2 = arith.constant 0 : i32
    return %arg0, %c0_i32, %c0_i32_0, %c0_i32_1 : i32, i32, i32, i32
  }
  func.func @transform_6(%arg0: i32, %arg1: memref<2x2xi32, #tpu.memory_space<smem>>) -> (i32, i32, i32, i32) {
    %c0_i32 = arith.constant 0 : i32
    %c0_i32_0 = arith.constant 0 : i32
    %c0_i32_1 = arith.constant 0 : i32
    %c0_i32_2 = arith.constant 0 : i32
    return %arg0, %c0_i32, %c0_i32_0, %c0_i32_1 : i32, i32, i32, i32
  }
  func.func @transform_7(%arg0: i32, %arg1: memref<2x2xi32, #tpu.memory_space<smem>>) -> (i32, i32, i32, i32) {
    %c0_i32 = arith.constant 0 : i32
    %c0_i32_0 = arith.constant 0 : i32
    %c0_i32_1 = arith.constant 0 : i32
    %c0_i32_2 = arith.constant 0 : i32
    return %arg0, %c0_i32, %c0_i32_0, %c0_i32_1 : i32, i32, i32, i32
  }
  func.func @transform_8(%arg0: i32, %arg1: memref<2x2xi32, #tpu.memory_space<smem>>) -> (i32, i32, i32, i32) {
    %c0_i32 = arith.constant 0 : i32
    %c0_i32_0 = arith.constant 0 : i32
    %c0_i32_1 = arith.constant 0 : i32
    %c0_i32_2 = arith.constant 0 : i32
    return %arg0, %c0_i32, %c0_i32_0, %c0_i32_1 : i32, i32, i32, i32
  }
  func.func @transform_9(%arg0: i32, %arg1: memref<2x2xi32, #tpu.memory_space<smem>>) -> (i32, i32, i32, i32) {
    %c0_i32 = arith.constant 0 : i32
    %c0_i32_0 = arith.constant 0 : i32
    %c0_i32_1 = arith.constant 0 : i32
    %c0_i32_2 = arith.constant 0 : i32
    return %arg0, %c0_i32, %c0_i32_0, %c0_i32_1 : i32, i32, i32, i32
  }
  func.func @transform_10(%arg0: i32, %arg1: memref<2x2xi32, #tpu.memory_space<smem>>) -> (i32, i32, i32, i32) {
    %c0_i32 = arith.constant 0 : i32
    %c0_i32_0 = arith.constant 0 : i32
    %c0_i32_1 = arith.constant 0 : i32
    %c0_i32_2 = arith.constant 0 : i32
    return %arg0, %c0_i32, %c0_i32_0, %c0_i32_1 : i32, i32, i32, i32
  }
  func.func @transform_11(%arg0: i32, %arg1: memref<2x2xi32, #tpu.memory_space<smem>>) -> (i32, i32, i32, i32) {
    %c0_i32 = arith.constant 0 : i32
    %c0_i32_0 = arith.constant 0 : i32
    %c0_i32_1 = arith.constant 0 : i32
    %c0_i32_2 = arith.constant 0 : i32
    return %arg0, %c0_i32, %c0_i32_0, %c0_i32_1 : i32, i32, i32, i32
  }
  func.func @transform_12(%arg0: i32, %arg1: memref<2x2xi32, #tpu.memory_space<smem>>) -> (i32, i32, i32, i32) {
    %c0_i32 = arith.constant 0 : i32
    %c0_i32_0 = arith.constant 0 : i32
    %c0_i32_1 = arith.constant 0 : i32
    %c0_i32_2 = arith.constant 0 : i32
    return %arg0, %c0_i32, %c0_i32_0, %c0_i32_1 : i32, i32, i32, i32
  }
  func.func @transform_13(%arg0: i32, %arg1: memref<2x2xi32, #tpu.memory_space<smem>>) -> (i32, i32, i32, i32) {
    %c0_i32 = arith.constant 0 : i32
    %c0_i32_0 = arith.constant 0 : i32
    %c0_i32_1 = arith.constant 0 : i32
    %c0_i32_2 = arith.constant 0 : i32
    return %arg0, %c0_i32, %c0_i32_0, %c0_i32_1 : i32, i32, i32, i32
  }
  func.func @transform_14(%arg0: i32, %arg1: memref<2x2xi32, #tpu.memory_space<smem>>) -> (i32, i32, i32, i32) {
    %c0_i32 = arith.constant 0 : i32
    %c0_i32_0 = arith.constant 0 : i32
    %c0_i32_1 = arith.constant 0 : i32
    %c0_i32_2 = arith.constant 0 : i32
    return %arg0, %c0_i32, %c0_i32_0, %c0_i32_1 : i32, i32, i32, i32
  }
  func.func @transform_15(%arg0: i32, %arg1: memref<2x2xi32, #tpu.memory_space<smem>>) -> (i32, i32, i32) {
    %c0_i32 = arith.constant 0 : i32
    %c0_i32_0 = arith.constant 0 : i32
    %c0_i32_1 = arith.constant 0 : i32
    return %arg0, %c0_i32, %c0_i32_0 : i32, i32, i32
  }
}

</mosaic_0001>

<bundles_post_ra>
// kernel: tpu_custom_call.1
= control target key start
LH: loop header
LB: loop body
LE: loop exit
PB: predicated region body
PF: predicated region fallthrough
CT: control target
= control target key end

     0   :  { %s13585_s0 = inlined_call_operand.hbm [shape: s32[2,2], index: 0, kind: input, shape index: {}]   ;;  %s13586_s1 = inlined_call_operand.hbm [shape: f32[2,2,8,8], index: 1, kind: input, shape index: {}]   ;;  %s13587_s2 = inlined_call_operand.hbm [shape: bf16[2,8,128], index: 2, kind: input, shape index: {}]   ;;  %s13588_s3 = inlined_call_operand.hbm [shape: f32[2,1,128], index: 3, kind: input, shape index: {}]   ;;  %s13589_s4 = inlined_call_operand.hbm [shape: bf16[2,2,128,384], index: 4, kind: input, shape index: {}]   ;;  %s13590_s5 = inlined_call_operand.hbm [shape: f32[2,2,1,384], index: 5, kind: input, shape index: {}]   ;;  %s13591_s6 = inlined_call_operand.hbm [shape: bf16[2,2,128,128], index: 6, kind: input, shape index: {}]   ;;  %s13592_s7 = inlined_call_operand.hbm [shape: f32[2,2,1,128], index: 7, kind: input, shape index: {}]   ;;  %s13593_s8 = inlined_call_operand.hbm [shape: f32[2,2,1,128], index: 8, kind: input, shape index: {}]   ;;  %s13594_s9 = inlined_call_operand.hbm [shape: f32[2,2,1,128], index: 9, kind: input, shape index: {}]   ;;  %s13595_s10 = inlined_call_operand.hbm [shape: bf16[2,2,128,2048], index: 10, kind: input, shape index: {}]   ;;  %s13596_s11 = inlined_call_operand.hbm [shape: f32[2,2,1,2048], index: 11, kind: input, shape index: {}]   ;;  %s13597_s12 = inlined_call_operand.hbm [shape: bf16[2,2,2048,128], index: 12, kind: input, shape index: {}]   ;;  %s13598_s13 = inlined_call_operand.hbm [shape: f32[2,2,1,128], index: 13, kind: input, shape index: {}]   ;;  %s13599_s14 = inlined_call_operand.hbm [shape: f32[2,2,1,128], index: 14, kind: input, shape index: {}]   ;;  %s13600_s15 = inlined_call_operand.hbm [shape: f32[2,2,1,128], index: 15, kind: input, shape index: {}]   ;;  %s13601_s16 = inlined_call_operand.hbm [shape: f32[2,2,128], index: 16, kind: output, shape index: {}]  }
   0x1   :  { %13634 = sst [smem:[#allocation48_spill]] %s13585_s0 }
   0x2   :  { %13635 = sst [smem:[#allocation49_spill]] %s13586_s1  ;;  %s13645_s23 = sld [smem:[#allocation48_spill]] }
   0x3   :  { %13636 = sst [smem:[#allocation50_spill]] %s13587_s2 }
   0x4   :  { %13637 = sst [smem:[#allocation51_spill]] %s13589_s4 }
   0x5   :  { %13638 = sst [smem:[#allocation52_spill]] %s13591_s6 }
   0x6   :  { %13639 = sst [smem:[#allocation53_spill]] %s13593_s8 }
   0x7   :  { %13640 = sst [smem:[#allocation54_spill]] %s13594_s9 }
   0x8   :  { %13641 = sst [smem:[#allocation55_spill]] %s13595_s10  ;;  %s11205_s9 = scalar_lea.hbm %s13645_s23, 32 }
   0x9   :  { %13642 = sst [smem:[#allocation56_spill]] %s13597_s12  ;;  %p11206_p0 = scmp.ne.s32.totalorder %s13645_s23, %s11205_s9 }
   0xa   :  { %13643 = sst [smem:[#allocation57_spill]] %s13599_s14  ;;  %p11209_p1 = scmp.lt.u32.totalorder %s11205_s9, %s13645_s23 }
   0xb   :  { %13644 = sst [smem:[#allocation58_spill]] %s13601_s16 }
   0xc   :  { %p11211_p2 = pnand %p11209_p1, %p11206_p0 }
   0xe   :  { %11214 = shalt.err (!%p11211_p2)  }
   0xf   :  { %s11733_s28 = smov [#allocation3]  }
  0x10   :  { %22 = dma.hbm_to_smem %s13645_s23, 32, %s11733_s28, [#allocation2] }
  0x11   :  { %11679 = dma.done.wait [#allocation2], 32 }
  0x12   :  { %11680 = vsyncadd [#allocation2], 4294967264 }
  0x13   :  { %24 = sfence }
  0x14   :  { %25 = vsyncpa [#allocation5], 0 }
  0x15   :  { %27 = vsyncpa [#allocation5 + $0x1], 0 }
  0x16   :  { %28 = vsyncpa [#allocation8], 0 }
  0x17   :  { %30 = vsyncpa [#allocation8 + $0x1], 0 }
  0x18   :  { %31 = vsyncpa [#allocation11], 0 }
  0x19   :  { %33 = vsyncpa [#allocation11 + $0x1], 0 }
  0x1a   :  { %34 = vsyncpa [#allocation14], 0 }
  0x1b   :  { %36 = vsyncpa [#allocation14 + $0x1], 0 }
  0x1c   :  { %37 = vsyncpa [#allocation17], 0 }
  0x1d   :  { %39 = vsyncpa [#allocation17 + $0x1], 0 }
  0x1e   :  { %40 = vsyncpa [#allocation20], 0 }
  0x1f   :  { %42 = vsyncpa [#allocation20 + $0x1], 0 }
  0x20   :  { %43 = vsyncpa [#allocation23], 0 }
  0x21   :  { %45 = vsyncpa [#allocation23 + $0x1], 0 }
  0x22   :  { %46 = vsyncpa [#allocation26], 0 }
  0x23   :  { %48 = vsyncpa [#allocation26 + $0x1], 0 }
  0x24   :  { %49 = vsyncpa [#allocation6], 0 }
  0x25   :  { %51 = vsyncpa [#allocation6 + $0x1], 0  ;;  %s11863_s9 = smov 0   ;;  %s11865_s0 = smov 0  }
  0x26   :  { %s11867_s17 = smov 0   ;;  %s11869_s18 = smov 0  }
  0x27 LB: > { %13646 = sst [smem:[#allocation39_spill]] %s11719_s9  ;;  %s11884_s19 = sadd.s32 4294967295, %s11731_s18   ;;  %s11731_s18 = sphi %s11869_s18, %s13694_s18   ;;  %s11727_s17 = sphi %s11867_s17, %s13697_s17   ;;  %s11723_s0 = sphi %s11865_s0, %s13696_s0   ;;  %s11719_s9 = sphi %s11863_s9, %s13695_s9  }
  0x28   : > { %13647 = sst [smem:[#allocation40_spill]] %s11723_s0  ;;  %s9005_s20 = sadd.s32 4294967294, %s11731_s18  }
  0x29   : > { %13648 = sst [smem:[#allocation41_spill]] %s11727_s17  ;;  %s11888_s21 = sadd.s32 1, %s11731_s18  }
  0x2a   : > { %13649 = sst [smem:[#allocation42_spill]] %s11884_s19  ;;  %s64_s22 = sadd.s32 1, %s11727_s17 }
  0x2b   : > { %13650 = sst [smem:[#allocation43_spill]] %s11888_s21  ;;  %s61_s23 = ssub.s32 %s11731_s18, %s11888_s21 }
  0x2c   : > { %p71_p3 = scmp.ne.s32.totalorder %s11727_s17, %s11723_s0  ;;  %p62_p4 = scmp.eq.s32.totalorder %s61_s23, 0 }
  0x2d   : > { %p72_p5 = scmp.eq.s32.totalorder %s11731_s18, 0  ;;  %p77_p6 = scmp.ne.s32.totalorder %s11723_s0, %s11719_s9 }
  0x2e   : > { %p78_p7 = scmp.eq.s32.totalorder %s11884_s19, 0  ;;  %p465_p10 = scmp.eq.s32.totalorder %s11884_s19, 1 }
  0x2f   : > { %s11900_s24 = scalar_select %p62_p4, %s11727_s17, %s64_s22  }
  0x30   : > { %p11902_p8 = por %p72_p5, %p71_p3  ;;  %p11906_p9 = por %p78_p7, %p77_p6 }
  0x31   : > { %13651 = sst [smem:[#allocation44_spill]] %s11900_s24  ;;  %p471_p11 = scmp.eq.s32.totalorder %s9005_s20, 1 }
  0x32   : > { %s13653_s26 = scalar_select %p11906_p9, 1, 0 }
  0x33   : > { %p11911_p12 = por %p465_p10, %p71_p3  ;;  %p11915_p13 = por %p471_p11, %p77_p6 }
  0x34   : > { %13654 = sst [smem:[#allocation45_spill]] %s13653_s26  ;;  %p13616_p0 = scmp.ge.s32.totalorder %s11731_s18, 2 }
  0x35   : > { %s13655_s27 = scalar_select %p11911_p12, 1, 0 }
  0x36   : > { %s13657_s28 = scalar_select %p11915_p13, 1, 0 }
  0x37   : > { %13656 = sst [smem:[#allocation46_spill]] %s13655_s27  ;;  %487 = sbr.rel (%p13616_p0) target bundleno = 458 (0x1ca), region = 16 }
  0x38   : > { %13658 = sst [smem:[#allocation47_spill]] %s13657_s28  ;;  %s11923_s29 = sand.u32 (!%p13616_p0), 1, %s11727_s17  }
  0x39   : > { %s11926_s30 = sand.u32 (!%p13616_p0), 1, %s11731_s18   ;;  %s9011_s20 = sshll.u32 (!%p13616_p0), %s11923_s29, 2 }
  0x3a   : > { %s9012_s22 = sshll.u32 (!%p13616_p0), %s11731_s18, 6  ;;  %s13659_s2 = sld [smem:[#allocation50_spill]] (!%p13616_p0) }
  0x3b   : > { %s516_s28 = scalar_lea.vmem (!%p13616_p0), [#allocation7], %s9011_s20  ;;  %s13619_s17 = scalar_lea.sflag (!%p13616_p0), [#allocation8], %s11926_s30 }
  0x3c   : > { %s523_s9 = sshll.u32 (!%p13616_p0), %s516_s28, 4  ;;  %s524_s9 = int_to_ptr.vmem [resolvable:$true] %s523_s9 }
  0x40   : > { %s11933_s21 = scalar_lea.hbm %s13659_s2, %s9012_s22  ;;  %s11219_s26 = scalar_lea.hbm %s13659_s2, 128 }
  0x41   : > { %s11215_s16 = scalar_lea.hbm %s11933_s21, 64  ;;  %p11220_p4 = scmp.lt.u32.totalorder %s11933_s21, %s13659_s2 }
  0x42   : > { %p11216_p1 = scmp.ne.s32.totalorder %s11933_s21, %s11215_s16  ;;  %p11221_p5 = scmp.lt.u32.totalorder %s11219_s26, %s11215_s16 }
  0x43   : > { %p11223_p7 = scmp.lt.u32.totalorder %s11215_s16, %s11933_s21 }
  0x44   : > { %p11217_p2 = pnand %p11216_p1, %p11902_p8  ;;  %p11222_p6 = por %p11221_p5, %p11220_p4 }
  0x46   : > { %p11218_p3 = pneg %p11217_p2  ;;  %p11224_p10 = por %p11223_p7, %p11222_p6 }
  0x48   : > { %p11225_p11 = pnand %p11224_p10, %p11218_p3 }
  0x4a   : > { %11228 = shalt.err (!%p11225_p11)
}
  0x4b   : > { %s11229_s28 = scalar_lea.vmem %s524_s9, 64  ;;  %s11734_s20 = smov [#allocation7]  }
  0x4c   : > { %p11230_p0 = scmp.ne.s32.totalorder %s524_s9, %s11229_s28  ;;  %s11233_s23 = sshll.u32 %s11734_s20, 4  ;;  %s11234_s23 = int_to_ptr.vmem [resolvable:$false] %s11233_s23 }
  0x4d   : > { %s11235_s19 = scalar_lea.vmem %s11234_s23, 128  ;;  %p11236_p13 = scmp.lt.s32.totalorder %s524_s9, %s11234_s23 }
  0x4e   : > { %p11231_p1 = pnand %p11230_p0, %p11902_p8  ;;  %p11237_p12 = scmp.lt.s32.totalorder %s11235_s19, %s11229_s28 }
  0x50   : > { %p11232_p2 = pneg %p11231_p1  ;;  %p11238_p9 = por %p11237_p12, %p11236_p13 }
  0x52   : > { %p11239_p4 = pnand %p11238_p9, %p11232_p2 }
  0x54   : > { %11242 = shalt.err (!%p11239_p4)
}
  0x55   : > { %10726 = dma.hbm_to_vmem [thread:$0]  (%p11902_p8), %s11933_s21, 64, %s524_s9, %s13619_s17  }
  0x56   : > { %s10719_s16 = smul.u32 384, %s11923_s29  ;;  %s13660_s4 = sld [smem:[#allocation51_spill]] }
  0x57   : > { %s10720_s26 = smul.u32 6144, %s11731_s18  ;;  %s9016_s23 = sshll.u32 %s11923_s29, 7 }
  0x58   : > { %s551_s28 = scalar_lea.vmem [#allocation10], %s10719_s16  ;;  %s13621_s19 = scalar_lea.sflag [#allocation11], %s11926_s30 }
  0x59   : > { %s558_s20 = sshll.u32 %s551_s28, 4  ;;  %s11962_s20 = int_to_ptr.vmem [resolvable:$true] %s558_s20 }
  0x5c   : > { %s11960_s22 = scalar_lea.hbm %s13660_s4, %s10720_s26  ;;  %s11247_s26 = scalar_lea.hbm %s13660_s4, 12288 }
  0x5d   : > { %s11243_s2 = scalar_lea.hbm %s11960_s22, 6144  ;;  %p11248_p0 = scmp.lt.u32.totalorder %s11960_s22, %s13660_s4 }
  0x5e   : > { %p11244_p9 = scmp.ne.s32.totalorder %s11960_s22, %s11243_s2  ;;  %p11249_p3 = scmp.lt.u32.totalorder %s11247_s26, %s11243_s2 }
  0x5f   : > { %p11251_p6 = scmp.lt.u32.totalorder %s11243_s2, %s11960_s22 }
  0x60   : > { %p11245_p12 = pnand %p11244_p9, %p11902_p8  ;;  %p11250_p5 = por %p11249_p3, %p11248_p0 }
  0x62   : > { %p11246_p13 = pneg %p11245_p12  ;;  %p11252_p7 = por %p11251_p6, %p11250_p5 }
  0x64   : > { %p11253_p10 = pnand %p11252_p7, %p11246_p13 }
  0x66   : > { %11256 = shalt.err (!%p11253_p10)
}
  0x67   : > { %s11257_s16 = scalar_lea.vmem %s11962_s20, 6144  ;;  %s11735_s28 = smov [#allocation10]  }
  0x68   : > { %p11258_p11 = scmp.ne.s32.totalorder %s11962_s20, %s11257_s16  ;;  %s11261_s9 = sshll.u32 %s11735_s28, 4  ;;  %s11262_s9 = int_to_ptr.vmem [resolvable:$false] %s11261_s9 }
  0x69   : > { %s11263_s21 = scalar_lea.vmem %s11262_s9, 12288  ;;  %p11264_p4 = scmp.lt.s32.totalorder %s11962_s20, %s11262_s9 }
  0x6a   : > { %p11259_p1 = pnand %p11258_p11, %p11902_p8  ;;  %p11265_p9 = scmp.lt.s32.totalorder %s11263_s21, %s11257_s16 }
  0x6c   : > { %p11260_p2 = pneg %p11259_p1  ;;  %p11266_p12 = por %p11265_p9, %p11264_p4 }
  0x6e   : > { %p11267_p0 = pnand %p11266_p12, %p11260_p2 }
  0x70   : > { %11270 = shalt.err (!%p11267_p0)
}
  0x71   : > { %s11736_s2 = smov 192   ;;  %s11737_s26 = smov 12  }
  0x72   : > { %10728 = dma.hbm_to_vmem [thread:$0]  (%p11902_p8), %s11960_s22, 6144, %s11962_s20, %s13621_s19, %s11736_s2, %s11736_s2, %s11737_s26  }
  0x73   : > { %s10121_s27 = sshll.u32 %s11731_s18, 11  ;;  %s13661_s6 = sld [smem:[#allocation52_spill]] }
  0x74   : > { %s593_s9 = scalar_lea.vmem [#allocation13], %s9016_s23  ;;  %s12000_s17 = sshll.u32 %s11923_s29, 1 }
  0x75   : > { %s600_s21 = sshll.u32 %s593_s9, 4  ;;  %s13622_s4 = scalar_lea.sflag [#allocation14], %s11926_s30  ;;  %s11997_s21 = int_to_ptr.vmem [resolvable:$true] %s600_s21 }
  0x79   : > { %s11993_s28 = scalar_lea.hbm %s13661_s6, %s10121_s27  ;;  %s11275_s2 = scalar_lea.hbm %s13661_s6, 4096 }
  0x7a   : > { %s11271_s0 = scalar_lea.hbm %s11993_s28, 2048  ;;  %p11276_p6 = scmp.lt.u32.totalorder %s11993_s28, %s13661_s6 }
  0x7b   : > { %p11272_p13 = scmp.ne.s32.totalorder %s11993_s28, %s11271_s0  ;;  %p11277_p7 = scmp.lt.u32.totalorder %s11275_s2, %s11271_s0 }
  0x7c   : > { %p11279_p11 = scmp.lt.u32.totalorder %s11271_s0, %s11993_s28 }
  0x7d   : > { %p11273_p3 = pnand %p11272_p13, %p11902_p8  ;;  %p11278_p10 = por %p11277_p7, %p11276_p6 }
  0x7f   : > { %p11274_p5 = pneg %p11273_p3  ;;  %p11280_p1 = por %p11279_p11, %p11278_p10 }
  0x81   : > { %p11281_p2 = pnand %p11280_p1, %p11274_p5 }
  0x83   : > { %11284 = shalt.err (!%p11281_p2)
}
  0x84   : > { %s11285_s23 = scalar_lea.vmem %s11997_s21, 2048  ;;  %s11738_s24 = smov [#allocation13]  }
  0x85   : > { %p11286_p4 = scmp.ne.s32.totalorder %s11997_s21, %s11285_s23  ;;  %s11289_s16 = sshll.u32 %s11738_s24, 4  ;;  %s11290_s16 = int_to_ptr.vmem [resolvable:$false] %s11289_s16 }
  0x86   : > { %s11291_s9 = scalar_lea.vmem %s11290_s16, 4096  ;;  %p11292_p0 = scmp.lt.s32.totalorder %s11997_s21, %s11290_s16 }
  0x87   : > { %p11287_p9 = pnand %p11286_p4, %p11902_p8  ;;  %p11293_p13 = scmp.lt.s32.totalorder %s11291_s9, %s11285_s23 }
  0x89   : > { %p11288_p12 = pneg %p11287_p9  ;;  %p11294_p3 = por %p11293_p13, %p11292_p0 }
  0x8b   : > { %p11295_p6 = pnand %p11294_p3, %p11288_p12 }
  0x8d   : > { %11298 = shalt.err (!%p11295_p6)
}
  0x8e   : > { %s13624_s0 = smov 64   ;;  %s13623_s22 = smov 4  }
  0x8f   : > { %10730 = dma.hbm_to_vmem [thread:$0]  (%p11902_p8), %s11993_s28, 2048, %s11997_s21, %s13622_s4, %s13624_s0, %s13624_s0, %s13623_s22  }
  0x90   : > { %s12030_s20 = sshll.u32 %s11731_s18, 5  ;;  %s13662_s8 = sld [smem:[#allocation53_spill]] }
  0x91   : > { %s635_s23 = scalar_lea.vmem [#allocation16], %s12000_s17  ;;  %s9028_s16 = sshll.u32 %s11923_s29, 11 }
  0x92   : > { %s642_s24 = sshll.u32 %s635_s23, 4  ;;  %s13626_s9 = scalar_lea.sflag [#allocation17], %s11926_s30  ;;  %s12039_s24 = int_to_ptr.vmem [resolvable:$true] %s642_s24 }
  0x96   : > { %s12036_s27 = scalar_lea.hbm %s13662_s8, %s12030_s20  ;;  %s11303_s2 = scalar_lea.hbm %s13662_s8, 64 }
  0x97   : > { %s11299_s19 = scalar_lea.hbm %s12036_s27, 32  ;;  %p11304_p11 = scmp.lt.u32.totalorder %s12036_s27, %s13662_s8 }
  0x98   : > { %p11300_p5 = scmp.ne.s32.totalorder %s12036_s27, %s11299_s19  ;;  %p11305_p1 = scmp.lt.u32.totalorder %s11303_s2, %s11299_s19 }
  0x99   : > { %p11307_p4 = scmp.lt.u32.totalorder %s11299_s19, %s12036_s27 }
  0x9a   : > { %p11301_p7 = pnand %p11300_p5, %p11902_p8  ;;  %p11306_p2 = por %p11305_p1, %p11304_p11 }
  0x9c   : > { %p11302_p10 = pneg %p11301_p7  ;;  %p11308_p9 = por %p11307_p4, %p11306_p2 }
  0x9e   : > { %p11309_p12 = pnand %p11308_p9, %p11302_p10 }
  0xa0   : > { %11312 = shalt.err (!%p11309_p12)
}
  0xa1   : > { %s11313_s23 = scalar_lea.vmem %s12039_s24, 32  ;;  %s11741_s28 = smov [#allocation16]  }
  0xa2   : > { %p11314_p0 = scmp.ne.s32.totalorder %s12039_s24, %s11313_s23  ;;  %s11317_s21 = sshll.u32 %s11741_s28, 4  ;;  %s11318_s21 = int_to_ptr.vmem [resolvable:$false] %s11317_s21 }
  0xa3   : > { %s11319_s4 = scalar_lea.vmem %s11318_s21, 64  ;;  %p11320_p6 = scmp.lt.s32.totalorder %s12039_s24, %s11318_s21 }
  0xa4   : > { %p11315_p13 = pnand %p11314_p0, %p11902_p8  ;;  %p11321_p5 = scmp.lt.s32.totalorder %s11319_s4, %s11313_s23 }
  0xa6   : > { %p11316_p3 = pneg %p11315_p13  ;;  %p11322_p7 = por %p11321_p5, %p11320_p6 }
  0xa8   : > { %p11323_p11 = pnand %p11322_p7, %p11316_p3 }
  0xaa   : > { %11326 = shalt.err (!%p11323_p11)
}
  0xab   : > { %s13627_s19 = smov 16   ;;  %s13629_s2 = smov 1  }
  0xac   : > { %10732 = dma.hbm_to_vmem [thread:$0]  (%p11902_p8), %s12036_s27, 32, %s12039_s24, %s13626_s9, %s13627_s19, %s13627_s19, %s13629_s2  }
  0xad   : > { %s10125_s26 = sshll.u32 %s11731_s18, 15  ;;  %s13663_s10 = sld [smem:[#allocation55_spill]] }
  0xae   : > { %s677_s4 = scalar_lea.vmem [#allocation19], %s9028_s16  ;;  %s13632_s0 = scalar_lea.sflag [#allocation20], %s11926_s30 }
  0xaf   : > { %s684_s22 = sshll.u32 %s677_s4, 4  ;;  %s12079_s22 = int_to_ptr.vmem [resolvable:$true] %s684_s22 }
  0xb3   : > { %s12075_s21 = scalar_lea.hbm %s13663_s10, %s10125_s26  ;;  %s11331_s23 = scalar_lea.hbm %s13663_s10, 65536 }
  0xb4   : > { %s11327_s6 = scalar_lea.hbm %s12075_s21, 32768  ;;  %p11332_p4 = scmp.lt.u32.totalorder %s12075_s21, %s13663_s10 }
  0xb5   : > { %p11328_p10 = scmp.ne.s32.totalorder %s12075_s21, %s11327_s6  ;;  %p11333_p9 = scmp.lt.u32.totalorder %s11331_s23, %s11327_s6 }
  0xb6   : > { %p11335_p0 = scmp.lt.u32.totalorder %s11327_s6, %s12075_s21 }
  0xb7   : > { %p11329_p1 = pnand %p11328_p10, %p11902_p8  ;;  %p11334_p12 = por %p11333_p9, %p11332_p4 }
  0xb9   : > { %p11330_p2 = pneg %p11329_p1  ;;  %p11336_p13 = por %p11335_p0, %p11334_p12 }
  0xbb   : > { %p11337_p3 = pnand %p11336_p13, %p11330_p2 }
  0xbd   : > { %11340 = shalt.err (!%p11337_p3)
}
  0xbe   : > { %s11341_s4 = scalar_lea.vmem %s12079_s22, 32768  ;;  %s11744_s27 = smov [#allocation19]  }
  0xbf   : > { %p11342_p6 = scmp.ne.s32.totalorder %s12079_s22, %s11341_s4  ;;  %s11345_s24 = sshll.u32 %s11744_s27, 4  ;;  %s11346_s24 = int_to_ptr.vmem [resolvable:$false] %s11345_s24 }
  0xc0   : > { %s11347_s9 = scalar_lea.vmem %s11346_s24, 65536  ;;  %p11348_p11 = scmp.lt.s32.totalorder %s12079_s22, %s11346_s24 }
  0xc1   : > { %p11343_p5 = pnand %p11342_p6, %p11902_p8  ;;  %p11349_p10 = scmp.lt.s32.totalorder %s11347_s9, %s11341_s4 }
  0xc3   : > { %p11344_p7 = pneg %p11343_p5  ;;  %p11350_p1 = por %p11349_p10, %p11348_p11 }
  0xc5   : > { %p11351_p4 = pnand %p11350_p1, %p11344_p7 }
  0xc7   : > { %11354 = shalt.err (!%p11351_p4)
}
  0xc8   : > { %s11745_s6 = smov 1024   ;;  %s13664_s23 = smov 64  }
  0xc9   : > { %10734 = dma.hbm_to_vmem [thread:$0]  (%p11902_p8), %s12075_s21, 32768, %s12079_s22, %s13632_s0, %s11745_s6, %s11745_s6, %s13664_s23  }
  0xca   : > { %s13665_s12 = sld [smem:[#allocation56_spill]]  ;;  %s719_s24 = scalar_lea.vmem [#allocation22], %s9028_s16 }
  0xcb   : > { %s726_s9 = sshll.u32 %s719_s24, 4  ;;  %s13631_s19 = scalar_lea.sflag [#allocation23], %s11926_s30  ;;  %s12115_s9 = int_to_ptr.vmem [resolvable:$true] %s726_s9 }
  0xd0   : > { %s12111_s4 = scalar_lea.hbm %s13665_s12, %s10125_s26  ;;  %s11359_s26 = scalar_lea.hbm %s13665_s12, 65536 }
  0xd1   : > { %s11355_s2 = scalar_lea.hbm %s12111_s4, 32768  ;;  %p11360_p0 = scmp.lt.u32.totalorder %s12111_s4, %s13665_s12 }
  0xd2   : > { %p11356_p2 = scmp.ne.s32.totalorder %s12111_s4, %s11355_s2  ;;  %p11361_p13 = scmp.lt.u32.totalorder %s11359_s26, %s11355_s2 }
  0xd3   : > { %p11363_p6 = scmp.lt.u32.totalorder %s11355_s2, %s12111_s4 }
  0xd4   : > { %p11357_p9 = pnand %p11356_p2, %p11902_p8  ;;  %p11362_p3 = por %p11361_p13, %p11360_p0 }
  0xd6   : > { %p11358_p12 = pneg %p11357_p9  ;;  %p11364_p5 = por %p11363_p6, %p11362_p3 }
  0xd8   : > { %p11365_p7 = pnand %p11364_p5, %p11358_p12 }
  0xda   : > { %11368 = shalt.err (!%p11365_p7)
}
  0xdb   : > { %s11369_s16 = scalar_lea.vmem %s12115_s9, 32768  ;;  %s11746_s27 = smov [#allocation22]  }
  0xdc   : > { %p11370_p11 = scmp.ne.s32.totalorder %s12115_s9, %s11369_s16  ;;  %s11373_s24 = sshll.u32 %s11746_s27, 4  ;;  %s11374_s24 = int_to_ptr.vmem [resolvable:$false] %s11373_s24 }
  0xdd   : > { %s11375_s22 = scalar_lea.vmem %s11374_s24, 65536  ;;  %p11376_p4 = scmp.lt.s32.totalorder %s12115_s9, %s11374_s24 }
  0xde   : > { %p11371_p10 = pnand %p11370_p11, %p11902_p8  ;;  %p11377_p2 = scmp.lt.s32.totalorder %s11375_s22, %s11369_s16 }
  0xe0   : > { %p11372_p1 = pneg %p11371_p10  ;;  %p11378_p9 = por %p11377_p2, %p11376_p4 }
  0xe2   : > { %p11379_p0 = pnand %p11378_p9, %p11372_p1 }
  0xe4   : > { %11382 = shalt.err (!%p11379_p0)
}
  0xe5   : > { %s13666_s2 = smov 4   ;;  %s13667_s14 = sld [smem:[#allocation57_spill]] }
  0xe6   : > { %10736 = dma.hbm_to_vmem [thread:$0]  (%p11902_p8), %s12111_s4, 32768, %s12115_s9, %s13631_s19, %s13664_s23, %s13664_s23, %s13666_s2  }
  0xe7   : > { %s761_s28 = scalar_lea.vmem [#allocation25], %s12000_s17  ;;  %s9008_s27 = sshll.u32 %s11923_s29, 4 }
  0xe8   : > { %s768_s16 = sshll.u32 %s761_s28, 4  ;;  %s13633_s24 = scalar_lea.sflag [#allocation26], %s11926_s30  ;;  %s12151_s16 = int_to_ptr.vmem [resolvable:$true] %s768_s16 }
  0xeb   : > { %s12148_s6 = scalar_lea.hbm %s13667_s14, %s12030_s20  ;;  %s11387_s9 = scalar_lea.hbm %s13667_s14, 64 }
  0xec   : > { %s11383_s22 = scalar_lea.hbm %s12148_s6, 32  ;;  %p11388_p6 = scmp.lt.u32.totalorder %s12148_s6, %s13667_s14 }
  0xed   : > { %p11384_p12 = scmp.ne.s32.totalorder %s12148_s6, %s11383_s22  ;;  %p11389_p5 = scmp.lt.u32.totalorder %s11387_s9, %s11383_s22 }
  0xee   : > { %p11391_p11 = scmp.lt.u32.totalorder %s11383_s22, %s12148_s6 }
  0xef   : > { %p11385_p13 = pnand %p11384_p12, %p11902_p8  ;;  %p11390_p7 = por %p11389_p5, %p11388_p6 }
  0xf1   : > { %p11386_p3 = pneg %p11385_p13  ;;  %p11392_p10 = por %p11391_p11, %p11390_p7 }
  0xf3   : > { %p11393_p1 = pnand %p11392_p10, %p11386_p3 }
  0xf5   : > { %11396 = shalt.err (!%p11393_p1)
}
  0xf6   : > { %s11397_s26 = scalar_lea.vmem %s12151_s16, 32  ;;  %s11747_s28 = smov [#allocation25]  }
  0xf7   : > { %p11398_p4 = scmp.ne.s32.totalorder %s12151_s16, %s11397_s26  ;;  %s11401_s23 = sshll.u32 %s11747_s28, 4  ;;  %s11402_s23 = int_to_ptr.vmem [resolvable:$false] %s11401_s23 }
  0xf8   : > { %s11403_s4 = scalar_lea.vmem %s11402_s23, 64  ;;  %p11404_p0 = scmp.lt.s32.totalorder %s12151_s16, %s11402_s23 }
  0xf9   : > { %p11399_p2 = pnand %p11398_p4, %p11902_p8  ;;  %p11405_p12 = scmp.lt.s32.totalorder %s11403_s4, %s11397_s26 }
  0xfb   : > { %p11400_p9 = pneg %p11399_p2  ;;  %p11406_p13 = por %p11405_p12, %p11404_p0 }
  0xfd   : > { %p11407_p6 = pnand %p11406_p13, %p11400_p9 }
  0xff   : > { %11410 = shalt.err (!%p11407_p6)
}
 0x100   : > { %s13668_s22 = smov 1   ;;  %s13669_s9 = smov 16  }
 0x101   : > { %10738 = dma.hbm_to_vmem [thread:$0]  (%p11902_p8), %s12148_s6, 32, %s12151_s16, %s13633_s24, %s13669_s9, %s13669_s9, %s13668_s22  }
 0x102   : > { %s10120_s2 = sshll.u32 %s11731_s18, 8  ;;  %s13670_s1 = sld [smem:[#allocation49_spill]] }
 0x103   : > { %s495_s23 = scalar_lea.vmem [#allocation4], %s9008_s27  ;;  %s492_s19 = scalar_lea.sflag [#allocation5], %s11923_s29 }
 0x104   : > { %s502_s4 = sshll.u32 %s495_s23, 4  ;;  %s12189_s4 = int_to_ptr.vmem [resolvable:$true] %s502_s4 }
 0x108   : > { %s12185_s28 = scalar_lea.hbm %s13670_s1, %s10120_s2  ;;  %s11415_s2 = scalar_lea.hbm %s13670_s1, 512 }
 0x109   : > { %s11411_s0 = scalar_lea.hbm %s12185_s28, 256  ;;  %p11416_p11 = scmp.lt.u32.totalorder %s12185_s28, %s13670_s1 }
 0x10a   : > { %p11412_p3 = scmp.ne.s32.totalorder %s12185_s28, %s11411_s0  ;;  %p11417_p10 = scmp.lt.u32.totalorder %s11415_s2, %s11411_s0 }
 0x10b   : > { %p11419_p4 = scmp.lt.u32.totalorder %s11411_s0, %s12185_s28 }
 0x10c   : > { %p11413_p5 = pnand %p11412_p3, %p11902_p8  ;;  %p11418_p1 = por %p11417_p10, %p11416_p11 }
 0x10e   : > { %p11414_p7 = pneg %p11413_p5  ;;  %p11420_p2 = por %p11419_p4, %p11418_p1 }
 0x110   : > { %p11421_p9 = pnand %p11420_p2, %p11414_p7 }
 0x112   : > { %11424 = shalt.err (!%p11421_p9)
}
 0x113   : > { %s11425_s27 = scalar_lea.vmem %s12189_s4, 256  ;;  %s11748_s23 = smov [#allocation4]  }
 0x114   : > { %p11426_p0 = scmp.ne.s32.totalorder %s12189_s4, %s11425_s27  ;;  %s11429_s6 = sshll.u32 %s11748_s23, 4  ;;  %s11430_s6 = int_to_ptr.vmem [resolvable:$false] %s11429_s6 }
 0x115   : > { %s11431_s16 = scalar_lea.vmem %s11430_s6, 512  ;;  %p11432_p6 = scmp.lt.s32.totalorder %s12189_s4, %s11430_s6 }
 0x116   : > { %p11427_p12 = pnand %p11426_p0, %p11902_p8  ;;  %p11433_p3 = scmp.lt.s32.totalorder %s11431_s16, %s11425_s27 }
 0x118   : > { %p11428_p13 = pneg %p11427_p12  ;;  %p11434_p5 = por %p11433_p3, %p11432_p6 }
 0x11a   : > { %p11435_p11 = pnand %p11434_p5, %p11428_p13 }
 0x11c   : > { %11438 = shalt.err (!%p11435_p11)
}
 0x11d   : > { %s11749_s0 = smov 128   ;;  %s11750_s2 = smov 8  }
 0x11e   : > { %10725 = dma.hbm_to_vmem [thread:$0]  (%p11902_p8), %s12185_s28, 256, %s12189_s4, %s492_s19, %s11749_s0, %s11749_s0, %s11750_s2  }
 0x11f   : > { %s9013_s21 = sshll.u32 %s11731_s18, 4  ;;  %s533_s26 = scalar_lea.vmem [#allocation9], %s11923_s29 }
 0x120   : > { %s540_s23 = sshll.u32 %s533_s26, 4  ;;  %s538_s16 = scalar_lea.hbm %s13588_s3, %s9013_s21  ;;  %s541_s23 = int_to_ptr.vmem [resolvable:$true] %s540_s23 }
 0x121   : > { %s11439_s24 = scalar_lea.hbm %s538_s16, 16  ;;  %s11443_s10 = scalar_lea.hbm %s13588_s3, 32 }
 0x122   : > { %p11440_p7 = scmp.ne.s32.totalorder %s538_s16, %s11439_s24  ;;  %p11444_p4 = scmp.lt.u32.totalorder %s538_s16, %s13588_s3 }
 0x123   : > { %p11445_p2 = scmp.lt.u32.totalorder %s11443_s10, %s11439_s24  ;;  %p11447_p0 = scmp.lt.u32.totalorder %s11439_s24, %s538_s16 }
 0x124   : > { %p11441_p10 = pnand %p11440_p7, %p11902_p8 }
 0x125   : > { %p11446_p9 = por %p11445_p2, %p11444_p4 }
 0x126   : > { %p11442_p1 = pneg %p11441_p10 }
 0x127   : > { %p11448_p12 = por %p11447_p0, %p11446_p9 }
 0x129   : > { %p11449_p13 = pnand %p11448_p12, %p11442_p1 }
 0x12b   : > { %11452 = shalt.err (!%p11449_p13)
}
 0x12c   : > { %s11453_s19 = scalar_lea.vmem %s541_s23, 16  ;;  %s11751_s28 = smov [#allocation9]  }
 0x12d   : > { %p11454_p6 = scmp.ne.s32.totalorder %s541_s23, %s11453_s19  ;;  %s11457_s4 = sshll.u32 %s11751_s28, 4  ;;  %s11458_s4 = int_to_ptr.vmem [resolvable:$false] %s11457_s4 }
 0x12e   : > { %s11459_s1 = scalar_lea.vmem %s11458_s4, 32  ;;  %p11460_p11 = scmp.lt.s32.totalorder %s541_s23, %s11458_s4 }
 0x12f   : > { %p11455_p3 = pnand %p11454_p6, %p11902_p8  ;;  %p11461_p7 = scmp.lt.s32.totalorder %s11459_s1, %s11453_s19 }
 0x131   : > { %p11456_p5 = pneg %p11455_p3  ;;  %p11462_p10 = por %p11461_p7, %p11460_p11 }
 0x133   : > { %p11463_p2 = pnand %p11462_p10, %p11456_p5 }
 0x135   : > { %11466 = shalt.err (!%p11463_p2)
}
 0x136   : > { %s13671_s8 = scalar_lea.sflag [#allocation8], %s11926_s30  ;;  %s10721_s10 = smul.u32 6, %s11923_s29 }
 0x137   : > { %10727 = dma.hbm_to_vmem [thread:$0]  (%p11902_p8), %s538_s16, 16, %s541_s23, %s13671_s8  }
 0x138   : > { %s10722_s12 = smul.u32 96, %s11731_s18  ;;  %s572_s2 = scalar_lea.vmem [#allocation12], %s10721_s10 }
 0x139   : > { %s579_s21 = sshll.u32 %s572_s2, 4  ;;  %s12247_s27 = scalar_lea.hbm %s13592_s7, %s12030_s20  ;;  %s12241_s21 = int_to_ptr.vmem [resolvable:$true] %s579_s21 }
 0x13a   : > { %s12239_s0 = scalar_lea.hbm %s13590_s5, %s10722_s12  ;;  %s11471_s28 = scalar_lea.hbm %s13590_s5, 192 }
 0x13b   : > { %s11467_s23 = scalar_lea.hbm %s12239_s0, 96  ;;  %p11472_p0 = scmp.lt.u32.totalorder %s12239_s0, %s13590_s5 }
 0x13c   : > { %p11468_p1 = scmp.ne.s32.totalorder %s12239_s0, %s11467_s23  ;;  %p11473_p12 = scmp.lt.u32.totalorder %s11471_s28, %s11467_s23 }
 0x13d   : > { %p11475_p6 = scmp.lt.u32.totalorder %s11467_s23, %s12239_s0 }
 0x13e   : > { %p11469_p4 = pnand %p11468_p1, %p11902_p8  ;;  %p11474_p13 = por %p11473_p12, %p11472_p0 }
 0x140   : > { %p11470_p9 = pneg %p11469_p4  ;;  %p11476_p3 = por %p11475_p6, %p11474_p13 }
 0x142   : > { %p11477_p5 = pnand %p11476_p3, %p11470_p9 }
 0x144   : > { %11480 = shalt.err (!%p11477_p5)
}
 0x145   : > { %s11481_s8 = scalar_lea.vmem %s12241_s21, 96  ;;  %s11752_s10 = smov [#allocation12]  }
 0x146   : > { %p11482_p11 = scmp.ne.s32.totalorder %s12241_s21, %s11481_s8  ;;  %s11485_s12 = sshll.u32 %s11752_s10, 4  ;;  %s11486_s12 = int_to_ptr.vmem [resolvable:$false] %s11485_s12 }
 0x147   : > { %s11487_s14 = scalar_lea.vmem %s11486_s12, 192  ;;  %p11488_p2 = scmp.lt.s32.totalorder %s12241_s21, %s11486_s12 }
 0x148   : > { %p11483_p7 = pnand %p11482_p11, %p11902_p8  ;;  %p11489_p1 = scmp.lt.s32.totalorder %s11487_s14, %s11481_s8 }
 0x14a   : > { %p11484_p10 = pneg %p11483_p7  ;;  %p11490_p4 = por %p11489_p1, %p11488_p2 }
 0x14c   : > { %p11491_p0 = pnand %p11490_p4, %p11484_p10 }
 0x14e   : > { %11494 = shalt.err (!%p11491_p0)
}
 0x14f   : > { %s11753_s24 = smov 48   ;;  %s11754_s2 = smov 3  }
 0x150   : > { %s13672_s26 = scalar_lea.sflag [#allocation11], %s11926_s30  ;;  %s614_s6 = scalar_lea.vmem [#allocation15], %s12000_s17 }
 0x151   : > { %10729 = dma.hbm_to_vmem [thread:$0]  (%p11902_p8), %s12239_s0, 96, %s12241_s21, %s13672_s26, %s11753_s24, %s11753_s24, %s11754_s2  }
 0x152   : > { %s621_s23 = sshll.u32 %s614_s6, 4  ;;  %s13673_s28 = sld [smem:[#allocation54_spill]]  ;;  %s12273_s23 = int_to_ptr.vmem [resolvable:$true] %s621_s23 }
 0x153   : > { %s11495_s1 = scalar_lea.hbm %s12247_s27, 32  ;;  %s11499_s12 = scalar_lea.hbm %s13592_s7, 64 }
 0x154   : > { %p11496_p9 = scmp.ne.s32.totalorder %s12247_s27, %s11495_s1  ;;  %p11500_p6 = scmp.lt.u32.totalorder %s12247_s27, %s13592_s7 }
 0x155   : > { %p11501_p3 = scmp.lt.u32.totalorder %s11499_s12, %s11495_s1  ;;  %p11503_p11 = scmp.lt.u32.totalorder %s11495_s1, %s12247_s27 }
 0x156   : > { %p11497_p12 = pnand %p11496_p9, %p11902_p8 }
 0x157   : > { %p11502_p5 = por %p11501_p3, %p11500_p6 }
 0x158   : > { %s12279_s4 = scalar_lea.hbm %s13673_s28, %s12030_s20  ;;  %p11498_p13 = pneg %p11497_p12 }
 0x159   : > { %p11504_p7 = por %p11503_p11, %p11502_p5 }
 0x15b   : > { %p11505_p10 = pnand %p11504_p7, %p11498_p13 }
 0x15d   : > { %11508 = shalt.err (!%p11505_p10)
}
 0x15e   : > { %s11509_s21 = scalar_lea.vmem %s12273_s23, 32  ;;  %s11755_s24 = smov [#allocation15]  }
 0x15f   : > { %p11510_p2 = scmp.ne.s32.totalorder %s12273_s23, %s11509_s21  ;;  %s11513_s2 = sshll.u32 %s11755_s24, 4  ;;  %s11514_s2 = int_to_ptr.vmem [resolvable:$false] %s11513_s2 }
 0x160   : > { %s11515_s26 = scalar_lea.vmem %s11514_s2, 64  ;;  %p11516_p0 = scmp.lt.s32.totalorder %s12273_s23, %s11514_s2 }
 0x161   : > { %p11511_p1 = pnand %p11510_p2, %p11902_p8  ;;  %p11517_p9 = scmp.lt.s32.totalorder %s11515_s26, %s11509_s21 }
 0x163   : > { %p11512_p4 = pneg %p11511_p1  ;;  %p11518_p12 = por %p11517_p9, %p11516_p0 }
 0x165   : > { %p11519_p6 = pnand %p11518_p12, %p11512_p4 }
 0x167   : > { %11522 = shalt.err (!%p11519_p6)
}
 0x168   : > { %s13674_s6 = scalar_lea.sflag [#allocation14], %s11926_s30  ;;  %s656_s16 = scalar_lea.vmem [#allocation18], %s12000_s17 }
 0x169   : > { %10731 = dma.hbm_to_vmem [thread:$0]  (%p11902_p8), %s12247_s27, 32, %s12273_s23, %s13674_s6, %s13669_s9, %s13669_s9, %s13668_s22  }
 0x16a   : > { %s663_s19 = sshll.u32 %s656_s16, 4  ;;  %s9031_s1 = sshll.u32 %s11923_s29, 5  ;;  %s12309_s19 = int_to_ptr.vmem [resolvable:$true] %s663_s19 }
 0x16b   : > { %s11523_s8 = scalar_lea.hbm %s12279_s4, 32  ;;  %s11527_s14 = scalar_lea.hbm %s13673_s28, 64 }
 0x16c   : > { %p11524_p13 = scmp.ne.s32.totalorder %s12279_s4, %s11523_s8  ;;  %p11528_p11 = scmp.lt.u32.totalorder %s12279_s4, %s13673_s28 }
 0x16d   : > { %p11529_p7 = scmp.lt.u32.totalorder %s11527_s14, %s11523_s8  ;;  %p11531_p2 = scmp.lt.u32.totalorder %s11523_s8, %s12279_s4 }
 0x16e   : > { %p11525_p3 = pnand %p11524_p13, %p11902_p8 }
 0x16f   : > { %p11530_p10 = por %p11529_p7, %p11528_p11 }
 0x170   : > { %p11526_p5 = pneg %p11525_p3 }
 0x171   : > { %p11532_p1 = por %p11531_p2, %p11530_p10 }
 0x173   : > { %p11533_p4 = pnand %p11532_p1, %p11526_p5 }
 0x175   : > { %11536 = shalt.err (!%p11533_p4)
}
 0x176   : > { %s11537_s27 = scalar_lea.vmem %s12309_s19, 32  ;;  %s11756_s23 = smov [#allocation18]  }
 0x177   : > { %p11538_p0 = scmp.ne.s32.totalorder %s12309_s19, %s11537_s27  ;;  %s11541_s24 = sshll.u32 %s11756_s23, 4  ;;  %s11542_s24 = int_to_ptr.vmem [resolvable:$false] %s11541_s24 }
 0x178   : > { %s11543_s2 = scalar_lea.vmem %s11542_s24, 64  ;;  %p11544_p6 = scmp.lt.s32.totalorder %s12309_s19, %s11542_s24 }
 0x179   : > { %p11539_p9 = pnand %p11538_p0, %p11902_p8  ;;  %p11545_p13 = scmp.lt.s32.totalorder %s11543_s2, %s11537_s27 }
 0x17b   : > { %p11540_p12 = pneg %p11539_p9  ;;  %p11546_p3 = por %p11545_p13, %p11544_p6 }
 0x17d   : > { %p11547_p11 = pnand %p11546_p3, %p11540_p12 }
 0x17f   : > { %11550 = shalt.err (!%p11547_p11)
}
 0x180   : > { %s13675_s26 = scalar_lea.sflag [#allocation17], %s11926_s30  ;;  %s10126_s6 = sshll.u32 %s11731_s18, 9 }
 0x181   : > { %10733 = dma.hbm_to_vmem [thread:$0]  (%p11902_p8), %s12279_s4, 32, %s12309_s19, %s13675_s26, %s13669_s9, %s13669_s9, %s13668_s22  }
 0x182   : > { %s698_s16 = scalar_lea.vmem [#allocation21], %s9031_s1  ;;  %s12343_s14 = scalar_lea.hbm %s13596_s11, %s10126_s6 }
 0x183   : > { %s705_s8 = sshll.u32 %s698_s16, 4  ;;  %s11551_s0 = scalar_lea.hbm %s12343_s14, 512  ;;  %s12345_s8 = int_to_ptr.vmem [resolvable:$true] %s705_s8 }
 0x184   : > { %p11552_p5 = scmp.ne.s32.totalorder %s12343_s14, %s11551_s0  ;;  %s11555_s19 = scalar_lea.hbm %s13596_s11, 1024 }
 0x185   : > { %p11556_p2 = scmp.lt.u32.totalorder %s12343_s14, %s13596_s11  ;;  %p11557_p1 = scmp.lt.u32.totalorder %s11555_s19, %s11551_s0 }
 0x186   : > { %p11553_p7 = pnand %p11552_p5, %p11902_p8  ;;  %p11559_p0 = scmp.lt.u32.totalorder %s11551_s0, %s12343_s14 }
 0x187   : > { %p11558_p4 = por %p11557_p1, %p11556_p2 }
 0x188   : > { %p11554_p10 = pneg %p11553_p7 }
 0x189   : > { %p11560_p9 = por %p11559_p0, %p11558_p4 }
 0x18b   : > { %p11561_p12 = pnand %p11560_p9, %p11554_p10 }
 0x18d   : > { %11564 = shalt.err (!%p11561_p12)
}
 0x18e   : > { %s11565_s27 = scalar_lea.vmem %s12345_s8, 512  ;;  %s11757_s23 = smov [#allocation21]  }
 0x18f   : > { %p11566_p6 = scmp.ne.s32.totalorder %s12345_s8, %s11565_s27  ;;  %s11569_s24 = sshll.u32 %s11757_s23, 4  ;;  %s11570_s24 = int_to_ptr.vmem [resolvable:$false] %s11569_s24 }
 0x190   : > { %s11571_s2 = scalar_lea.vmem %s11570_s24, 1024  ;;  %p11572_p11 = scmp.lt.s32.totalorder %s12345_s8, %s11570_s24 }
 0x191   : > { %p11567_p13 = pnand %p11566_p6, %p11902_p8  ;;  %p11573_p5 = scmp.lt.s32.totalorder %s11571_s2, %s11565_s27 }
 0x193   : > { %p11568_p3 = pneg %p11567_p13  ;;  %p11574_p7 = por %p11573_p5, %p11572_p11 }
 0x195   : > { %p11575_p2 = pnand %p11574_p7, %p11568_p3 }
 0x197   : > { %11578 = shalt.err (!%p11575_p2)
}
 0x198   : > { %s11758_s26 = smov 256   ;;  %s13676_s6 = scalar_lea.sflag [#allocation20], %s11926_s30 }
 0x199   : > { %10735 = dma.hbm_to_vmem [thread:$0]  (%p11902_p8), %s12343_s14, 512, %s12345_s8, %s13676_s6, %s11758_s26, %s11758_s26, %s13669_s9  }
 0x19a   : > { %s12375_s12 = scalar_lea.hbm %s13598_s13, %s12030_s20  ;;  %s740_s0 = scalar_lea.vmem [#allocation24], %s12000_s17 }
 0x19b   : > { %s747_s4 = sshll.u32 %s740_s0, 4  ;;  %s11579_s29 = scalar_lea.hbm %s12375_s12, 32  ;;  %s12378_s4 = int_to_ptr.vmem [resolvable:$true] %s747_s4 }
 0x19c   : > { %p11580_p10 = scmp.ne.s32.totalorder %s12375_s12, %s11579_s29  ;;  %s11583_s14 = scalar_lea.hbm %s13598_s13, 64 }
 0x19d   : > { %p11584_p0 = scmp.lt.u32.totalorder %s12375_s12, %s13598_s13  ;;  %p11585_p9 = scmp.lt.u32.totalorder %s11583_s14, %s11579_s29 }
 0x19e   : > { %p11581_p1 = pnand %p11580_p10, %p11902_p8  ;;  %p11587_p6 = scmp.lt.u32.totalorder %s11579_s29, %s12375_s12 }
 0x19f   : > { %p11586_p12 = por %p11585_p9, %p11584_p0 }
 0x1a0   : > { %p11582_p4 = pneg %p11581_p1 }
 0x1a1   : > { %p11588_p13 = por %p11587_p6, %p11586_p12 }
 0x1a3   : > { %p11589_p3 = pnand %p11588_p13, %p11582_p4 }
 0x1a5   : > { %11592 = shalt.err (!%p11589_p3)
}
 0x1a6   : > { %s11593_s27 = scalar_lea.vmem %s12378_s4, 32  ;;  %s11759_s23 = smov [#allocation24]  }
 0x1a7   : > { %p11594_p11 = scmp.ne.s32.totalorder %s12378_s4, %s11593_s27  ;;  %s11597_s24 = sshll.u32 %s11759_s23, 4  ;;  %s11598_s24 = int_to_ptr.vmem [resolvable:$false] %s11597_s24 }
 0x1a8   : > { %s11599_s2 = scalar_lea.vmem %s11598_s24, 64  ;;  %p11600_p2 = scmp.lt.s32.totalorder %s12378_s4, %s11598_s24 }
 0x1a9   : > { %p11595_p5 = pnand %p11594_p11, %p11902_p8  ;;  %p11601_p10 = scmp.lt.s32.totalorder %s11599_s2, %s11593_s27 }
 0x1ab   : > { %p11596_p7 = pneg %p11595_p5  ;;  %p11602_p1 = por %p11601_p10, %p11600_p2 }
 0x1ad   : > { %p11603_p0 = pnand %p11602_p1, %p11596_p7 }
 0x1af   : > { %11606 = shalt.err (!%p11603_p0)
}
 0x1b0   : > { %s13677_s26 = scalar_lea.sflag [#allocation23], %s11926_s30  ;;  %s12410_s10 = scalar_lea.hbm %s13600_s15, %s12030_s20 }
 0x1b1   : > { %10737 = dma.hbm_to_vmem [thread:$0]  (%p11902_p8), %s12375_s12, 32, %s12378_s4, %s13677_s26, %s13669_s9, %s13669_s9, %s13668_s22  }
 0x1b2   : > { %s782_s0 = scalar_lea.vmem [#allocation27], %s12000_s17  ;;  %s11607_s19 = scalar_lea.hbm %s12410_s10, 32 }
 0x1b3   : > { %s789_s29 = sshll.u32 %s782_s0, 4  ;;  %p11608_p4 = scmp.ne.s32.totalorder %s12410_s10, %s11607_s19  ;;  %s12413_s29 = int_to_ptr.vmem [resolvable:$true] %s789_s29 }
 0x1b4   : > { %s11611_s4 = scalar_lea.hbm %s13600_s15, 64  ;;  %p11612_p6 = scmp.lt.u32.totalorder %s12410_s10, %s13600_s15 }
 0x1b5   : > { %p11609_p9 = pnand %p11608_p4, %p11902_p8  ;;  %p11613_p13 = scmp.lt.u32.totalorder %s11611_s4, %s11607_s19 }
 0x1b6   : > { %p11615_p11 = scmp.lt.u32.totalorder %s11607_s19, %s12410_s10 }
 0x1b7   : > { %p11610_p12 = pneg %p11609_p9  ;;  %p11614_p3 = por %p11613_p13, %p11612_p6 }
 0x1b9   : > { %p11616_p5 = por %p11615_p11, %p11614_p3 }
 0x1bb   : > { %p11617_p7 = pnand %p11616_p5, %p11610_p12 }
 0x1bd   : > { %11620 = shalt.err (!%p11617_p7)
}
 0x1be   : > { %s11621_s17 = scalar_lea.vmem %s12413_s29, 32  ;;  %s11760_s1 = smov [#allocation27]  }
 0x1bf   : > { %p11622_p2 = scmp.ne.s32.totalorder %s12413_s29, %s11621_s17  ;;  %s11625_s21 = sshll.u32 %s11760_s1, 4  ;;  %s11626_s21 = int_to_ptr.vmem [resolvable:$false] %s11625_s21 }
 0x1c0   : > { %s11627_s27 = scalar_lea.vmem %s11626_s21, 64  ;;  %p11628_p0 = scmp.lt.s32.totalorder %s12413_s29, %s11626_s21 }
 0x1c1   : > { %p11623_p10 = pnand %p11622_p2, %p11902_p8  ;;  %p11629_p4 = scmp.lt.s32.totalorder %s11627_s27, %s11621_s17 }
 0x1c3   : > { %p11624_p1 = pneg %p11623_p10  ;;  %p11630_p9 = por %p11629_p4, %p11628_p0 }
 0x1c5   : > { %p11631_p6 = pnand %p11630_p9, %p11624_p1 }
 0x1c7   : > { %11634 = shalt.err (!%p11631_p6)
}
 0x1c8   : > { %s13678_s23 = scalar_lea.sflag [#allocation26], %s11926_s30 }
 0x1c9   : > { %10739 = dma.hbm_to_vmem [thread:$0]  (%p11902_p8), %s12410_s10, 32, %s12413_s29, %s13678_s23, %s13669_s9, %s13669_s9, %s13668_s22  }
 0x1ca PF: > { %p9046_p12 = scmp.ge.s32.totalorder %s11731_s18, 1  ;;  %p797_p13 = scmp.lt.s32.totalorder %s11731_s18, 3 }
 0x1cc   : > { %p798_p3 = pnand %p9046_p12, %p797_p13 }
 0x1cd   : > { %s13679_s24 = sld [smem:[#allocation40_spill]] (!%p798_p3)  ;;  %s13680_s2 = sld [smem:[#allocation45_spill]] (!%p798_p3) }
 0x1ce   : > { %801 = sbr.rel (%p798_p3) target bundleno = 6818 (0x1aa2), region = 80 }
 0x1d3   : > { %s12444_s26 = sand.u32 (!%p798_p3), 1, %s13679_s24   ;;  %p13681_p11 = scmp.ne.s32.totalorder (!%p798_p3), %s13680_s2, 0 }
 0x1d4   : > { %s9047_s25 = sshll.u32 (!%p798_p3), %s12444_s26, 4  ;;  %s804_s6 = scalar_lea.sflag (!%p798_p3), [#allocation5], %s12444_s26 }
 0x1d5   : > { %s12448_s16 = scalar_lea.vmem [#allocation4], %s9047_s25 }
 0x1d6   : > { %11682 = dma.done.wait (%p13681_p11), %s804_s6, 256  }
 0x1d7   : > { %11684 = vsyncadd (%p13681_p11), %s804_s6, 4294967040  ;;  %s13682_s30 = sld [smem:[#allocation42_spill]]  ;;  %s9048_s9 = sshll.u32 %s12444_s26, 2 }
 0x1d8   : > { %s12459_s0 = scalar_lea.vmem [#allocation7], %s9048_s9 }
 0x1dd   : > { %s12455_s22 = sand.u32 1, %s13682_s30  }
 0x1de   : > { %s813_s10 = scalar_lea.sflag [#allocation8], %s12455_s22 }
 0x1df   : > { %11686 = dma.done.wait (%p13681_p11), %s813_s10, 80  }
 0x1e0   : > { %11688 = vsyncadd (%p13681_p11), %s813_s10, 4294967216  ;;  %s10723_s29 = smul.u32 384, %s12444_s26  ;;  %s824_s19 = scalar_lea.vmem [#allocation9], %s12444_s26 }
 0x1e1   : > { %s830_s8 = scalar_lea.sflag [#allocation11], %s12455_s22 }
 0x1e2   : > { %s12468_s12 = scalar_lea.vmem [#allocation10], %s10723_s29 }
 0x1e3   : > { %11690 = dma.done.wait (%p13681_p11), %s830_s8, 6240  }
 0x1e4   : > { %11692 = vsyncadd (%p13681_p11), %s830_s8, 4294961056  ;;  %s10724_s4 = smul.u32 6, %s12444_s26  ;;  %s9049_s14 = sshll.u32 %s12444_s26, 7 }
 0x1e5   : > { %s848_s17 = scalar_lea.sflag [#allocation14], %s12455_s22  ;;  %s12479_s1 = scalar_lea.vmem [#allocation13], %s9049_s14 }
 0x1e6   : > { %s12476_s20 = scalar_lea.vmem [#allocation12], %s10724_s4 }
 0x1e7   : > { %11694 = dma.done.wait (%p13681_p11), %s848_s17, 2080  }
 0x1e8   : > { %11696 = vsyncadd (%p13681_p11), %s848_s17, 4294965216  ;;  %s12486_s21 = sshll.u32 %s12444_s26, 1  ;;  %s866_s23 = scalar_lea.sflag [#allocation17], %s12455_s22 }
 0x1e9   : > { %s860_s27 = scalar_lea.vmem [#allocation15], %s12486_s21  ;;  %s869_s24 = scalar_lea.vmem [#allocation16], %s12486_s21 }
 0x1ea   : > { %11698 = dma.done.wait (%p13681_p11), %s866_s23, 64  }
 0x1eb   : > { %11700 = vsyncadd (%p13681_p11), %s866_s23, 4294967232  ;;  %s9053_s25 = sshll.u32 %s12444_s26, 11  ;;  %s878_s6 = scalar_lea.vmem [#allocation18], %s12486_s21 }
 0x1ec   : > { %s884_s9 = scalar_lea.sflag [#allocation20], %s12455_s22  ;;  %s12498_s10 = scalar_lea.vmem [#allocation19], %s9053_s25 }
 0x1ed   : > { %11702 = dma.done.wait (%p13681_p11), %s884_s9, 33280  }
 0x1ee   : > { %11704 = vsyncadd (%p13681_p11), %s884_s9, 4294934016  ;;  %s9054_s29 = sshll.u32 %s12444_s26, 5  ;;  %s902_s4 = scalar_lea.sflag [#allocation23], %s12455_s22 }
 0x1ef   : > { %s12505_s8 = scalar_lea.vmem [#allocation21], %s9054_s29  ;;  %s12508_s14 = scalar_lea.vmem [#allocation22], %s9053_s25 }
 0x1f0   : > { %11706 = dma.done.wait (%p13681_p11), %s902_s4, 32800  }
 0x1f1   : > { %11708 = vsyncadd (%p13681_p11), %s902_s4, 4294934496  ;;  %s914_s17 = scalar_lea.vmem [#allocation24], %s12486_s21  ;;  %s920_s23 = scalar_lea.sflag [#allocation26], %s12455_s22 }
 0x1f2   : > { %s923_s9 = scalar_lea.vmem [#allocation25], %s12486_s21 }
 0x1f3   : > { %11710 = dma.done.wait (%p13681_p11), %s920_s23, 64  }
 0x1f4   : > { %11712 = vsyncadd (%p13681_p11), %s920_s23, 4294967232  ;;  %v11761_v0 = vmov 0.0   ;;  %vm11762_vm0 = vmmov 0   ;;  %vm1064_vm1 = vcmask 1043456   ;;  %v1052_v1 = vld [vmem:[%s12459_s0] sm:$0xf]  ;;  %v1117_v41 = vlaneseq }
 0x1f5   : > { %10553 = vmatprep.subr.bf16.mxu0 %v11761_v0  ;;  %10555 = vmatprep.mubr.msk.bf16.mxu0 %vm11762_vm0, %v11761_v0  ;;  %v1049_v2 = vld [vmem:[%s12448_s16] sm:$0xff]  ;;  %v1050_v3 = vld [vmem:[%s12448_s16 + $0x8] sm:$0xff]  ;;  %v1066_v4 = vsel %vm1064_vm1, %v1052_v1, 0  ;;  %vm1060_vm2 = vcmask 64512   ;;  %v11763_v30 = vmov 0   ;;  %vm1383_vm3 = vcmask 523264  }
 0x1f6   : > { %v1051_v5 = vpack.c.bf16 %v1050_v3, %v1049_v2  ;;  %v10821_v6 = vld [vmem:[%s12468_s12 + $0x4] ss:$12 sps:$4 sm:$0xff]   ;;  %10554 = vmatpush3.bf16.msra.mxu0 %v1066_v4  ;;  %v10823_v7 = vld [vmem:[%s12468_s12] ss:$12 sps:$4 sm:$0xff]   ;;  %v10824_v8 = vld [vmem:[%s12468_s12 + $0x8] ss:$12 sps:$4 sm:$0xff]   ;;  %1331 = vmatprep.mubr.bf16.mxu1 %v11763_v30 }
 0x1f7   : > { %1299 = vmatprep.subr.bf16.mxu1 %v10821_v6  ;;  %10559 = vmatprep.subr.bf16.mxu0 %v11761_v0  ;;  %v10825_v9 = vld [vmem:[%s12468_s12 + $0x1c] ss:$12 sps:$4 sm:$0xff]   ;;  %v10827_v10 = vld [vmem:[%s12468_s12 + $0x18] ss:$12 sps:$4 sm:$0xff]   ;;  %v10828_v11 = vld [vmem:[%s12468_s12 + $0x20] ss:$12 sps:$4 sm:$0xff]  }
 0x1f8   : > { %1300 = vmatpush1.bf16.msra.mxu1 %v10823_v7  ;;  %v10829_v12 = vld [vmem:[%s12468_s12 + $0x34] ss:$12 sps:$4 sm:$0xff]   ;;  %v10831_v13 = vld [vmem:[%s12468_s12 + $0x30] ss:$12 sps:$4 sm:$0xff]   ;;  %v10833_v14 = vld [vmem:[%s12468_s12 + $0x4c] ss:$12 sps:$4 sm:$0xff]  }
 0x1f9   : > { %10556 = vmatmul.mubr.msk.bf16.vlgmr.msra.gmra.mrb[0].mxu0 %vm1060_vm2, %v1051_v5  ;;  %1301 = vmatprep.subr.bf16.mxu1 %v10825_v9  ;;  %v10832_v15 = vld [vmem:[%s12468_s12 + $0x38] ss:$12 sps:$4 sm:$0xff]   ;;  %v10835_v16 = vld [vmem:[%s12468_s12 + $0x48] ss:$12 sps:$4 sm:$0xff]   ;;  %v10836_v17 = vld [vmem:[%s12468_s12 + $0x50] ss:$12 sps:$4 sm:$0xff]  }
 0x1fa   : > { %10560 = vmatpush3.bf16.msra.mxu0 %v10824_v8  ;;  %10575 = vmatprep.mubr.msk.bf16.mxu0 %vm11762_vm0, %v11761_v0  ;;  %v10837_v18 = vld [vmem:[%s12468_s12 + $0x64] ss:$12 sps:$4 sm:$0xff]   ;;  %v10839_v19 = vld [vmem:[%s12468_s12 + $0x60] ss:$12 sps:$4 sm:$0xff]   ;;  %v10841_v20 = vld [vmem:[%s12468_s12 + $0x7c] ss:$12 sps:$4 sm:$0xff]  }
 0x1fb   : > { %10561 = vmatprep.subr.bf16.mxu0 %v11761_v0  ;;  %v10840_v21 = vld [vmem:[%s12468_s12 + $0x68] ss:$12 sps:$4 sm:$0xff]   ;;  %v10843_v22 = vld [vmem:[%s12468_s12 + $0x78] ss:$12 sps:$4 sm:$0xff]   ;;  %v10844_v23 = vld [vmem:[%s12468_s12 + $0x80] ss:$12 sps:$4 sm:$0xff]  }
 0x1fc   : > { %1302 = vmatpush1.bf16.msra.mxu1 %v10827_v10  ;;  %v10845_v24 = vld [vmem:[%s12468_s12 + $0x94] ss:$12 sps:$4 sm:$0xff]   ;;  %v10847_v25 = vld [vmem:[%s12468_s12 + $0x90] ss:$12 sps:$4 sm:$0xff]   ;;  %v10848_v26 = vld [vmem:[%s12468_s12 + $0x98] ss:$12 sps:$4 sm:$0xff]  }
 0x1fd   : > { %1303 = vmatprep.subr.bf16.mxu1 %v10829_v12  ;;  %v10849_v27 = vld [vmem:[%s12468_s12 + $0xac] ss:$12 sps:$4 sm:$0xff]   ;;  %v10851_v28 = vld [vmem:[%s12468_s12 + $0xa8] ss:$12 sps:$4 sm:$0xff]   ;;  %v10852_v29 = vld [vmem:[%s12468_s12 + $0xb0] ss:$12 sps:$4 sm:$0xff]  }
 0x1fe   : > { %10562 = vmatpush3.bf16.msra.mxu0 %v10828_v11  ;;  %v9060_v31 = vld [vmem:[%s824_s19] ss:$0 sm:$0xff]  ;;  %v12581_v42 = vshrl.u32 %v1117_v41, 7  ;;  %v1154_v44 = vld [vmem:[%s12476_s20] sm:$0x7]  ;;  %s11764_s2 = smov 64  }
 0x1ff   : > { %10563 = vmatprep.subr.bf16.mxu0 %v11761_v0  ;;  %s9062_s16 = sshll.u32 %s13682_s30, 7  ;;  %v1118_v1 = vand.u32 127, %v1117_v41  ;;  %vm8619_vm6 = vcmask 1041409  }
 0x200   : > { %1304 = vmatpush1.bf16.msra.mxu1 %v10831_v13  ;;  %v12584_v43 = vsub.s32 0, %v12581_v42  ;;  %v12588_v45 = vsub.s32 1, %v12581_v42  ;;  %v12592_v47 = vsub.s32 2, %v12581_v42  ;;  %s1112_s22 = sld [smem:[#allocation3 + %s9062_s16]]  ;;  %s1114_s0 = sadd.s32 1, %s9062_s16 }
 0x201   : > { %1305 = vmatprep.subr.bf16.mxu1 %v10833_v14  ;;  %s1115_s19 = sld [smem:[#allocation3 + %s1114_s0]] }
 0x202   : > { %10564 = vmatpush3.bf16.msra.mxu0 %v10832_v15  ;;  %v1159_v46 = vrot.slane %v1154_v44, %v12584_v43  ;;  %v1163_v48 = vrot.slane %v1154_v44, %v12588_v45  ;;  %v1167_v52 = vrot.slane %v1154_v44, %v12592_v47 }
 0x203   : > { %10565 = vmatprep.subr.bf16.mxu0 %v11761_v0 }
 0x204   : > { %1306 = vmatpush1.bf16.msra.mxu1 %v10835_v16 }
 0x205   : > { %1307 = vmatprep.subr.bf16.mxu1 %v10837_v18 }
 0x206   : > { %10566 = vmatpush3.bf16.msra.mxu0 %v10836_v17  ;;  %v1113_v2 = vstv %s1112_s22 }
 0x207   : > { %10567 = vmatprep.subr.bf16.mxu0 %v11761_v0  ;;  %vm12614_vm4 = vcmp.le.s32.totalorder %v1118_v1, %v1113_v2  ;;  %v1116_v7 = vstv %s1115_s19 }
 0x208   : > { %1308 = vmatpush1.bf16.msra.mxu1 %v10839_v19  ;;  %vm12621_vm5 = vcmp.le.s32.totalorder %v1118_v1, %v1116_v7 }
 0x209   : > { %1309 = vmatprep.subr.bf16.mxu1 %v10841_v20 }
 0x20a   : > { %10568 = vmatpush3.bf16.msra.mxu0 %v10840_v21 }
 0x20b   : > { %10569 = vmatprep.subr.bf16.mxu0 %v11761_v0 }
 0x20c   : > { %1310 = vmatpush1.bf16.msra.mxu1 %v10843_v22 }
 0x20d   : > { %1311 = vmatprep.subr.bf16.mxu1 %v10845_v24 }
 0x20e   : > { %10570 = vmatpush3.bf16.msra.mxu0 %v10844_v23 }
 0x20f   : > { %10571 = vmatprep.subr.bf16.mxu0 %v11761_v0 }
 0x210   : > { %1312 = vmatpush1.bf16.msra.mxu1 %v10847_v25 }
 0x211   : > { %1313 = vmatprep.subr.bf16.mxu1 %v10849_v27 }
 0x212   : > { %10572 = vmatpush3.bf16.msra.mxu0 %v10848_v26 }
 0x213   : > { %10573 = vmatprep.subr.bf16.mxu0 %v11761_v0 }
 0x214   : > { %1314 = vmatpush1.bf16.msra.mxu1 %v10851_v28 }
 0x215   : > { %10609 = vmatprep.subr.mxu1 %v11761_v0 }
 0x216   : > { %10574 = vmatpush3.bf16.msra.mxu0 %v10852_v29 }
 0x217   : > { %10579 = vmatprep.subr.mxu0 %v11761_v0 }
 0x2cc   : > { %v1102_v32 = vpop.f32.mrb[0].mxu0 }
 0x2cd   : > { %v12567_v33 = vadd.f32 %v9060_v31, %v1102_v32  ;;  %v10557_v34 = vpop.f32.mrb[1].mxu0 }
 0x2ce   : > { %v1105_v35 = vpop.f32.mrb[2].mxu0 }
 0x2cf   : > { %v12569_v36 = vadd.f32 %v9060_v31, %v1105_v35  ;;  %v10558_v37 = vpop.f32.mrb[3].mxu0  ;;  %v1109_v38 = vmax.f32 %v12567_v33, 0.0  ;;  %v2232_v33 = vld [vmem:[%s12498_s10 + $0x88] sm:$0xff] }
 0x2d1   : > { %v1110_v39 = vmax.f32 %v12569_v36, 0.0 }
 0x2d3   : > { %v1121_v40 = vpack.c.bf16 %v1110_v39, %v1109_v38 }
 0x2d5   : > { %1332 = vmatmul.mubr.bf16.vlgmr.msra.gmra.mrb[0].mxu1 %v1121_v40  ;;  %10576 = vmatmul.mubr.bf16.vlgmr.msra.gmra.mrb[4].mxu0 %v1121_v40 }
 0x2d6   : > { %10581 = vmatprep.mubr.msk.f32.mxu0 %vm11762_vm0, %v11761_v0  ;;  %10611 = vmatprep.mubr.msk.f32.mxu1 %vm11762_vm0, %v11761_v0 }
 0x3a8   : > { %v1333_v49 = vpop.f32.mrb[0].mxu1  ;;  %v1376_v50 = vpop.f32.mrb[4].mxu0 }
 0x3a9   : > { %v1334_v51 = vadd.f32 %v1333_v49, %v1159_v46  ;;  %v1335_v53 = vpop.f32.mrb[1].mxu1  ;;  %v10577_v54 = vpop.f32.mrb[5].mxu0  ;;  %v12606_v63 = vadd.f32 %v1376_v50, %v1167_v52 }
 0x3aa   : > { %v1336_v55 = vadd.f32 %v1335_v53, %v1163_v48  ;;  %v1337_v56 = vpop.f32.mrb[2].mxu1  ;;  %v1379_v57 = vpop.f32.mrb[6].mxu0 }
 0x3ab   : > { %v12596_v58 = vadd.f32 %v1379_v57, %v1167_v52  ;;  %v1339_v59 = vpop.f32.mrb[3].mxu1  ;;  %1712 = vrot.lane.b32.xlu1 %v1334_v51, %s11764_s2  ;;  %v10578_v60 = vpop.f32.mrb[7].mxu0  ;;  %v1338_v62 = vadd.f32 %v1337_v56, %v1159_v46 }
 0x3ac   : > { %10580 = vmatpush3.xpose.msk.msra.mxu0 %vm1383_vm3, %v1336_v55  ;;  %v1340_v61 = vadd.f32 %v1339_v59, %v1163_v48 }
 0x3ad   : > { %10584 = vmatprep.subr.mxu0 %v11761_v0 }
 0x3af   : > { %10582 = vmatmul.mubr.msk.f32.vlgmr.msra.gmra.mrb[8].mxu0 %vm1383_vm3, %v1334_v51 }
 0x3b0   : > { %10585 = vmatpush3.xpose.msk.msra.mxu0 %vm1383_vm3, %v1340_v61  ;;  %10586 = vmatprep.mubr.msk.f32.mxu0 %vm11762_vm0, %v11761_v0 }
 0x3b1   : > { %10589 = vmatprep.subr.mxu0 %v11761_v0 }
 0x3b3   : > { %10587 = vmatmul.mubr.msk.f32.vlgmr.msra.gmra.mrb[10].mxu0 %vm1383_vm3, %v1338_v62 }
 0x3b4   : > { %10590 = vmatpush3.msra.mxu0 %v12606_v63  ;;  %10591 = vmatprep.mubr.msk.f32.mxu0 %vm11762_vm0, %v11761_v0 }
 0x3b5   : > { %10594 = vmatprep.subr.mxu0 %v11761_v0 }
 0x41d   : > { %v1713_v26 = vpop.permute.xlu1 %1712 }
 0x482   : > { %v1456_v3 = vpop.f32.mrb[8].mxu0 }
 0x483   : > { %v1536_v5 = vmul.f32 0.125, %v1456_v3  ;;  %v10583_v6 = vpop.f32.mrb[9].mxu0 }
 0x485   : > { %v1542_v8 = vsel %vm12614_vm4, %v1536_v5, -1e+30 }
 0x486   : > { %v1532_v9 = vpop.f32.mrb[10].mxu0  ;;  %v1544_v10 = vsel %vm1060_vm2, %v1542_v8, -inf }
 0x487   : > { %v1537_v12 = vmul.f32 0.125, %v1532_v9  ;;  %1545 = vmax.xlane.f32.xlu0 %v1544_v10  ;;  %v10588_v13 = vpop.f32.mrb[11].mxu0 }
 0x489   : > { %v1543_v14 = vsel %vm12621_vm5, %v1537_v12, -1e+30 }
 0x48a   : > { %v1547_v15 = vsel %vm1060_vm2, %v1543_v14, -inf }
 0x48b   : > { %1548 = vmax.xlane.f32.xlu0 %v1547_v15 }
 0x4a1   : > { %1714 = vrot.lane.b32.xlu0 %v1336_v55, %s11764_s2 }
 0x514   : > { %v1546_v16 = vpop.xlane.xlu0 %1545 }
 0x515   : > { %v1550_v17 = vsub.f32 %v1542_v8, %v1546_v16  ;;  %v10853_v16 = vld [vmem:[%s12479_s1] sm:$0xff]  }
 0x517   : > { %v1552_v18 = vmul.f32 1.442695, %v1550_v17  ;;  %v10854_v17 = vld [vmem:[%s12479_s1 + $0x8] sm:$0xff]  }
 0x518   : > { %v1549_v21 = vpop.xlane.xlu0 %1548 }
 0x519   : > { %11157 = vpow2.f32 %v1552_v18  ;;  %v1551_v22 = vsub.f32 %v1543_v14, %v1549_v21  ;;  %v10855_v18 = vld [vmem:[%s12479_s1 + $0x10] sm:$0xff]   ;;  %v10858_v21 = vld [vmem:[%s12479_s1 + $0x28] sm:$0xff]  }
 0x51b   : > { %v1554_v23 = vmul.f32 1.442695, %v1551_v22  ;;  %v10859_v22 = vld [vmem:[%s12479_s1 + $0x30] sm:$0xff]  }
 0x51c   : > { %v1715_v37 = vpop.permute.xlu0 %1714 }
 0x51d   : > { %11159 = vpow2.f32 %v1554_v23  ;;  %v10860_v23 = vld [vmem:[%s12479_s1 + $0x38] sm:$0xff]  }
 0x523   : > { %v11158_v19 = vpop.eup %11157 }
 0x524   : > { %v1556_v20 = vsel %vm1060_vm2, %v11158_v19, 0.0 }
 0x525   : > { %1557 = vadd.xlane.f32.xlu1 %v1556_v20  ;;  %v10857_v20 = vld [vmem:[%s12479_s1 + $0x20] sm:$0xff]  }
 0x527   : > { %v11160_v24 = vpop.eup %11159 }
 0x528   : > { %v1559_v25 = vsel %vm1060_vm2, %v11160_v24, 0.0 }
 0x536   : > { %1792 = vrot.lane.b32.xlu1 %v1340_v61, %s11764_s2 }
 0x55a   : > { %1560 = vadd.xlane.f32.xlu1 %v1559_v25 }
 0x56b   : > { %1790 = vrot.lane.b32.xlu1 %v1338_v62, %s11764_s2 }
 0x5b2   : > { %v1558_v27 = vpop.xlane.xlu1 %1557 }
 0x5b3   : > { %11161 = vrcp.f32 %v1558_v27 }
 0x5b6   : > { %v1793_v31 = vpop.permute.xlu1 %1792 }
 0x5bd   : > { %v11162_v28 = vpop.eup %11161 }
 0x5be   : > { %v1564_v29 = vmul.f32 %v11162_v28, %v11158_v19  ;;  %v10856_v19 = vld [vmem:[%s12479_s1 + $0x18] sm:$0xff]  }
 0x5c0   : > { %10592 = vmatmul.mubr.msk.f32.vlgmr.msra.gmra.mrb[12].mxu0 %vm1060_vm2, %v1564_v29 }
 0x5c1   : > { %10595 = vmatpush3.msra.mxu0 %v12596_v58  ;;  %10596 = vmatprep.mubr.msk.f32.mxu0 %vm11762_vm0, %v11761_v0 }
 0x5c2   : > { %10599 = vmatprep.subr.mxu0 %v11761_v0 }
 0x5e7   : > { %v1561_v32 = vpop.xlane.xlu1 %1560 }
 0x5e8   : > { %11163 = vrcp.f32 %v1561_v32 }
 0x5eb   : > { %v1791_v40 = vpop.permute.xlu1 %1790 }
 0x5f2   : > { %v11164_v34 = vpop.eup %11163 }
 0x5f3   : > { %v1565_v35 = vmul.f32 %v11164_v34, %v11160_v24 }
 0x5f5   : > { %10597 = vmatmul.mubr.msk.f32.vlgmr.msra.gmra.mrb[14].mxu0 %vm1060_vm2, %v1565_v35 }
 0x5f6   : > { %10600 = vmatpush3.xpose.msk.msra.mxu0 %vm1383_vm3, %v1715_v37  ;;  %10601 = vmatprep.mubr.msk.f32.mxu0 %vm11762_vm0, %v11761_v0 }
 0x5f7   : > { %10604 = vmatprep.subr.mxu0 %v11761_v0 }
 0x5f9   : > { %10602 = vmatmul.mubr.msk.f32.vlgmr.msra.gmra.mrb[16].mxu0 %vm1383_vm3, %v1713_v26 }
 0x5fa   : > { %10605 = vmatpush3.xpose.msk.msra.mxu0 %vm1383_vm3, %v1793_v31  ;;  %10606 = vmatprep.mubr.msk.f32.mxu0 %vm11762_vm0, %v11761_v0 }
 0x5fb   : > { %10614 = vmatprep.subr.mxu0 %v11761_v0 }
 0x5fd   : > { %10607 = vmatmul.mubr.msk.f32.vlgmr.msra.gmra.mrb[18].mxu0 %vm1383_vm3, %v1791_v40  ;;  %v9099_v40 = vld [vmem:[%s860_s27] ss:$0 sm:$0xff] }
 0x5fe   : > { %10616 = vmatprep.mubr.msk.f32.mxu0 %vm11762_vm0, %v11761_v0 }
 0x693   : > { %v12651_v41 = vpop.f32.mrb[12].mxu0 }
 0x694   : > { %v10593_v44 = vpop.f32.mrb[13].mxu0 }
 0x6c8   : > { %v12653_v46 = vpop.f32.mrb[14].mxu0 }
 0x6c9   : > { %v10598_v48 = vpop.f32.mrb[15].mxu0 }
 0x6cc   : > { %v1786_v49 = vpop.f32.mrb[16].mxu0 }
 0x6cd   : > { %v1868_v50 = vmul.f32 0.125, %v1786_v49  ;;  %v10603_v51 = vpop.f32.mrb[17].mxu0 }
 0x6cf   : > { %v1870_v52 = vsel %vm12614_vm4, %v1868_v50, -1e+30 }
 0x6d0   : > { %v1864_v53 = vpop.f32.mrb[18].mxu0  ;;  %v1872_v54 = vsel %vm1060_vm2, %v1870_v52, -inf }
 0x6d1   : > { %v1869_v55 = vmul.f32 0.125, %v1864_v53  ;;  %1873 = vmax.xlane.f32.xlu0 %v1872_v54  ;;  %v10608_v56 = vpop.f32.mrb[19].mxu0  ;;  %v2215_v53 = vld [vmem:[%s12498_s10] sm:$0xff] }
 0x6d2   : > { %v2223_v54 = vld [vmem:[%s12498_s10 + $0x40] sm:$0xff] }
 0x6d3   : > { %v1871_v57 = vsel %vm12621_vm5, %v1869_v55, -1e+30  ;;  %v2216_v55 = vld [vmem:[%s12498_s10 + $0x8] sm:$0xff]  ;;  %v9110_v56 = vcombine.low %v2215_v53, %v2223_v54 }
 0x6d4   : > { %v1875_v59 = vsel %vm1060_vm2, %v1871_v57, -inf }
 0x6d5   : > { %1876 = vmax.xlane.f32.xlu1 %v1875_v59  ;;  %v2224_v59 = vld [vmem:[%s12498_s10 + $0x48] sm:$0xff] }
 0x6e6   : > { %1972 = vrot.lane.b32.xlu1 %v12596_v58, %s11764_s2 }
 0x75e   : > { %v1874_v60 = vpop.xlane.xlu0 %1873 }
 0x75f   : > { %v1878_v61 = vsub.f32 %v1870_v52, %v1874_v60  ;;  %v2231_v60 = vld [vmem:[%s12498_s10 + $0x80] sm:$0xff] }
 0x761   : > { %v1880_v62 = vmul.f32 1.442695, %v1878_v61  ;;  %v2239_v61 = vld [vmem:[%s12498_s10 + $0xc0] sm:$0xff] }
 0x762   : > { %v1877_v1 = vpop.xlane.xlu1 %1876  ;;  %v9126_v36 = vcombine.low %v2231_v60, %v2239_v61 }
 0x763   : > { %11165 = vpow2.f32 %v1880_v62  ;;  %v1879_v2 = vsub.f32 %v1871_v57, %v1877_v1  ;;  %v9111_v57 = vcombine.high %v2215_v53, %v2223_v54  ;;  %v9112_v62 = vcombine.low %v2216_v55, %v2224_v59  ;;  %v2311_v53 = vld [vmem:[%s12498_s10 + $0x300] sm:$0xff] }
 0x764   : > { %v9113_v1 = vcombine.high %v2216_v55, %v2224_v59  ;;  %v2319_v54 = vld [vmem:[%s12498_s10 + $0x340] sm:$0xff]  ;;  %v2312_v55 = vld [vmem:[%s12498_s10 + $0x308] sm:$0xff] }
 0x765   : > { %v1882_v3 = vmul.f32 1.442695, %v1879_v2  ;;  %v9127_v2 = vcombine.high %v2231_v60, %v2239_v61  ;;  %v9206_v59 = vcombine.low %v2311_v53, %v2319_v54 }
 0x766   : > { %v1973_v5 = vpop.permute.xlu1 %1972 }
 0x767   : > { %11167 = vpow2.f32 %v1882_v3  ;;  %10615 = vmatpush3.msra.mxu0 %v1973_v5  ;;  %v2240_v3 = vld [vmem:[%s12498_s10 + $0xc8] sm:$0xff] }
 0x768   : > { %3067 = vmatprep.subr.bf16.mxu0 %v9111_v57  ;;  %v2320_v57 = vld [vmem:[%s12498_s10 + $0x348] sm:$0xff] }
 0x769   : > { %v9208_v60 = vcombine.low %v2312_v55, %v2320_v57  ;;  %v9209_v61 = vcombine.high %v2312_v55, %v2320_v57  ;;  %v2274_v55 = vld [vmem:[%s12498_s10 + $0x1d8] sm:$0xff] }
 0x76d   : > { %v11166_v6 = vpop.eup %11165 }
 0x76e   : > { %v1884_v7 = vsel %vm1060_vm2, %v11166_v6, 0.0 }
 0x76f   : > { %1885 = vadd.xlane.f32.xlu0 %v1884_v7 }
 0x771   : > { %v11168_v8 = vpop.eup %11167 }
 0x772   : > { %v1887_v9 = vsel %vm1060_vm2, %v11168_v8, 0.0 }
 0x773   : > { %1888 = vadd.xlane.f32.xlu0 %v1887_v9 }
 0x789   : > { %1895 = vrot.lane.b32.xlu0 %v12606_v63, %s11764_s2 }
 0x7fc   : > { %v1886_v58 = vpop.xlane.xlu0 %1885 }
 0x7fd   : > { %11169 = vrcp.f32 %v1886_v58 }
 0x800   : > { %v1889_v10 = vpop.xlane.xlu0 %1888 }
 0x801   : > { %11171 = vrcp.f32 %v1889_v10 }
 0x804   : > { %v1896_v12 = vpop.permute.xlu0 %1895 }
 0x805   : > { %10610 = vmatpush3.msra.mxu1 %v1896_v12 }
 0x806   : > { %10619 = vmatprep.subr.bf16.mxu1 %v11761_v0 }
 0x807   : > { %v11170_v13 = vpop.eup %11169 }
 0x808   : > { %v1892_v14 = vmul.f32 %v11170_v13, %v11166_v6  ;;  %v2247_v13 = vld [vmem:[%s12498_s10 + $0x100] sm:$0xff] }
 0x80a   : > { %10612 = vmatmul.mubr.msk.f32.vlgmr.msra.gmra.mrb[4].mxu1 %vm1060_vm2, %v1892_v14  ;;  %v2255_v14 = vld [vmem:[%s12498_s10 + $0x140] sm:$0xff] }
 0x80b   : > { %v11172_v15 = vpop.eup %11171  ;;  %10635 = vmatprep.mubr.msk.bf16.mxu1 %vm11762_vm0, %v11761_v0  ;;  %10620 = vmatpush3.bf16.msra.mxu1 %v10853_v16  ;;  %v2256_v16 = vld [vmem:[%s12498_s10 + $0x148] sm:$0xff] }
 0x80c   : > { %v1893_v63 = vmul.f32 %v11172_v15, %v11168_v8  ;;  %10621 = vmatprep.subr.bf16.mxu1 %v11761_v0  ;;  %v2248_v15 = vld [vmem:[%s12498_s10 + $0x108] sm:$0xff] }
 0x80e   : > { %10617 = vmatmul.mubr.msk.f32.vlgmr.msra.gmra.mrb[20].mxu0 %vm1060_vm2, %v1893_v63  ;;  %v9143_v63 = vcombine.high %v2247_v13, %v2255_v14 }
 0x80f   : > { %3099 = vmatprep.mubr.bf16.mxu0 %v11763_v30  ;;  %10622 = vmatpush3.bf16.msra.mxu1 %v10854_v17  ;;  %v9142_v17 = vcombine.low %v2247_v13, %v2255_v14 }
 0x810   : > { %10623 = vmatprep.subr.bf16.mxu1 %v11761_v0  ;;  %3068 = vmatpush1.bf16.msra.mxu0 %v9110_v56  ;;  %v9207_v56 = vcombine.high %v2311_v53, %v2319_v54  ;;  %v2273_v53 = vld [vmem:[%s12498_s10 + $0x1d0] sm:$0xff]  ;;  %v2266_v54 = vld [vmem:[%s12498_s10 + $0x198] sm:$0xff] }
 0x811   : > { %3069 = vmatprep.subr.bf16.mxu0 %v9127_v2  ;;  %v2328_v2 = vld [vmem:[%s12498_s10 + $0x388] sm:$0xff] }
 0x813   : > { %10624 = vmatpush3.bf16.msra.mxu1 %v10855_v18  ;;  %v9144_v18 = vcombine.low %v2248_v15, %v2256_v16 }
 0x814   : > { %10625 = vmatprep.subr.bf16.mxu1 %v11761_v0  ;;  %3070 = vmatpush1.bf16.msra.mxu0 %v9126_v36 }
 0x815   : > { %3071 = vmatprep.subr.bf16.mxu0 %v9143_v63 }
 0x817   : > { %10626 = vmatpush3.bf16.msra.mxu1 %v10856_v19  ;;  %v9145_v19 = vcombine.high %v2248_v15, %v2256_v16 }
 0x818   : > { %10627 = vmatprep.subr.bf16.mxu1 %v11761_v0  ;;  %3072 = vmatpush1.bf16.msra.mxu0 %v9142_v17 }
 0x81b   : > { %10628 = vmatpush3.bf16.msra.mxu1 %v10857_v20  ;;  %v2263_v20 = vld [vmem:[%s12498_s10 + $0x180] sm:$0xff] }
 0x81c   : > { %10629 = vmatprep.subr.bf16.mxu1 %v11761_v0 }
 0x81f   : > { %10630 = vmatpush3.bf16.msra.mxu1 %v10858_v21  ;;  %v2271_v21 = vld [vmem:[%s12498_s10 + $0x1c0] sm:$0xff] }
 0x820   : > { %10631 = vmatprep.subr.bf16.mxu1 %v11761_v0 }
 0x823   : > { %10632 = vmatpush3.bf16.msra.mxu1 %v10859_v22  ;;  %v2264_v22 = vld [vmem:[%s12498_s10 + $0x188] sm:$0xff] }
 0x824   : > { %10633 = vmatprep.subr.bf16.mxu1 %v11761_v0 }
 0x827   : > { %10634 = vmatpush3.bf16.msra.mxu1 %v10860_v23  ;;  %v9159_v23 = vcombine.high %v2263_v20, %v2271_v21 }
 0x828   : > { %3110 = vmatprep.subr.bf16.mxu1 %v9113_v1  ;;  %v2335_v1 = vld [vmem:[%s12498_s10 + $0x3c0] sm:$0xff] }
 0x829   : > { %3073 = vmatprep.subr.bf16.mxu0 %v9159_v23 }
 0x8dd   : > { %v1967_v24 = vpop.f32.mrb[4].mxu1 }
 0x8de   : > { %v10613_v25 = vpop.f32.mrb[5].mxu1 }
 0x8df   : > { %v9158_v25 = vcombine.low %v2263_v20, %v2271_v21 }
 0x8e1   : > { %v2044_v26 = vpop.f32.mrb[20].mxu0  ;;  %3074 = vmatpush1.bf16.msra.mxu0 %v9158_v25 }
 0x8e2   : > { %v10811_v27 = vpack.i.bf16 %v2044_v26, %v1967_v24  ;;  %v10618_v28 = vpop.f32.mrb[21].mxu0  ;;  %v2272_v24 = vld [vmem:[%s12498_s10 + $0x1c8] sm:$0xff] }
 0x8e3   : > { %v9160_v26 = vcombine.low %v2264_v22, %v2272_v24  ;;  %v2279_v28 = vld [vmem:[%s12498_s10 + $0x200] sm:$0xff] }
 0x8e4   : > { %10812 = vrot.lane.b32.xlu1 %v10811_v27, %s11764_s2  ;;  %v9161_v27 = vcombine.high %v2264_v22, %v2272_v24  ;;  %v9108_v22 = vld [vmem:[%s869_s24] ss:$0 sm:$0xff] }
 0x956   : > { %v10813_v29 = vpop.permute.xlu1 %10812 }
 0x957   : > { %v10815_v31 = vunpack.i.h.bf16 %v10813_v29  ;;  %v10814_v32 = vunpack.i.l.bf16 %v10813_v29  ;;  %v2287_v29 = vld [vmem:[%s12498_s10 + $0x240] sm:$0xff] }
 0x959   : > { %v2057_v34 = vsel %vm1383_vm3, %v12653_v46, %v10815_v31  ;;  %v2056_v35 = vsel %vm1383_vm3, %v12651_v41, %v10814_v32  ;;  %v2280_v31 = vld [vmem:[%s12498_s10 + $0x208] sm:$0xff]  ;;  %v9175_v32 = vcombine.high %v2279_v28, %v2287_v29 }
 0x95a   : > { %v2058_v37 = vpack.c.bf16 %v2057_v34, %v2056_v35  ;;  %v2288_v34 = vld [vmem:[%s12498_s10 + $0x248] sm:$0xff]  ;;  %v9174_v35 = vcombine.low %v2279_v28, %v2287_v29  ;;  %v2233_v28 = vld [vmem:[%s12498_s10 + $0x90] sm:$0xff] }
 0x95b   : > { %3075 = vmatprep.subr.bf16.mxu0 %v9175_v32  ;;  %v2241_v29 = vld [vmem:[%s12498_s10 + $0xd0] sm:$0xff]  ;;  %v2242_v32 = vld [vmem:[%s12498_s10 + $0xd8] sm:$0xff] }
 0x95c   : > { %10636 = vmatmul.mubr.bf16.vlgmr.msra.gmra.mrb[8].mxu1 %v2058_v37  ;;  %v9176_v37 = vcombine.low %v2280_v31, %v2288_v34  ;;  %3076 = vmatpush1.bf16.msra.mxu0 %v9174_v35 }
 0x95d   : > { %3142 = vmatprep.mubr.bf16.mxu1 %v11763_v30  ;;  %3111 = vmatpush1.bf16.msra.mxu1 %v9112_v62  ;;  %v2327_v62 = vld [vmem:[%s12498_s10 + $0x380] sm:$0xff] }
 0xa2f   : > { %v2164_v44 = vpop.f32.mrb[8].mxu1 }
 0xa30   : > { %v2165_v48 = vadd.f32 %v9099_v40, %v2164_v44  ;;  %v10637_v49 = vpop.f32.mrb[9].mxu1  ;;  %v2295_v44 = vld [vmem:[%s12498_s10 + $0x280] sm:$0xff] }
 0xa31   : > { %v2167_v50 = vpop.f32.mrb[10].mxu1  ;;  %v2296_v49 = vld [vmem:[%s12498_s10 + $0x288] sm:$0xff] }
 0xa32   : > { %v2168_v46 = vadd.f32 %v9099_v40, %v2167_v50  ;;  %v10638_v51 = vpop.f32.mrb[11].mxu1  ;;  %v2171_v41 = vadd.f32 %v2165_v48, %v1109_v38  ;;  %v9129_v38 = vcombine.high %v2232_v33, %v2240_v3  ;;  %v9177_v40 = vcombine.high %v2280_v31, %v2288_v34  ;;  %v2303_v48 = vld [vmem:[%s12498_s10 + $0x2c0] sm:$0xff]  ;;  %v2234_v31 = vld [vmem:[%s12498_s10 + $0x98] sm:$0xff] }
 0xa33   : > { %v9191_v50 = vcombine.high %v2295_v44, %v2303_v48  ;;  %v9190_v51 = vcombine.low %v2295_v44, %v2303_v48  ;;  %v2257_v44 = vld [vmem:[%s12498_s10 + $0x150] sm:$0xff]  ;;  %v2250_v48 = vld [vmem:[%s12498_s10 + $0x118] sm:$0xff] }
 0xa34   : > { %2175 = vadd.xlane.f32.xlu1 %v2171_v41  ;;  %v2172_v52 = vadd.f32 %v2168_v46, %v1110_v39  ;;  %v9128_v39 = vcombine.low %v2232_v33, %v2240_v3  ;;  %3112 = vmatprep.subr.bf16.mxu1 %v9129_v38  ;;  %v2304_v46 = vld [vmem:[%s12498_s10 + $0x2c8] sm:$0xff]  ;;  %v9223_v33 = vcombine.high %v2327_v62, %v2335_v1 }
 0xa35   : > { %3077 = vmatprep.subr.bf16.mxu0 %v9191_v50  ;;  %v2336_v3 = vld [vmem:[%s12498_s10 + $0x3c8] sm:$0xff]  ;;  %v9222_v38 = vcombine.low %v2327_v62, %v2335_v1  ;;  %v9130_v50 = vcombine.low %v2233_v28, %v2241_v29  ;;  %v2289_v62 = vld [vmem:[%s12498_s10 + $0x250] sm:$0xff]  ;;  %v2282_v1 = vld [vmem:[%s12498_s10 + $0x218] sm:$0xff] }
 0xa36   : > { %2177 = vadd.xlane.f32.xlu0 %v2172_v52  ;;  %3113 = vmatpush1.bf16.msra.mxu1 %v9128_v39  ;;  %v9224_v36 = vcombine.low %v2328_v2, %v2336_v3  ;;  %v9225_v39 = vcombine.high %v2328_v2, %v2336_v3  ;;  %v2290_v2 = vld [vmem:[%s12498_s10 + $0x258] sm:$0xff]  ;;  %v9164_v3 = vcombine.low %v2266_v54, %v2274_v55 }
 0xa37   : > { %3114 = vmatprep.subr.bf16.mxu1 %v9145_v19  ;;  %3078 = vmatpush1.bf16.msra.mxu0 %v9190_v51 }
 0xa38   : > { %3079 = vmatprep.subr.bf16.mxu0 %v9207_v56 }
 0xa3a   : > { %3115 = vmatpush1.bf16.msra.mxu1 %v9144_v18 }
 0xa3b   : > { %3116 = vmatprep.subr.bf16.mxu1 %v9161_v27  ;;  %3080 = vmatpush1.bf16.msra.mxu0 %v9206_v59 }
 0xa3c   : > { %3081 = vmatprep.subr.bf16.mxu0 %v9223_v33 }
 0xa3e   : > { %3117 = vmatpush1.bf16.msra.mxu1 %v9160_v26  ;;  %v9109_v26 = vld [vmem:[%s878_s6] ss:$0 sm:$0xff] }
 0xa3f   : > { %3118 = vmatprep.subr.bf16.mxu1 %v9177_v40  ;;  %3082 = vmatpush1.bf16.msra.mxu0 %v9222_v38  ;;  %v9133_v40 = vcombine.high %v2234_v31, %v2242_v32 }
 0xa42   : > { %3119 = vmatpush1.bf16.msra.mxu1 %v9176_v37  ;;  %v9131_v37 = vcombine.high %v2233_v28, %v2241_v29  ;;  %v2219_v29 = vld [vmem:[%s12498_s10 + $0x20] sm:$0xff] }
 0xac1   : > { %v2176_v5 = vpop.xlane.xlu1 %2175 }
 0xac2   : > { %v2180_v6 = vmul.f32 0.0078125, %v2176_v5  ;;  %v2217_v5 = vld [vmem:[%s12498_s10 + $0x10] sm:$0xff] }
 0xac3   : > { %v2178_v7 = vpop.xlane.xlu0 %2177 }
 0xac4   : > { %v12708_v8 = vsub.f32 %v2171_v41, %v2180_v6  ;;  %v2181_v9 = vmul.f32 0.0078125, %v2178_v7  ;;  %v9192_v41 = vcombine.low %v2296_v49, %v2304_v46  ;;  %v2225_v6 = vld [vmem:[%s12498_s10 + $0x50] sm:$0xff]  ;;  %v2218_v7 = vld [vmem:[%s12498_s10 + $0x18] sm:$0xff] }
 0xac6   : > { %v12710_v58 = vsub.f32 %v2172_v52, %v2181_v9  ;;  %v2184_v10 = vmul.f32 %v12708_v8, %v12708_v8  ;;  %v9193_v52 = vcombine.high %v2296_v49, %v2304_v46  ;;  %v9114_v9 = vcombine.low %v2217_v5, %v2225_v6  ;;  %v2258_v49 = vld [vmem:[%s12498_s10 + $0x158] sm:$0xff] }
 0xac7   : > { %v9132_v46 = vcombine.low %v2234_v31, %v2242_v32  ;;  %v9148_v57 = vcombine.low %v2250_v48, %v2258_v49  ;;  %v2227_v31 = vld [vmem:[%s12498_s10 + $0x60] sm:$0xff]  ;;  %v2220_v32 = vld [vmem:[%s12498_s10 + $0x28] sm:$0xff] }
 0xac8   : > { %2186 = vadd.xlane.f32.xlu0 %v2184_v10  ;;  %v2185_v12 = vmul.f32 %v12710_v58, %v12710_v58  ;;  %3120 = vmatprep.subr.bf16.mxu1 %v9193_v52  ;;  %v9115_v10 = vcombine.high %v2217_v5, %v2225_v6  ;;  %v2265_v52 = vld [vmem:[%s12498_s10 + $0x190] sm:$0xff]  ;;  %v2298_v6 = vld [vmem:[%s12498_s10 + $0x298] sm:$0xff] }
 0xac9   : > { %3121 = vmatpush1.bf16.msra.mxu1 %v9192_v41  ;;  %v9149_v41 = vcombine.high %v2250_v48, %v2258_v49  ;;  %v9163_v59 = vcombine.high %v2265_v52, %v2273_v53  ;;  %v9162_v33 = vcombine.low %v2265_v52, %v2273_v53  ;;  %v2305_v5 = vld [vmem:[%s12498_s10 + $0x2d0] sm:$0xff]  ;;  %v2235_v49 = vld [vmem:[%s12498_s10 + $0xa0] sm:$0xff] }
 0xaca   : > { %3122 = vmatprep.subr.bf16.mxu1 %v9209_v61  ;;  %3153 = vmatprep.subr.bf16.mxu0 %v9115_v10  ;;  %v2281_v61 = vld [vmem:[%s12498_s10 + $0x210] sm:$0xff]  ;;  %v9180_v10 = vcombine.low %v2282_v1, %v2290_v2 }
 0xacb   : > { %v9179_v38 = vcombine.high %v2281_v61, %v2289_v62 }
 0xacc   : > { %2188 = vadd.xlane.f32.xlu0 %v2185_v12  ;;  %v2226_v12 = vld [vmem:[%s12498_s10 + $0x58] sm:$0xff] }
 0xacd   : > { %3123 = vmatpush1.bf16.msra.mxu1 %v9208_v60  ;;  %v9116_v13 = vcombine.low %v2218_v7, %v2226_v12  ;;  %v9117_v14 = vcombine.high %v2218_v7, %v2226_v12  ;;  %v9165_v60 = vcombine.high %v2266_v54, %v2274_v55  ;;  %v2306_v7 = vld [vmem:[%s12498_s10 + $0x2d8] sm:$0xff]  ;;  %v2251_v55 = vld [vmem:[%s12498_s10 + $0x120] sm:$0xff] }
 0xace   : > { %3124 = vmatprep.subr.bf16.mxu1 %v9225_v39  ;;  %v2297_v39 = vld [vmem:[%s12498_s10 + $0x290] sm:$0xff] }
 0xacf   : > { %v9195_v12 = vcombine.high %v2297_v39, %v2305_v5 }
 0xad1   : > { %3125 = vmatpush1.bf16.msra.mxu1 %v9224_v36  ;;  %v9181_v36 = vcombine.high %v2282_v1, %v2290_v2  ;;  %v2267_v2 = vld [vmem:[%s12498_s10 + $0x1a0] sm:$0xff] }
 0xad2   : > { %3196 = vmatprep.subr.bf16.mxu1 %v9117_v14  ;;  %v2313_v14 = vld [vmem:[%s12498_s10 + $0x310] sm:$0xff] }
 0xb55   : > { %v2187_v15 = vpop.xlane.xlu0 %2186 }
 0xb56   : > { %v2190_v63 = vmul.f32 0.0078125, %v2187_v15  ;;  %v2321_v15 = vld [vmem:[%s12498_s10 + $0x350] sm:$0xff] }
 0xb58   : > { %v2192_v16 = vadd.f32 1e-05, %v2190_v63  ;;  %v2314_v63 = vld [vmem:[%s12498_s10 + $0x318] sm:$0xff] }
 0xb59   : > { %v2189_v17 = vpop.xlane.xlu0 %2188 }
 0xb5a   : > { %11173 = vrsqrt.f32 %v2192_v16  ;;  %v2191_v18 = vmul.f32 0.0078125, %v2189_v17  ;;  %v2322_v16 = vld [vmem:[%s12498_s10 + $0x358] sm:$0xff]  ;;  %v9194_v17 = vcombine.low %v2297_v39, %v2305_v5 }
 0xb5c   : > { %v2193_v19 = vadd.f32 1e-05, %v2191_v18  ;;  %v9196_v18 = vcombine.low %v2298_v6, %v2306_v7 }
 0xb5e   : > { %11175 = vrsqrt.f32 %v2193_v19  ;;  %v9211_v19 = vcombine.high %v2313_v14, %v2321_v15 }
 0xb64   : > { %v11174_v20 = vpop.eup %11173 }
 0xb65   : > { %v2196_v21 = vmul.f32 %v11174_v20, %v12708_v8  ;;  %v9213_v20 = vcombine.high %v2314_v63, %v2322_v16 }
 0xb67   : > { %v2204_v24 = vmul.f32 %v9108_v22, %v2196_v21  ;;  %v2329_v21 = vld [vmem:[%s12498_s10 + $0x390] sm:$0xff] }
 0xb68   : > { %v11176_v23 = vpop.eup %11175 }
 0xb69   : > { %v2197_v25 = vmul.f32 %v11176_v23, %v12710_v58  ;;  %v12754_v34 = vadd.f32 %v9109_v26, %v2204_v24  ;;  %v2249_v58 = vld [vmem:[%s12498_s10 + $0x110] sm:$0xff]  ;;  %v2330_v23 = vld [vmem:[%s12498_s10 + $0x398] sm:$0xff] }
 0xb6a   : > { %v9147_v51 = vcombine.high %v2249_v58, %v2257_v44  ;;  %v9146_v56 = vcombine.low %v2249_v58, %v2257_v44  ;;  %v2338_v24 = vld [vmem:[%s12498_s10 + $0x3d8] sm:$0xff]  ;;  %v9119_v44 = vcombine.high %v2219_v29, %v2227_v31 }
 0xb6b   : > { %v2205_v27 = vmul.f32 %v9108_v22, %v2197_v25  ;;  %v2337_v22 = vld [vmem:[%s12498_s10 + $0x3d0] sm:$0xff]  ;;  %v9210_v25 = vcombine.low %v2313_v14, %v2321_v15  ;;  %v9229_v28 = vcombine.high %v2330_v23, %v2338_v24  ;;  %v9228_v58 = vcombine.low %v2330_v23, %v2338_v24  ;;  %v2315_v24 = vld [vmem:[%s12498_s10 + $0x320] sm:$0xff] }
 0xb6d   : > { %v12756_v8 = vadd.f32 %v9109_v26, %v2205_v27  ;;  %v9212_v26 = vcombine.low %v2314_v63, %v2322_v16  ;;  %v9227_v27 = vcombine.high %v2329_v21, %v2337_v22  ;;  %v2299_v16 = vld [vmem:[%s12498_s10 + $0x2a0] sm:$0xff] }
 0xb6f   : > { %v12760_v35 = vpack.c.bf16 %v12756_v8, %v12754_v34 }
 0xb71   : > { %3100 = vmatmul.mubr.bf16.vlgmr.msra.gmra.mrb[24].mxu0 %v12760_v35  ;;  %3143 = vmatmul.mubr.bf16.vlgmr.msra.gmra.mrb[12].mxu1 %v12760_v35 }
 0xb72   : > { %3154 = vmatpush1.bf16.msra.mxu0 %v9114_v9  ;;  %3197 = vmatpush1.bf16.msra.mxu1 %v9116_v13  ;;  %v9178_v9 = vcombine.low %v2281_v61, %v2289_v62  ;;  %v9197_v13 = vcombine.high %v2298_v6, %v2306_v7  ;;  %v2283_v7 = vld [vmem:[%s12498_s10 + $0x220] sm:$0xff] }
 0xb73   : > { %3155 = vmatprep.subr.bf16.mxu0 %v9131_v37  ;;  %3198 = vmatprep.subr.bf16.mxu1 %v9133_v40  ;;  %v2228_v37 = vld [vmem:[%s12498_s10 + $0x68] sm:$0xff]  ;;  %v9226_v40 = vcombine.low %v2329_v21, %v2337_v22 }
 0xb74   : > { %3185 = vmatprep.mubr.bf16.mxu0 %v11763_v30  ;;  %3228 = vmatprep.mubr.bf16.mxu1 %v11763_v30  ;;  %v9121_v48 = vcombine.high %v2220_v32, %v2228_v37  ;;  %v9120_v52 = vcombine.low %v2220_v32, %v2228_v37  ;;  %v2331_v37 = vld [vmem:[%s12498_s10 + $0x3a0] sm:$0xff] }
 0xb76   : > { %3156 = vmatpush1.bf16.msra.mxu0 %v9130_v50  ;;  %3199 = vmatpush1.bf16.msra.mxu1 %v9132_v46  ;;  %v2243_v50 = vld [vmem:[%s12498_s10 + $0xe0] sm:$0xff]  ;;  %v2236_v46 = vld [vmem:[%s12498_s10 + $0xa8] sm:$0xff] }
 0xb77   : > { %3157 = vmatprep.subr.bf16.mxu0 %v9147_v51  ;;  %3200 = vmatprep.subr.bf16.mxu1 %v9149_v41  ;;  %v2244_v51 = vld [vmem:[%s12498_s10 + $0xe8] sm:$0xff]  ;;  %v9118_v41 = vcombine.low %v2219_v29, %v2227_v31  ;;  %v9135_v53 = vcombine.high %v2235_v49, %v2243_v50 }
 0xb78   : > { %v9137_v54 = vcombine.high %v2236_v46, %v2244_v51  ;;  %v9136_v61 = vcombine.low %v2236_v46, %v2244_v51  ;;  %v2221_v51 = vld [vmem:[%s12498_s10 + $0x30] sm:$0xff] }
 0xb7a   : > { %3158 = vmatpush1.bf16.msra.mxu0 %v9146_v56  ;;  %3201 = vmatpush1.bf16.msra.mxu1 %v9148_v57  ;;  %v2259_v56 = vld [vmem:[%s12498_s10 + $0x160] sm:$0xff]  ;;  %v2252_v57 = vld [vmem:[%s12498_s10 + $0x128] sm:$0xff] }
 0xb7b   : > { %3159 = vmatprep.subr.bf16.mxu0 %v9163_v59  ;;  %3202 = vmatprep.subr.bf16.mxu1 %v9165_v60  ;;  %v2260_v59 = vld [vmem:[%s12498_s10 + $0x168] sm:$0xff]  ;;  %v9134_v60 = vcombine.low %v2235_v49, %v2243_v50  ;;  %v9151_v62 = vcombine.high %v2251_v55, %v2259_v56 }
 0xb7c   : > { %v9153_v1 = vcombine.high %v2252_v57, %v2260_v59  ;;  %v9152_v39 = vcombine.low %v2252_v57, %v2260_v59  ;;  %v2237_v59 = vld [vmem:[%s12498_s10 + $0xb0] sm:$0xff] }
 0xb7e   : > { %3160 = vmatpush1.bf16.msra.mxu0 %v9162_v33  ;;  %3203 = vmatpush1.bf16.msra.mxu1 %v9164_v3  ;;  %v2275_v33 = vld [vmem:[%s12498_s10 + $0x1e0] sm:$0xff]  ;;  %v2268_v3 = vld [vmem:[%s12498_s10 + $0x1a8] sm:$0xff] }
 0xb7f   : > { %3161 = vmatprep.subr.bf16.mxu0 %v9179_v38  ;;  %3204 = vmatprep.subr.bf16.mxu1 %v9181_v36  ;;  %v2276_v38 = vld [vmem:[%s12498_s10 + $0x1e8] sm:$0xff]  ;;  %v9150_v36 = vcombine.low %v2251_v55, %v2259_v56  ;;  %v9167_v5 = vcombine.high %v2267_v2, %v2275_v33 }
 0xb80   : > { %v9169_v6 = vcombine.high %v2268_v3, %v2276_v38  ;;  %v9168_v14 = vcombine.low %v2268_v3, %v2276_v38  ;;  %v2253_v38 = vld [vmem:[%s12498_s10 + $0x130] sm:$0xff] }
 0xb82   : > { %3162 = vmatpush1.bf16.msra.mxu0 %v9178_v9  ;;  %3205 = vmatpush1.bf16.msra.mxu1 %v9180_v10  ;;  %v2291_v9 = vld [vmem:[%s12498_s10 + $0x260] sm:$0xff]  ;;  %v2284_v10 = vld [vmem:[%s12498_s10 + $0x228] sm:$0xff] }
 0xb83   : > { %3163 = vmatprep.subr.bf16.mxu0 %v9195_v12  ;;  %3206 = vmatprep.subr.bf16.mxu1 %v9197_v13  ;;  %v2292_v12 = vld [vmem:[%s12498_s10 + $0x268] sm:$0xff]  ;;  %v9166_v13 = vcombine.low %v2267_v2, %v2275_v33  ;;  %v9183_v15 = vcombine.high %v2283_v7, %v2291_v9 }
 0xb84   : > { %v9185_v63 = vcombine.high %v2284_v10, %v2292_v12  ;;  %v9184_v21 = vcombine.low %v2284_v10, %v2292_v12  ;;  %v2269_v12 = vld [vmem:[%s12498_s10 + $0x1b0] sm:$0xff] }
 0xb86   : > { %3164 = vmatpush1.bf16.msra.mxu0 %v9194_v17  ;;  %3207 = vmatpush1.bf16.msra.mxu1 %v9196_v18  ;;  %v2307_v17 = vld [vmem:[%s12498_s10 + $0x2e0] sm:$0xff]  ;;  %v2300_v18 = vld [vmem:[%s12498_s10 + $0x2a8] sm:$0xff] }
 0xb87   : > { %3165 = vmatprep.subr.bf16.mxu0 %v9211_v19  ;;  %3208 = vmatprep.subr.bf16.mxu1 %v9213_v20  ;;  %v2308_v19 = vld [vmem:[%s12498_s10 + $0x2e8] sm:$0xff]  ;;  %v9182_v20 = vcombine.low %v2283_v7, %v2291_v9  ;;  %v9199_v22 = vcombine.high %v2299_v16, %v2307_v17 }
 0xb88   : > { %v9201_v23 = vcombine.high %v2300_v18, %v2308_v19  ;;  %v9200_v29 = vcombine.low %v2300_v18, %v2308_v19  ;;  %v2285_v19 = vld [vmem:[%s12498_s10 + $0x230] sm:$0xff] }
 0xb8a   : > { %3166 = vmatpush1.bf16.msra.mxu0 %v9210_v25  ;;  %3209 = vmatpush1.bf16.msra.mxu1 %v9212_v26  ;;  %v2323_v25 = vld [vmem:[%s12498_s10 + $0x360] sm:$0xff]  ;;  %v2316_v26 = vld [vmem:[%s12498_s10 + $0x328] sm:$0xff] }
 0xb8b   : > { %3167 = vmatprep.subr.bf16.mxu0 %v9227_v27  ;;  %3210 = vmatprep.subr.bf16.mxu1 %v9229_v28  ;;  %v2324_v27 = vld [vmem:[%s12498_s10 + $0x368] sm:$0xff]  ;;  %v9198_v28 = vcombine.low %v2299_v16, %v2307_v17  ;;  %v9215_v31 = vcombine.high %v2315_v24, %v2323_v25 }
 0xb8c   : > { %v9217_v32 = vcombine.high %v2316_v26, %v2324_v27  ;;  %v9216_v49 = vcombine.low %v2316_v26, %v2324_v27  ;;  %v2301_v27 = vld [vmem:[%s12498_s10 + $0x2b0] sm:$0xff] }
 0xb8e   : > { %3168 = vmatpush1.bf16.msra.mxu0 %v9226_v40  ;;  %3211 = vmatpush1.bf16.msra.mxu1 %v9228_v58  ;;  %v2339_v40 = vld [vmem:[%s12498_s10 + $0x3e0] sm:$0xff]  ;;  %v2332_v58 = vld [vmem:[%s12498_s10 + $0x3a8] sm:$0xff] }
 0xb8f   : > { %3239 = vmatprep.subr.bf16.mxu0 %v9119_v44  ;;  %3282 = vmatprep.subr.bf16.mxu1 %v9121_v48  ;;  %v2340_v44 = vld [vmem:[%s12498_s10 + $0x3e8] sm:$0xff]  ;;  %v9214_v48 = vcombine.low %v2315_v24, %v2323_v25  ;;  %v9231_v50 = vcombine.high %v2331_v37, %v2339_v40 }
 0xb90   : > { %v9233_v46 = vcombine.high %v2332_v58, %v2340_v44  ;;  %v9232_v55 = vcombine.low %v2332_v58, %v2340_v44  ;;  %v2317_v44 = vld [vmem:[%s12498_s10 + $0x330] sm:$0xff] }
 0xb91   : > { %3186 = vmatmul.mubr.bf16.vlgmr.msra.gmra.mrb[28].mxu0 %v12760_v35  ;;  %3229 = vmatmul.mubr.bf16.vlgmr.msra.gmra.mrb[16].mxu1 %v12760_v35 }
 0xb92   : > { %3240 = vmatpush1.bf16.msra.mxu0 %v9118_v41  ;;  %3283 = vmatpush1.bf16.msra.mxu1 %v9120_v52  ;;  %v2229_v41 = vld [vmem:[%s12498_s10 + $0x70] sm:$0xff]  ;;  %v2222_v52 = vld [vmem:[%s12498_s10 + $0x38] sm:$0xff] }
 0xb93   : > { %3241 = vmatprep.subr.bf16.mxu0 %v9135_v53  ;;  %3284 = vmatprep.subr.bf16.mxu1 %v9137_v54  ;;  %v2230_v53 = vld [vmem:[%s12498_s10 + $0x78] sm:$0xff]  ;;  %v9230_v54 = vcombine.low %v2331_v37, %v2339_v40  ;;  %v9123_v56 = vcombine.high %v2221_v51, %v2229_v41 }
 0xb94   : > { %3271 = vmatprep.mubr.bf16.mxu0 %v11763_v30  ;;  %3314 = vmatprep.mubr.bf16.mxu1 %v11763_v30  ;;  %v9125_v57 = vcombine.high %v2222_v52, %v2230_v53  ;;  %v9124_v2 = vcombine.low %v2222_v52, %v2230_v53  ;;  %v2333_v53 = vld [vmem:[%s12498_s10 + $0x3b0] sm:$0xff] }
 0xb96   : > { %3242 = vmatpush1.bf16.msra.mxu0 %v9134_v60  ;;  %3285 = vmatpush1.bf16.msra.mxu1 %v9136_v61  ;;  %v2245_v60 = vld [vmem:[%s12498_s10 + $0xf0] sm:$0xff]  ;;  %v2238_v61 = vld [vmem:[%s12498_s10 + $0xb8] sm:$0xff] }
 0xb97   : > { %3243 = vmatprep.subr.bf16.mxu0 %v9151_v62  ;;  %3286 = vmatprep.subr.bf16.mxu1 %v9153_v1  ;;  %v2246_v62 = vld [vmem:[%s12498_s10 + $0xf8] sm:$0xff]  ;;  %v9122_v1 = vcombine.low %v2221_v51, %v2229_v41  ;;  %v9139_v33 = vcombine.high %v2237_v59, %v2245_v60 }
 0xb98   : > { %v9141_v3 = vcombine.high %v2238_v61, %v2246_v62  ;;  %v9140_v7 = vcombine.low %v2238_v61, %v2246_v62 }
 0xb9a   : > { %3244 = vmatpush1.bf16.msra.mxu0 %v9150_v36  ;;  %3287 = vmatpush1.bf16.msra.mxu1 %v9152_v39  ;;  %v2261_v36 = vld [vmem:[%s12498_s10 + $0x170] sm:$0xff]  ;;  %v2254_v39 = vld [vmem:[%s12498_s10 + $0x138] sm:$0xff] }
 0xb9b   : > { %3245 = vmatprep.subr.bf16.mxu0 %v9167_v5  ;;  %3288 = vmatprep.subr.bf16.mxu1 %v9169_v6  ;;  %v2262_v5 = vld [vmem:[%s12498_s10 + $0x178] sm:$0xff]  ;;  %v9138_v6 = vcombine.low %v2237_v59, %v2245_v60  ;;  %v9155_v9 = vcombine.high %v2253_v38, %v2261_v36 }
 0xb9c   : > { %v9157_v10 = vcombine.high %v2254_v39, %v2262_v5  ;;  %v9156_v16 = vcombine.low %v2254_v39, %v2262_v5  ;;  %v10866_v39 = vld [vmem:[%s12508_s14 + $0xc8] sm:$0xff]  }
 0xb9d   : > { %v10867_v5 = vld [vmem:[%s12508_s14 + $0x8] sm:$0xff]  }
 0xb9e   : > { %3246 = vmatpush1.bf16.msra.mxu0 %v9166_v13  ;;  %3289 = vmatpush1.bf16.msra.mxu1 %v9168_v14  ;;  %v2277_v13 = vld [vmem:[%s12498_s10 + $0x1f0] sm:$0xff]  ;;  %v2270_v14 = vld [vmem:[%s12498_s10 + $0x1b8] sm:$0xff] }
 0xb9f   : > { %3247 = vmatprep.subr.bf16.mxu0 %v9183_v15  ;;  %3290 = vmatprep.subr.bf16.mxu1 %v9185_v63  ;;  %v2278_v15 = vld [vmem:[%s12498_s10 + $0x1f8] sm:$0xff]  ;;  %v9154_v63 = vcombine.low %v2253_v38, %v2261_v36  ;;  %v9171_v17 = vcombine.high %v2269_v12, %v2277_v13  ;;  %v10864_v38 = vld [vmem:[%s12508_s14 + $0x80] sm:$0xff]   ;;  %v10865_v36 = vld [vmem:[%s12508_s14 + $0x48] sm:$0xff]  }
 0xba0   : > { %v9173_v18 = vcombine.high %v2270_v14, %v2278_v15  ;;  %v9172_v24 = vcombine.low %v2270_v14, %v2278_v15  ;;  %v10875_v14 = vld [vmem:[%s12508_s14 + $0x18] sm:$0xff]  }
 0xba1   : > { %v10876_v15 = vld [vmem:[%s12508_s14 + $0x98] sm:$0xff]  }
 0xba2   : > { %3248 = vmatpush1.bf16.msra.mxu0 %v9182_v20  ;;  %3291 = vmatpush1.bf16.msra.mxu1 %v9184_v21  ;;  %v2293_v20 = vld [vmem:[%s12498_s10 + $0x270] sm:$0xff]  ;;  %v2286_v21 = vld [vmem:[%s12498_s10 + $0x238] sm:$0xff] }
 0xba3   : > { %3249 = vmatprep.subr.bf16.mxu0 %v9199_v22  ;;  %3292 = vmatprep.subr.bf16.mxu1 %v9201_v23  ;;  %v2294_v22 = vld [vmem:[%s12498_s10 + $0x278] sm:$0xff]  ;;  %v9170_v23 = vcombine.low %v2269_v12, %v2277_v13  ;;  %v9187_v25 = vcombine.high %v2285_v19, %v2293_v20  ;;  %v10872_v12 = vld [vmem:[%s12508_s14 + $0x90] sm:$0xff]  }
 0xba4   : > { %v9189_v26 = vcombine.high %v2286_v21, %v2294_v22  ;;  %v9188_v37 = vcombine.low %v2286_v21, %v2294_v22  ;;  %v10874_v13 = vld [vmem:[%s12508_s14 + $0xd8] sm:$0xff]   ;;  %v10883_v21 = vld [vmem:[%s12508_s14 + $0x28] sm:$0xff]  }
 0xba5   : > { %v10884_v22 = vld [vmem:[%s12508_s14 + $0xa8] sm:$0xff]  }
 0xba6   : > { %3250 = vmatpush1.bf16.msra.mxu0 %v9198_v28  ;;  %3293 = vmatpush1.bf16.msra.mxu1 %v9200_v29  ;;  %v2309_v28 = vld [vmem:[%s12498_s10 + $0x2f0] sm:$0xff]  ;;  %v2302_v29 = vld [vmem:[%s12498_s10 + $0x2b8] sm:$0xff] }
 0xba7   : > { %3251 = vmatprep.subr.bf16.mxu0 %v9215_v31  ;;  %3294 = vmatprep.subr.bf16.mxu1 %v9217_v32  ;;  %v2310_v31 = vld [vmem:[%s12498_s10 + $0x2f8] sm:$0xff]  ;;  %v9186_v32 = vcombine.low %v2285_v19, %v2293_v20  ;;  %v9203_v40 = vcombine.high %v2301_v27, %v2309_v28  ;;  %v10881_v19 = vld [vmem:[%s12508_s14 + $0x68] sm:$0xff]  }
 0xba8   : > { %v9205_v58 = vcombine.high %v2302_v29, %v2310_v31  ;;  %v9204_v51 = vcombine.low %v2302_v29, %v2310_v31  ;;  %v10882_v20 = vld [vmem:[%s12508_s14 + $0xe8] sm:$0xff]   ;;  %v10891_v29 = vld [vmem:[%s12508_s14 + $0x38] sm:$0xff]  }
 0xba9   : > { %v10892_v31 = vld [vmem:[%s12508_s14 + $0xb8] sm:$0xff]  }
 0xbaa   : > { %3252 = vmatpush1.bf16.msra.mxu0 %v9214_v48  ;;  %3295 = vmatpush1.bf16.msra.mxu1 %v9216_v49  ;;  %v2325_v48 = vld [vmem:[%s12498_s10 + $0x370] sm:$0xff]  ;;  %v2318_v49 = vld [vmem:[%s12498_s10 + $0x338] sm:$0xff] }
 0xbab   : > { %3253 = vmatprep.subr.bf16.mxu0 %v9231_v50  ;;  %3296 = vmatprep.subr.bf16.mxu1 %v9233_v46  ;;  %v2326_v50 = vld [vmem:[%s12498_s10 + $0x378] sm:$0xff]  ;;  %v9202_v46 = vcombine.low %v2301_v27, %v2309_v28  ;;  %v9219_v41 = vcombine.high %v2317_v44, %v2325_v48 }
 0xbac   : > { %v9221_v52 = vcombine.high %v2318_v49, %v2326_v50  ;;  %v9220_v59 = vcombine.low %v2318_v49, %v2326_v50  ;;  %v10889_v27 = vld [vmem:[%s12508_s14 + $0x78] sm:$0xff]  }
 0xbad   : > { %v10890_v28 = vld [vmem:[%s12508_s14 + $0xf8] sm:$0xff]  }
 0xbae   : > { %3254 = vmatpush1.bf16.msra.mxu0 %v9230_v54  ;;  %3297 = vmatpush1.bf16.msra.mxu1 %v9232_v55  ;;  %v2341_v54 = vld [vmem:[%s12498_s10 + $0x3f0] sm:$0xff]  ;;  %v2334_v55 = vld [vmem:[%s12498_s10 + $0x3b8] sm:$0xff] }
 0xbaf   : > { %3325 = vmatprep.subr.bf16.mxu0 %v9123_v56  ;;  %3368 = vmatprep.subr.bf16.mxu1 %v9125_v57  ;;  %v2342_v56 = vld [vmem:[%s12498_s10 + $0x3f8] sm:$0xff]  ;;  %v9218_v57 = vcombine.low %v2317_v44, %v2325_v48  ;;  %v9235_v60 = vcombine.high %v2333_v53, %v2341_v54  ;;  %v9234_v62 = vcombine.low %v2333_v53, %v2341_v54 }
 0xbb0   : > { %v9237_v61 = vcombine.high %v2334_v55, %v2342_v56 }
 0xbb1   : > { %3272 = vmatmul.mubr.bf16.vlgmr.msra.gmra.mrb[32].mxu0 %v12760_v35  ;;  %3315 = vmatmul.mubr.bf16.vlgmr.msra.gmra.mrb[20].mxu1 %v12760_v35 }
 0xbb2   : > { %3326 = vmatpush1.bf16.msra.mxu0 %v9122_v1  ;;  %3369 = vmatpush1.bf16.msra.mxu1 %v9124_v2  ;;  %v9236_v1 = vcombine.low %v2334_v55, %v2342_v56  ;;  %v10861_v2 = vld [vmem:[%s12508_s14 + $0x40] sm:$0xff]  }
 0xbb3   : > { %3327 = vmatprep.subr.bf16.mxu0 %v9139_v33  ;;  %3370 = vmatprep.subr.bf16.mxu1 %v9141_v3  ;;  %v10862_v33 = vld [vmem:[%s12508_s14 + $0xc0] sm:$0xff]  }
 0xbb4   : > { %3357 = vmatprep.mubr.bf16.mxu0 %v11763_v30  ;;  %3400 = vmatprep.mubr.bf16.mxu1 %v11763_v30  ;;  %v10863_v3 = vld [vmem:[%s12508_s14] sm:$0xff]  }
 0xbb6   : > { %3328 = vmatpush1.bf16.msra.mxu0 %v9138_v6  ;;  %3371 = vmatpush1.bf16.msra.mxu1 %v9140_v7  ;;  %v10868_v6 = vld [vmem:[%s12508_s14 + $0x88] sm:$0xff]   ;;  %v10869_v7 = vld [vmem:[%s12508_s14 + $0x50] sm:$0xff]  }
 0xbb7   : > { %3329 = vmatprep.subr.bf16.mxu0 %v9155_v9  ;;  %3372 = vmatprep.subr.bf16.mxu1 %v9157_v10  ;;  %v10870_v9 = vld [vmem:[%s12508_s14 + $0xd0] sm:$0xff]  }
 0xbb8   : > { %v10871_v10 = vld [vmem:[%s12508_s14 + $0x10] sm:$0xff]  }
 0xbba   : > { %3330 = vmatpush1.bf16.msra.mxu0 %v9154_v63  ;;  %3373 = vmatpush1.bf16.msra.mxu1 %v9156_v16  ;;  %v10877_v63 = vld [vmem:[%s12508_s14 + $0x60] sm:$0xff]  }
 0xbbb   : > { %3331 = vmatprep.subr.bf16.mxu0 %v9171_v17  ;;  %3374 = vmatprep.subr.bf16.mxu1 %v9173_v18  ;;  %v10878_v16 = vld [vmem:[%s12508_s14 + $0xe0] sm:$0xff]  }
 0xbbc   : > { %v10879_v17 = vld [vmem:[%s12508_s14 + $0x20] sm:$0xff]  }
 0xbbd   : > { %v10880_v18 = vld [vmem:[%s12508_s14 + $0xa0] sm:$0xff]  }
 0xbbe   : > { %3332 = vmatpush1.bf16.msra.mxu0 %v9170_v23  ;;  %3375 = vmatpush1.bf16.msra.mxu1 %v9172_v24  ;;  %v10885_v23 = vld [vmem:[%s12508_s14 + $0x70] sm:$0xff]  }
 0xbbf   : > { %3333 = vmatprep.subr.bf16.mxu0 %v9187_v25  ;;  %3376 = vmatprep.subr.bf16.mxu1 %v9189_v26  ;;  %v10886_v24 = vld [vmem:[%s12508_s14 + $0xf0] sm:$0xff]  }
 0xbc0   : > { %v10887_v25 = vld [vmem:[%s12508_s14 + $0x30] sm:$0xff]  }
 0xbc1   : > { %v10888_v26 = vld [vmem:[%s12508_s14 + $0xb0] sm:$0xff]  }
 0xbc2   : > { %3334 = vmatpush1.bf16.msra.mxu0 %v9186_v32  ;;  %3377 = vmatpush1.bf16.msra.mxu1 %v9188_v37  ;;  %v10893_v32 = vld [vmem:[%s12508_s14 + $0x140] sm:$0xff]  }
 0xbc3   : > { %3335 = vmatprep.subr.bf16.mxu0 %v9203_v40  ;;  %3378 = vmatprep.subr.bf16.mxu1 %v9205_v58  ;;  %v10894_v37 = vld [vmem:[%s12508_s14 + $0x1c0] sm:$0xff]   ;;  %v12902_v58 = vsub.s32 3, %v12581_v42 }
 0xbc4   : > { %v12899_v40 = vld [vmem:[%s12505_s8] sm:$0xff] }
 0xbc5   : > { %v2350_v44 = vrot.slane %v12899_v40, %v12584_v43  ;;  %v2358_v48 = vrot.slane %v12899_v40, %v12592_v47  ;;  %v2354_v49 = vrot.slane %v12899_v40, %v12588_v45  ;;  %v2362_v50 = vrot.slane %v12899_v40, %v12902_v58 }
 0xbc6   : > { %3336 = vmatpush1.bf16.msra.mxu0 %v9202_v46  ;;  %3379 = vmatpush1.bf16.msra.mxu1 %v9204_v51 }
 0xbc7   : > { %3337 = vmatprep.subr.bf16.mxu0 %v9219_v41  ;;  %3380 = vmatprep.subr.bf16.mxu1 %v9221_v52 }
 0xbca   : > { %3338 = vmatpush1.bf16.msra.mxu0 %v9218_v57  ;;  %3381 = vmatpush1.bf16.msra.mxu1 %v9220_v59 }
 0xbcb   : > { %3339 = vmatprep.subr.bf16.mxu0 %v9235_v60  ;;  %3382 = vmatprep.subr.bf16.mxu1 %v9237_v61 }
 0xbce   : > { %3340 = vmatpush1.bf16.msra.mxu0 %v9234_v62  ;;  %3383 = vmatpush1.bf16.msra.mxu1 %v9236_v1 }
 0xbcf   : > { %10167 = vmatprep.subr.bf16.mxu0 %v10861_v2  ;;  %10189 = vmatprep.subr.bf16.mxu1 %v10862_v33 }
 0xbd1   : > { %3358 = vmatmul.mubr.bf16.vlgmr.msra.gmra.mrb[36].mxu0 %v12760_v35  ;;  %3401 = vmatmul.mubr.bf16.vlgmr.msra.gmra.mrb[24].mxu1 %v12760_v35  ;;  %v10873_v35 = vld [vmem:[%s12508_s14 + $0x58] sm:$0xff]  }
 0xbd2   : > { %10168 = vmatpush3.bf16.msra.mxu0 %v10863_v3  ;;  %10190 = vmatpush3.bf16.msra.mxu1 %v10864_v38 }
 0xbd3   : > { %10169 = vmatprep.subr.bf16.mxu0 %v10865_v36  ;;  %10191 = vmatprep.subr.bf16.mxu1 %v10866_v39 }
 0xbd6   : > { %10170 = vmatpush3.bf16.msra.mxu0 %v10867_v5  ;;  %10192 = vmatpush3.bf16.msra.mxu1 %v10868_v6 }
 0xbd7   : > { %10171 = vmatprep.subr.bf16.mxu0 %v10869_v7  ;;  %10193 = vmatprep.subr.bf16.mxu1 %v10870_v9 }
 0xbda   : > { %10172 = vmatpush3.bf16.msra.mxu0 %v10871_v10  ;;  %10194 = vmatpush3.bf16.msra.mxu1 %v10872_v12 }
 0xbdb   : > { %10173 = vmatprep.subr.bf16.mxu0 %v10873_v35  ;;  %10195 = vmatprep.subr.bf16.mxu1 %v10874_v13 }
 0xbde   : > { %10174 = vmatpush3.bf16.msra.mxu0 %v10875_v14  ;;  %10196 = vmatpush3.bf16.msra.mxu1 %v10876_v15  ;;  %v10895_v14 = vld [vmem:[%s12508_s14 + $0x100] sm:$0xff]  }
 0xbdf   : > { %10175 = vmatprep.subr.bf16.mxu0 %v10877_v63  ;;  %10197 = vmatprep.subr.bf16.mxu1 %v10878_v16  ;;  %v10896_v15 = vld [vmem:[%s12508_s14 + $0x180] sm:$0xff]   ;;  %v10897_v63 = vld [vmem:[%s12508_s14 + $0x148] sm:$0xff]  }
 0xbe0   : > { %v10898_v16 = vld [vmem:[%s12508_s14 + $0x1c8] sm:$0xff]  }
 0xbe2   : > { %10176 = vmatpush3.bf16.msra.mxu0 %v10879_v17  ;;  %10198 = vmatpush3.bf16.msra.mxu1 %v10880_v18  ;;  %v10899_v17 = vld [vmem:[%s12508_s14 + $0x108] sm:$0xff]  }
 0xbe3   : > { %10177 = vmatprep.subr.bf16.mxu0 %v10881_v19  ;;  %10199 = vmatprep.subr.bf16.mxu1 %v10882_v20  ;;  %v10900_v18 = vld [vmem:[%s12508_s14 + $0x188] sm:$0xff]   ;;  %v10901_v19 = vld [vmem:[%s12508_s14 + $0x150] sm:$0xff]  }
 0xbe4   : > { %v10902_v20 = vld [vmem:[%s12508_s14 + $0x1d0] sm:$0xff]  }
 0xbe6   : > { %10178 = vmatpush3.bf16.msra.mxu0 %v10883_v21  ;;  %10200 = vmatpush3.bf16.msra.mxu1 %v10884_v22  ;;  %v10903_v21 = vld [vmem:[%s12508_s14 + $0x110] sm:$0xff]  }
 0xbe7   : > { %10179 = vmatprep.subr.bf16.mxu0 %v10885_v23  ;;  %10201 = vmatprep.subr.bf16.mxu1 %v10886_v24  ;;  %v10904_v22 = vld [vmem:[%s12508_s14 + $0x190] sm:$0xff]   ;;  %v10905_v23 = vld [vmem:[%s12508_s14 + $0x158] sm:$0xff]  }
 0xbe8   : > { %v10906_v24 = vld [vmem:[%s12508_s14 + $0x1d8] sm:$0xff]  }
 0xbea   : > { %10180 = vmatpush3.bf16.msra.mxu0 %v10887_v25  ;;  %10202 = vmatpush3.bf16.msra.mxu1 %v10888_v26  ;;  %v10907_v25 = vld [vmem:[%s12508_s14 + $0x118] sm:$0xff]  }
 0xbeb   : > { %10181 = vmatprep.subr.bf16.mxu0 %v10889_v27  ;;  %10203 = vmatprep.subr.bf16.mxu1 %v10890_v28  ;;  %v10908_v26 = vld [vmem:[%s12508_s14 + $0x198] sm:$0xff]   ;;  %v10909_v27 = vld [vmem:[%s12508_s14 + $0x160] sm:$0xff]  }
 0xbec   : > { %v10910_v28 = vld [vmem:[%s12508_s14 + $0x1e0] sm:$0xff]  }
 0xbee   : > { %10182 = vmatpush3.bf16.msra.mxu0 %v10891_v29  ;;  %10204 = vmatpush3.bf16.msra.mxu1 %v10892_v31  ;;  %v10911_v29 = vld [vmem:[%s12508_s14 + $0x120] sm:$0xff]  }
 0xbef   : > { %10211 = vmatprep.subr.bf16.mxu0 %v10893_v32  ;;  %10233 = vmatprep.subr.bf16.mxu1 %v10894_v37  ;;  %v10912_v31 = vld [vmem:[%s12508_s14 + $0x1a0] sm:$0xff]   ;;  %v10913_v32 = vld [vmem:[%s12508_s14 + $0x168] sm:$0xff]  }
 0xbf0   : > { %v10914_v37 = vld [vmem:[%s12508_s14 + $0x1e8] sm:$0xff]  }
 0xc44   : > { %v3101_v46 = vpop.f32.mrb[24].mxu0  ;;  %v3144_v51 = vpop.f32.mrb[12].mxu1 }
 0xc45   : > { %v3102_v41 = vadd.f32 %v3101_v46, %v2350_v44  ;;  %v3145_v52 = vadd.f32 %v3144_v51, %v2358_v48  ;;  %v3103_v53 = vpop.f32.mrb[25].mxu0  ;;  %v3146_v54 = vpop.f32.mrb[13].mxu1  ;;  %v10915_v46 = vld [vmem:[%s12508_s14 + $0x128] sm:$0xff]  }
 0xc46   : > { %v3104_v55 = vadd.f32 %v3103_v53, %v2354_v49  ;;  %v3147_v56 = vadd.f32 %v3146_v54, %v2362_v50  ;;  %v3105_v57 = vpop.f32.mrb[26].mxu0  ;;  %v3148_v59 = vpop.f32.mrb[14].mxu1  ;;  %v10916_v51 = vld [vmem:[%s12508_s14 + $0x1a8] sm:$0xff]   ;;  %v10917_v53 = vld [vmem:[%s12508_s14 + $0x170] sm:$0xff]  }
 0xc47   : > { %v3106_v60 = vadd.f32 %v3105_v57, %v2350_v44  ;;  %v3149_v61 = vadd.f32 %v3148_v59, %v2358_v48  ;;  %v3107_v62 = vpop.f32.mrb[27].mxu0  ;;  %v3150_v1 = vpop.f32.mrb[15].mxu1  ;;  %v3411_v3 = vmax.f32 %v3102_v41, 0.0  ;;  %v3413_v38 = vmax.f32 %v3145_v52, 0.0  ;;  %v10918_v54 = vld [vmem:[%s12508_s14 + $0x1f0] sm:$0xff]  }
 0xc48   : > { %v3108_v2 = vadd.f32 %v3107_v62, %v2354_v49  ;;  %v3151_v33 = vadd.f32 %v3150_v1, %v2362_v50  ;;  %v3412_v5 = vmax.f32 %v3104_v55, 0.0  ;;  %v3414_v6 = vmax.f32 %v3147_v56, 0.0  ;;  %v10919_v59 = vld [vmem:[%s12508_s14 + $0x130] sm:$0xff]  }
 0xc49   : > { %v3427_v36 = vmax.f32 %v3106_v60, 0.0  ;;  %v3429_v39 = vmax.f32 %v3149_v61, 0.0  ;;  %v12933_v44 = vsub.s32 4, %v12581_v42  ;;  %v12936_v48 = vsub.s32 6, %v12581_v42  ;;  %v10920_v60 = vld [vmem:[%s12508_s14 + $0x1b0] sm:$0xff]  }
 0xc4a   : > { %v3428_v7 = vmax.f32 %v3108_v2, 0.0  ;;  %v3430_v9 = vmax.f32 %v3151_v33, 0.0  ;;  %v12939_v49 = vsub.s32 5, %v12581_v42  ;;  %v12942_v50 = vsub.s32 7, %v12581_v42  ;;  %v10921_v33 = vld [vmem:[%s12508_s14 + $0x178] sm:$0xff]  }
 0xc4b   : > { %v3443_v10 = vpack.c.bf16 %v3427_v36, %v3411_v3  ;;  %v3445_v12 = vpack.c.bf16 %v3429_v39, %v3413_v38  ;;  %v2366_v41 = vrot.slane %v12899_v40, %v12933_v44  ;;  %v2374_v52 = vrot.slane %v12899_v40, %v12936_v48  ;;  %v10922_v3 = vld [vmem:[%s12508_s14 + $0x1f8] sm:$0xff]  }
 0xc4c   : > { %v3444_v35 = vpack.c.bf16 %v3428_v7, %v3412_v5  ;;  %v3446_v13 = vpack.c.bf16 %v3430_v9, %v3414_v6  ;;  %v2370_v42 = vrot.slane %v12899_v40, %v12939_v49  ;;  %v2378_v55 = vrot.slane %v12899_v40, %v12942_v50 }
 0xc4e   : > { %4522 = vmatprep.mubr.bf16.mxu0 %v3444_v35  ;;  %4563 = vmatprep.mubr.bf16.mxu1 %v3446_v13  ;;  %v10923_v35 = vld [vmem:[%s12508_s14 + $0x138] sm:$0xff]  }
 0xc4f   : > { %4523 = vmatmul.mubr.bf16.vlgmr.msra.gmra.mrb[40].mxu0 %v3443_v10  ;;  %4564 = vmatmul.mubr.bf16.vlgmr.msra.gmra.mrb[28].mxu1 %v3445_v12  ;;  %v10924_v13 = vld [vmem:[%s12508_s14 + $0x1b8] sm:$0xff]  }
 0xc50   : > { %10212 = vmatpush3.bf16.msra.mxu0 %v10895_v14  ;;  %10234 = vmatpush3.bf16.msra.mxu1 %v10896_v15 }
 0xc51   : > { %10213 = vmatprep.subr.bf16.mxu0 %v10897_v63  ;;  %10235 = vmatprep.subr.bf16.mxu1 %v10898_v16 }
 0xc54   : > { %10214 = vmatpush3.bf16.msra.mxu0 %v10899_v17  ;;  %10236 = vmatpush3.bf16.msra.mxu1 %v10900_v18  ;;  %v10925_v17 = vld [vmem:[%s12508_s14 + $0x240] sm:$0xff]  }
 0xc55   : > { %10215 = vmatprep.subr.bf16.mxu0 %v10901_v19  ;;  %10237 = vmatprep.subr.bf16.mxu1 %v10902_v20  ;;  %v10926_v18 = vld [vmem:[%s12508_s14 + $0x2c0] sm:$0xff]  }
 0xc58   : > { %10216 = vmatpush3.bf16.msra.mxu0 %v10903_v21  ;;  %10238 = vmatpush3.bf16.msra.mxu1 %v10904_v22 }
 0xc59   : > { %10217 = vmatprep.subr.bf16.mxu0 %v10905_v23  ;;  %10239 = vmatprep.subr.bf16.mxu1 %v10906_v24 }
 0xc5c   : > { %10218 = vmatpush3.bf16.msra.mxu0 %v10907_v25  ;;  %10240 = vmatpush3.bf16.msra.mxu1 %v10908_v26 }
 0xc5d   : > { %10219 = vmatprep.subr.bf16.mxu0 %v10909_v27  ;;  %10241 = vmatprep.subr.bf16.mxu1 %v10910_v28  ;;  %v10927_v27 = vld [vmem:[%s12508_s14 + $0x200] sm:$0xff]  }
 0xc5e   : > { %v10928_v28 = vld [vmem:[%s12508_s14 + $0x280] sm:$0xff]  }
 0xc60   : > { %10220 = vmatpush3.bf16.msra.mxu0 %v10911_v29  ;;  %10242 = vmatpush3.bf16.msra.mxu1 %v10912_v31  ;;  %v10929_v29 = vld [vmem:[%s12508_s14 + $0x248] sm:$0xff]  }
 0xc61   : > { %10221 = vmatprep.subr.bf16.mxu0 %v10913_v32  ;;  %10243 = vmatprep.subr.bf16.mxu1 %v10914_v37  ;;  %v10930_v31 = vld [vmem:[%s12508_s14 + $0x2c8] sm:$0xff]  }
 0xc62   : > { %v10931_v32 = vld [vmem:[%s12508_s14 + $0x208] sm:$0xff]  }
 0xc63   : > { %v10932_v37 = vld [vmem:[%s12508_s14 + $0x288] sm:$0xff]  }
 0xc64   : > { %v3187_v56 = vpop.f32.mrb[28].mxu0  ;;  %v3230_v57 = vpop.f32.mrb[16].mxu1  ;;  %10222 = vmatpush3.bf16.msra.mxu0 %v10915_v46  ;;  %10244 = vmatpush3.bf16.msra.mxu1 %v10916_v51  ;;  %v10933_v46 = vld [vmem:[%s12508_s14 + $0x250] sm:$0xff]  }
 0xc65   : > { %v3188_v61 = vadd.f32 %v3187_v56, %v2366_v41  ;;  %v3231_v62 = vadd.f32 %v3230_v57, %v2374_v52  ;;  %v3189_v1 = vpop.f32.mrb[29].mxu0  ;;  %v3232_v2 = vpop.f32.mrb[17].mxu1  ;;  %10223 = vmatprep.subr.bf16.mxu0 %v10917_v53  ;;  %10245 = vmatprep.subr.bf16.mxu1 %v10918_v54  ;;  %v10934_v51 = vld [vmem:[%s12508_s14 + $0x2d0] sm:$0xff]   ;;  %v10937_v53 = vld [vmem:[%s12508_s14 + $0x258] sm:$0xff]   ;;  %v10941_v56 = vld [vmem:[%s12508_s14 + $0x260] sm:$0xff]  }
 0xc66   : > { %v3190_v38 = vadd.f32 %v3189_v1, %v2370_v42  ;;  %v3233_v36 = vadd.f32 %v3232_v2, %v2378_v55  ;;  %v3191_v39 = vpop.f32.mrb[30].mxu0  ;;  %v3234_v40 = vpop.f32.mrb[18].mxu1  ;;  %v10938_v54 = vld [vmem:[%s12508_s14 + $0x2d8] sm:$0xff]   ;;  %v10942_v57 = vld [vmem:[%s12508_s14 + $0x2e0] sm:$0xff]   ;;  %v12985_v1 = vld [vmem:[%s12505_s8 + $0x8] sm:$0xff] }
 0xc67   : > { %v3192_v5 = vadd.f32 %v3191_v39, %v2366_v41  ;;  %v3235_v6 = vadd.f32 %v3234_v40, %v2374_v52  ;;  %v3193_v7 = vpop.f32.mrb[31].mxu0  ;;  %v3236_v9 = vpop.f32.mrb[19].mxu1  ;;  %v3415_v14 = vmax.f32 %v3188_v61, 0.0  ;;  %v3417_v15 = vmax.f32 %v3231_v62, 0.0  ;;  %v10935_v41 = vld [vmem:[%s12508_s14 + $0x210] sm:$0xff]   ;;  %v10945_v61 = vld [vmem:[%s12508_s14 + $0x268] sm:$0xff]  }
 0xc68   : > { %v3194_v10 = vadd.f32 %v3193_v7, %v2370_v42  ;;  %v3237_v12 = vadd.f32 %v3236_v9, %v2378_v55  ;;  %10224 = vmatpush3.bf16.msra.mxu0 %v10919_v59  ;;  %10246 = vmatpush3.bf16.msra.mxu1 %v10920_v60  ;;  %v3416_v19 = vmax.f32 %v3190_v38, 0.0  ;;  %v3418_v20 = vmax.f32 %v3233_v36, 0.0  ;;  %v10936_v52 = vld [vmem:[%s12508_s14 + $0x290] sm:$0xff]   ;;  %v10939_v42 = vld [vmem:[%s12508_s14 + $0x218] sm:$0xff]   ;;  %v10943_v59 = vld [vmem:[%s12508_s14 + $0x220] sm:$0xff]  }
 0xc69   : > { %v3431_v63 = vmax.f32 %v3192_v5, 0.0  ;;  %v3433_v16 = vmax.f32 %v3235_v6, 0.0  ;;  %10225 = vmatprep.subr.bf16.mxu0 %v10921_v33  ;;  %10247 = vmatprep.subr.bf16.mxu1 %v10922_v3  ;;  %v10940_v55 = vld [vmem:[%s12508_s14 + $0x298] sm:$0xff]   ;;  %v10944_v60 = vld [vmem:[%s12508_s14 + $0x2a0] sm:$0xff]   ;;  %v10946_v62 = vld [vmem:[%s12508_s14 + $0x2e8] sm:$0xff]   ;;  %v2382_v3 = vrot.slane %v12985_v1, %v12584_v43  ;;  %v2390_v38 = vrot.slane %v12985_v1, %v12592_v47 }
 0xc6a   : > { %v3432_v21 = vmax.f32 %v3194_v10, 0.0  ;;  %v3434_v22 = vmax.f32 %v3237_v12, 0.0  ;;  %v10947_v2 = vld [vmem:[%s12508_s14 + $0x228] sm:$0xff]   ;;  %v10949_v36 = vld [vmem:[%s12508_s14 + $0x270] sm:$0xff]   ;;  %v2386_v40 = vrot.slane %v12985_v1, %v12588_v45  ;;  %v2394_v5 = vrot.slane %v12985_v1, %v12902_v58 }
 0xc6b   : > { %v3447_v23 = vpack.c.bf16 %v3431_v63, %v3415_v14  ;;  %v3449_v24 = vpack.c.bf16 %v3433_v16, %v3417_v15  ;;  %v10948_v33 = vld [vmem:[%s12508_s14 + $0x2a8] sm:$0xff]   ;;  %v10950_v39 = vld [vmem:[%s12508_s14 + $0x2f0] sm:$0xff]   ;;  %v10953_v15 = vld [vmem:[%s12508_s14 + $0x278] sm:$0xff]  }
 0xc6c   : > { %v3448_v25 = vpack.c.bf16 %v3432_v21, %v3416_v19  ;;  %v3450_v26 = vpack.c.bf16 %v3434_v22, %v3418_v20  ;;  %10226 = vmatpush3.bf16.msra.mxu0 %v10923_v35  ;;  %10248 = vmatpush3.bf16.msra.mxu1 %v10924_v13  ;;  %v10951_v9 = vld [vmem:[%s12508_s14 + $0x230] sm:$0xff]   ;;  %v10954_v63 = vld [vmem:[%s12508_s14 + $0x2f8] sm:$0xff]  }
 0xc6d   : > { %10255 = vmatprep.subr.bf16.mxu0 %v10925_v17  ;;  %10277 = vmatprep.subr.bf16.mxu1 %v10926_v18  ;;  %v10952_v10 = vld [vmem:[%s12508_s14 + $0x2b0] sm:$0xff]  }
 0xc6e   : > { %4604 = vmatprep.mubr.bf16.mxu0 %v3448_v25  ;;  %4645 = vmatprep.mubr.bf16.mxu1 %v3450_v26  ;;  %v10955_v26 = vld [vmem:[%s12508_s14 + $0x238] sm:$0xff]  }
 0xc6f   : > { %4605 = vmatmul.mubr.bf16.vlgmr.msra.gmra.mrb[44].mxu0 %v3447_v23  ;;  %4646 = vmatmul.mubr.bf16.vlgmr.msra.gmra.mrb[32].mxu1 %v3449_v24 }
 0xc70   : > { %10256 = vmatpush3.bf16.msra.mxu0 %v10927_v27  ;;  %10278 = vmatpush3.bf16.msra.mxu1 %v10928_v28  ;;  %v10956_v27 = vld [vmem:[%s12508_s14 + $0x2b8] sm:$0xff]  }
 0xc71   : > { %10257 = vmatprep.subr.bf16.mxu0 %v10929_v29  ;;  %10279 = vmatprep.subr.bf16.mxu1 %v10930_v31 }
 0xc74   : > { %10258 = vmatpush3.bf16.msra.mxu0 %v10931_v32  ;;  %10280 = vmatpush3.bf16.msra.mxu1 %v10932_v37  ;;  %v10957_v37 = vld [vmem:[%s12508_s14 + $0x340] sm:$0xff]  }
 0xc75   : > { %10259 = vmatprep.subr.bf16.mxu0 %v10933_v46  ;;  %10281 = vmatprep.subr.bf16.mxu1 %v10934_v51  ;;  %v10958_v46 = vld [vmem:[%s12508_s14 + $0x3c0] sm:$0xff]  }
 0xc78   : > { %10260 = vmatpush3.bf16.msra.mxu0 %v10935_v41  ;;  %10282 = vmatpush3.bf16.msra.mxu1 %v10936_v52 }
 0xc79   : > { %10261 = vmatprep.subr.bf16.mxu0 %v10937_v53  ;;  %10283 = vmatprep.subr.bf16.mxu1 %v10938_v54 }
 0xc7c   : > { %10262 = vmatpush3.bf16.msra.mxu0 %v10939_v42  ;;  %10284 = vmatpush3.bf16.msra.mxu1 %v10940_v55 }
 0xc7d   : > { %10263 = vmatprep.subr.bf16.mxu0 %v10941_v56  ;;  %10285 = vmatprep.subr.bf16.mxu1 %v10942_v57  ;;  %v10959_v57 = vld [vmem:[%s12508_s14 + $0x300] sm:$0xff]  }
 0xc80   : > { %10264 = vmatpush3.bf16.msra.mxu0 %v10943_v59  ;;  %10286 = vmatpush3.bf16.msra.mxu1 %v10944_v60  ;;  %v10960_v59 = vld [vmem:[%s12508_s14 + $0x380] sm:$0xff]   ;;  %v10961_v60 = vld [vmem:[%s12508_s14 + $0x348] sm:$0xff]  }
 0xc81   : > { %10265 = vmatprep.subr.bf16.mxu0 %v10945_v61  ;;  %10287 = vmatprep.subr.bf16.mxu1 %v10946_v62  ;;  %v10962_v61 = vld [vmem:[%s12508_s14 + $0x3c8] sm:$0xff]  }
 0xc82   : > { %v10963_v62 = vld [vmem:[%s12508_s14 + $0x308] sm:$0xff]  }
 0xc84   : > { %v3273_v6 = vpop.f32.mrb[32].mxu0  ;;  %v3316_v7 = vpop.f32.mrb[20].mxu1  ;;  %10266 = vmatpush3.bf16.msra.mxu0 %v10947_v2  ;;  %10288 = vmatpush3.bf16.msra.mxu1 %v10948_v33  ;;  %v10964_v2 = vld [vmem:[%s12508_s14 + $0x388] sm:$0xff]   ;;  %v10965_v33 = vld [vmem:[%s12508_s14 + $0x350] sm:$0xff]  }
 0xc85   : > { %v3274_v12 = vadd.f32 %v3273_v6, %v2382_v3  ;;  %v3317_v35 = vadd.f32 %v3316_v7, %v2390_v38  ;;  %v3275_v13 = vpop.f32.mrb[33].mxu0  ;;  %v3318_v14 = vpop.f32.mrb[21].mxu1  ;;  %10267 = vmatprep.subr.bf16.mxu0 %v10949_v36  ;;  %10289 = vmatprep.subr.bf16.mxu1 %v10950_v39  ;;  %v10968_v36 = vld [vmem:[%s12508_s14 + $0x390] sm:$0xff]   ;;  %v10969_v39 = vld [vmem:[%s12508_s14 + $0x358] sm:$0xff]   ;;  %v10973_v7 = vld [vmem:[%s12508_s14 + $0x360] sm:$0xff]  }
 0xc86   : > { %v3276_v16 = vadd.f32 %v3275_v13, %v2386_v40  ;;  %v3319_v17 = vadd.f32 %v3318_v14, %v2394_v5  ;;  %v3277_v18 = vpop.f32.mrb[34].mxu0  ;;  %v3320_v19 = vpop.f32.mrb[22].mxu1  ;;  %v10972_v6 = vld [vmem:[%s12508_s14 + $0x398] sm:$0xff]   ;;  %v10978_v13 = vld [vmem:[%s12508_s14 + $0x3e8] sm:$0xff]  }
 0xc87   : > { %v3278_v20 = vadd.f32 %v3277_v18, %v2382_v3  ;;  %v3321_v21 = vadd.f32 %v3320_v19, %v2390_v38  ;;  %v3279_v22 = vpop.f32.mrb[35].mxu0  ;;  %v3322_v23 = vpop.f32.mrb[23].mxu1  ;;  %v3419_v28 = vmax.f32 %v3274_v12, 0.0  ;;  %v3421_v29 = vmax.f32 %v3317_v35, 0.0  ;;  %v10966_v3 = vld [vmem:[%s12508_s14 + $0x3d0] sm:$0xff]   ;;  %v10976_v12 = vld [vmem:[%s12508_s14 + $0x3a0] sm:$0xff]  }
 0xc88   : > { %v3280_v24 = vadd.f32 %v3279_v22, %v2386_v40  ;;  %v3323_v25 = vadd.f32 %v3322_v23, %v2394_v5  ;;  %10268 = vmatpush3.bf16.msra.mxu0 %v10951_v9  ;;  %10290 = vmatpush3.bf16.msra.mxu1 %v10952_v10  ;;  %v3420_v51 = vmax.f32 %v3276_v16, 0.0  ;;  %v3422_v41 = vmax.f32 %v3319_v17, 0.0  ;;  %v10967_v38 = vld [vmem:[%s12508_s14 + $0x310] sm:$0xff]   ;;  %v10970_v40 = vld [vmem:[%s12508_s14 + $0x3d8] sm:$0xff]   ;;  %v10974_v9 = vld [vmem:[%s12508_s14 + $0x3e0] sm:$0xff]  }
 0xc89   : > { %v3435_v31 = vmax.f32 %v3278_v20, 0.0  ;;  %v3437_v32 = vmax.f32 %v3321_v21, 0.0  ;;  %10269 = vmatprep.subr.bf16.mxu0 %v10953_v15  ;;  %10291 = vmatprep.subr.bf16.mxu1 %v10954_v63  ;;  %v10971_v5 = vld [vmem:[%s12508_s14 + $0x318] sm:$0xff]   ;;  %v10975_v10 = vld [vmem:[%s12508_s14 + $0x320] sm:$0xff]   ;;  %v10977_v35 = vld [vmem:[%s12508_s14 + $0x368] sm:$0xff]   ;;  %v2398_v63 = vrot.slane %v12985_v1, %v12933_v44  ;;  %v2406_v16 = vrot.slane %v12985_v1, %v12936_v48 }
 0xc8a   : > { %v3436_v52 = vmax.f32 %v3280_v24, 0.0  ;;  %v3438_v53 = vmax.f32 %v3323_v25, 0.0  ;;  %v10979_v14 = vld [vmem:[%s12508_s14 + $0x328] sm:$0xff]   ;;  %v10981_v17 = vld [vmem:[%s12508_s14 + $0x370] sm:$0xff]   ;;  %v2402_v19 = vrot.slane %v12985_v1, %v12939_v49  ;;  %v2410_v20 = vrot.slane %v12985_v1, %v12942_v50 }
 0xc8b   : > { %v3451_v54 = vpack.c.bf16 %v3435_v31, %v3419_v28  ;;  %v3453_v42 = vpack.c.bf16 %v3437_v32, %v3421_v29  ;;  %v10980_v15 = vld [vmem:[%s12508_s14 + $0x3a8] sm:$0xff]   ;;  %v10982_v18 = vld [vmem:[%s12508_s14 + $0x3f0] sm:$0xff]   ;;  %v10985_v29 = vld [vmem:[%s12508_s14 + $0x378] sm:$0xff]  }
 0xc8c   : > { %v3452_v55 = vpack.c.bf16 %v3436_v52, %v3420_v51  ;;  %v3454_v56 = vpack.c.bf16 %v3438_v53, %v3422_v41  ;;  %10270 = vmatpush3.bf16.msra.mxu0 %v10955_v26  ;;  %10292 = vmatpush3.bf16.msra.mxu1 %v10956_v27  ;;  %v10983_v23 = vld [vmem:[%s12508_s14 + $0x330] sm:$0xff]   ;;  %v10986_v31 = vld [vmem:[%s12508_s14 + $0x3f8] sm:$0xff]  }
 0xc8d   : > { %10299 = vmatprep.subr.bf16.mxu0 %v10957_v37  ;;  %10321 = vmatprep.subr.bf16.mxu1 %v10958_v46  ;;  %v10984_v24 = vld [vmem:[%s12508_s14 + $0x3b0] sm:$0xff]  }
 0xc8e   : > { %4686 = vmatprep.mubr.bf16.mxu0 %v3452_v55  ;;  %4727 = vmatprep.mubr.bf16.mxu1 %v3454_v56  ;;  %v10987_v55 = vld [vmem:[%s12508_s14 + $0x338] sm:$0xff]  }
 0xc8f   : > { %4687 = vmatmul.mubr.bf16.vlgmr.msra.gmra.mrb[48].mxu0 %v3451_v54  ;;  %4728 = vmatmul.mubr.bf16.vlgmr.msra.gmra.mrb[36].mxu1 %v3453_v42  ;;  %v10988_v56 = vld [vmem:[%s12508_s14 + $0x3b8] sm:$0xff]  }
 0xc90   : > { %10300 = vmatpush3.bf16.msra.mxu0 %v10959_v57  ;;  %10322 = vmatpush3.bf16.msra.mxu1 %v10960_v59 }
 0xc91   : > { %10301 = vmatprep.subr.bf16.mxu0 %v10961_v60  ;;  %10323 = vmatprep.subr.bf16.mxu1 %v10962_v61 }
 0xc94   : > { %10302 = vmatpush3.bf16.msra.mxu0 %v10963_v62  ;;  %10324 = vmatpush3.bf16.msra.mxu1 %v10964_v2 }
 0xc95   : > { %10303 = vmatprep.subr.bf16.mxu0 %v10965_v33  ;;  %10325 = vmatprep.subr.bf16.mxu1 %v10966_v3 }
 0xc98   : > { %10304 = vmatpush3.bf16.msra.mxu0 %v10967_v38  ;;  %10326 = vmatpush3.bf16.msra.mxu1 %v10968_v36 }
 0xc99   : > { %10305 = vmatprep.subr.bf16.mxu0 %v10969_v39  ;;  %10327 = vmatprep.subr.bf16.mxu1 %v10970_v40 }
 0xc9c   : > { %10306 = vmatpush3.bf16.msra.mxu0 %v10971_v5  ;;  %10328 = vmatpush3.bf16.msra.mxu1 %v10972_v6 }
 0xc9d   : > { %10307 = vmatprep.subr.bf16.mxu0 %v10973_v7  ;;  %10329 = vmatprep.subr.bf16.mxu1 %v10974_v9  ;;  %v9238_v7 = vld [vmem:[%s914_s17] ss:$0 sm:$0xff] }
 0xca0   : > { %10308 = vmatpush3.bf16.msra.mxu0 %v10975_v10  ;;  %10330 = vmatpush3.bf16.msra.mxu1 %v10976_v12 }
 0xca1   : > { %10309 = vmatprep.subr.bf16.mxu0 %v10977_v35  ;;  %10331 = vmatprep.subr.bf16.mxu1 %v10978_v13 }
 0xca4   : > { %v3359_v21 = vpop.f32.mrb[36].mxu0  ;;  %v3402_v22 = vpop.f32.mrb[24].mxu1  ;;  %10310 = vmatpush3.bf16.msra.mxu0 %v10979_v14  ;;  %10332 = vmatpush3.bf16.msra.mxu1 %v10980_v15 }
 0xca5   : > { %v3360_v25 = vadd.f32 %v3359_v21, %v2398_v63  ;;  %v3403_v26 = vadd.f32 %v3402_v22, %v2406_v16  ;;  %v3361_v27 = vpop.f32.mrb[37].mxu0  ;;  %v3404_v28 = vpop.f32.mrb[25].mxu1  ;;  %10311 = vmatprep.subr.bf16.mxu0 %v10981_v17  ;;  %10333 = vmatprep.subr.bf16.mxu1 %v10982_v18 }
 0xca6   : > { %v3362_v32 = vadd.f32 %v3361_v27, %v2402_v19  ;;  %v3405_v37 = vadd.f32 %v3404_v28, %v2410_v20  ;;  %v3363_v46 = vpop.f32.mrb[38].mxu0  ;;  %v3406_v1 = vpop.f32.mrb[26].mxu1 }
 0xca7   : > { %v3364_v51 = vadd.f32 %v3363_v46, %v2398_v63  ;;  %v3407_v41 = vadd.f32 %v3406_v1, %v2406_v16  ;;  %v3365_v52 = vpop.f32.mrb[39].mxu0  ;;  %v3408_v53 = vpop.f32.mrb[27].mxu1  ;;  %v3423_v57 = vmax.f32 %v3360_v25, 0.0  ;;  %v3425_v59 = vmax.f32 %v3403_v26, 0.0 }
 0xca8   : > { %v3366_v54 = vadd.f32 %v3365_v52, %v2402_v19  ;;  %v3409_v42 = vadd.f32 %v3408_v53, %v2410_v20  ;;  %10312 = vmatpush3.bf16.msra.mxu0 %v10983_v23  ;;  %10334 = vmatpush3.bf16.msra.mxu1 %v10984_v24  ;;  %v3424_v62 = vmax.f32 %v3362_v32, 0.0  ;;  %v3426_v2 = vmax.f32 %v3405_v37, 0.0 }
 0xca9   : > { %v3439_v60 = vmax.f32 %v3364_v51, 0.0  ;;  %v3441_v61 = vmax.f32 %v3407_v41, 0.0  ;;  %10313 = vmatprep.subr.bf16.mxu0 %v10985_v29  ;;  %10335 = vmatprep.subr.bf16.mxu1 %v10986_v31 }
 0xcaa   : > { %v3440_v33 = vmax.f32 %v3366_v54, 0.0  ;;  %v3442_v3 = vmax.f32 %v3409_v42, 0.0 }
 0xcab   : > { %v3455_v38 = vpack.c.bf16 %v3439_v60, %v3423_v57  ;;  %v3457_v36 = vpack.c.bf16 %v3441_v61, %v3425_v59 }
 0xcac   : > { %v3456_v39 = vpack.c.bf16 %v3440_v33, %v3424_v62  ;;  %v3458_v40 = vpack.c.bf16 %v3442_v3, %v3426_v2  ;;  %10314 = vmatpush3.bf16.msra.mxu0 %v10987_v55  ;;  %10336 = vmatpush3.bf16.msra.mxu1 %v10988_v56 }
 0xcad   : > { %10639 = vmatprep.subr.bf16.mxu1 %v11761_v0 }
 0xcae   : > { %4768 = vmatprep.mubr.bf16.mxu0 %v3456_v39  ;;  %4809 = vmatprep.mubr.bf16.mxu1 %v3458_v40 }
 0xcaf   : > { %4769 = vmatmul.mubr.bf16.vlgmr.msra.gmra.mrb[52].mxu0 %v3455_v38  ;;  %4810 = vmatmul.mubr.bf16.vlgmr.msra.gmra.mrb[40].mxu1 %v3457_v36 }
 0xcb0   : > { %5072 = vmatprep.mubr.bf16.mxu0 %v11763_v30  ;;  %10655 = vmatprep.mubr.msk.bf16.mxu1 %vm11762_vm0, %v11761_v0 }
 0xd22   : > { %v10183_v5 = vpop.f32.mrb[40].mxu0  ;;  %v10205_v6 = vpop.f32.mrb[28].mxu1 }
 0xd23   : > { %v10184_v9 = vpop.f32.mrb[41].mxu0  ;;  %v10206_v10 = vpop.f32.mrb[29].mxu1 }
 0xd24   : > { %v10185_v12 = vadd.f32 %v10184_v9, %v10183_v5  ;;  %v10207_v35 = vadd.f32 %v10206_v10, %v10205_v6  ;;  %v10186_v13 = vpop.f32.mrb[42].mxu0  ;;  %v10208_v14 = vpop.f32.mrb[30].mxu1 }
 0xd25   : > { %v10187_v15 = vpop.f32.mrb[43].mxu0  ;;  %v10209_v63 = vpop.f32.mrb[31].mxu1 }
 0xd26   : > { %v4525_v16 = vadd.f32 %v10185_v12, %v9238_v7  ;;  %v10188_v17 = vadd.f32 %v10187_v15, %v10186_v13  ;;  %v10210_v18 = vadd.f32 %v10209_v63, %v10208_v14 }
 0xd28   : > { %v4566_v19 = vadd.f32 %v10207_v35, %v4525_v16  ;;  %v4528_v20 = vadd.f32 %v10188_v17, %v9238_v7 }
 0xd2a   : > { %v4569_v21 = vadd.f32 %v10210_v18, %v4528_v20 }
 0xd42   : > { %v10227_v22 = vpop.f32.mrb[44].mxu0  ;;  %v10249_v23 = vpop.f32.mrb[32].mxu1 }
 0xd43   : > { %v10228_v24 = vpop.f32.mrb[45].mxu0  ;;  %v10250_v25 = vpop.f32.mrb[33].mxu1 }
 0xd44   : > { %v10229_v26 = vadd.f32 %v10228_v24, %v10227_v22  ;;  %v10251_v27 = vadd.f32 %v10250_v25, %v10249_v23  ;;  %v10230_v28 = vpop.f32.mrb[46].mxu0  ;;  %v10252_v29 = vpop.f32.mrb[34].mxu1  ;;  %v10989_v22 = vld [vmem:[%s12468_s12 + $0xc0] ss:$12 sps:$4 sm:$0xff]   ;;  %v10991_v23 = vld [vmem:[%s12468_s12 + $0xc4] ss:$12 sps:$4 sm:$0xff]  }
 0xd45   : > { %v10231_v31 = vpop.f32.mrb[47].mxu0  ;;  %v10253_v32 = vpop.f32.mrb[35].mxu1  ;;  %v10992_v24 = vld [vmem:[%s12468_s12 + $0xc8] ss:$12 sps:$4 sm:$0xff]   ;;  %5040 = vmatprep.subr.bf16.mxu0 %v10991_v23 }
 0xd46   : > { %v4607_v37 = vadd.f32 %v10229_v26, %v4566_v19  ;;  %v10232_v46 = vadd.f32 %v10231_v31, %v10230_v28  ;;  %v10254_v1 = vadd.f32 %v10253_v32, %v10252_v29  ;;  %v10995_v25 = vld [vmem:[%s12468_s12 + $0xdc] ss:$12 sps:$4 sm:$0xff]   ;;  %10640 = vmatpush3.bf16.msra.mxu1 %v10992_v24  ;;  %v10996_v26 = vld [vmem:[%s12468_s12 + $0xe0] ss:$12 sps:$4 sm:$0xff]   ;;  %5041 = vmatpush1.bf16.msra.mxu0 %v10989_v22 }
 0xd47   : > { %10641 = vmatprep.subr.bf16.mxu1 %v11761_v0  ;;  %5042 = vmatprep.subr.bf16.mxu0 %v10995_v25 }
 0xd48   : > { %v4648_v51 = vadd.f32 %v10251_v27, %v4607_v37  ;;  %v4610_v41 = vadd.f32 %v10232_v46, %v4569_v21  ;;  %v10993_v27 = vld [vmem:[%s12468_s12 + $0xd8] ss:$12 sps:$4 sm:$0xff]  }
 0xd4a   : > { %v4651_v52 = vadd.f32 %v10254_v1, %v4610_v41  ;;  %10642 = vmatpush3.bf16.msra.mxu1 %v10996_v26  ;;  %5043 = vmatpush1.bf16.msra.mxu0 %v10993_v27  ;;  %v10999_v1 = vld [vmem:[%s12468_s12 + $0xf4] ss:$12 sps:$4 sm:$0xff]   ;;  %v11000_v41 = vld [vmem:[%s12468_s12 + $0xf8] ss:$12 sps:$4 sm:$0xff]  }
 0xd4b   : > { %10643 = vmatprep.subr.bf16.mxu1 %v11761_v0  ;;  %5044 = vmatprep.subr.bf16.mxu0 %v10999_v1 }
 0xd4e   : > { %10644 = vmatpush3.bf16.msra.mxu1 %v11000_v41 }
 0xd4f   : > { %10645 = vmatprep.subr.bf16.mxu1 %v11761_v0 }
 0xd62   : > { %v10271_v53 = vpop.f32.mrb[48].mxu0  ;;  %v10293_v54 = vpop.f32.mrb[36].mxu1 }
 0xd63   : > { %v10272_v42 = vpop.f32.mrb[49].mxu0  ;;  %v10294_v55 = vpop.f32.mrb[37].mxu1 }
 0xd64   : > { %v10273_v56 = vadd.f32 %v10272_v42, %v10271_v53  ;;  %v10295_v57 = vadd.f32 %v10294_v55, %v10293_v54  ;;  %v10274_v59 = vpop.f32.mrb[50].mxu0  ;;  %v10296_v60 = vpop.f32.mrb[38].mxu1  ;;  %v11001_v53 = vld [vmem:[%s12468_s12 + $0x108] ss:$12 sps:$4 sm:$0xff]   ;;  %v11004_v54 = vld [vmem:[%s12468_s12 + $0x110] ss:$12 sps:$4 sm:$0xff]  }
 0xd65   : > { %v10275_v61 = vpop.f32.mrb[51].mxu0  ;;  %v10297_v62 = vpop.f32.mrb[39].mxu1  ;;  %10646 = vmatpush3.bf16.msra.mxu1 %v11004_v54  ;;  %v11007_v42 = vld [vmem:[%s12468_s12 + $0x124] ss:$12 sps:$4 sm:$0xff]   ;;  %v11005_v55 = vld [vmem:[%s12468_s12 + $0x120] ss:$12 sps:$4 sm:$0xff]  }
 0xd66   : > { %v4689_v2 = vadd.f32 %v10273_v56, %v4648_v51  ;;  %v10276_v33 = vadd.f32 %v10275_v61, %v10274_v59  ;;  %v10298_v3 = vadd.f32 %v10297_v62, %v10296_v60  ;;  %v10997_v51 = vld [vmem:[%s12468_s12 + $0xf0] ss:$12 sps:$4 sm:$0xff]   ;;  %10647 = vmatprep.subr.bf16.mxu1 %v11761_v0  ;;  %v11008_v56 = vld [vmem:[%s12468_s12 + $0x128] ss:$12 sps:$4 sm:$0xff]   ;;  %v11009_v59 = vld [vmem:[%s12468_s12 + $0x138] ss:$12 sps:$4 sm:$0xff]  }
 0xd67   : > { %5045 = vmatpush1.bf16.msra.mxu0 %v10997_v51  ;;  %v11012_v60 = vld [vmem:[%s12468_s12 + $0x140] ss:$12 sps:$4 sm:$0xff]   ;;  %v11013_v62 = vld [vmem:[%s12468_s12 + $0x150] ss:$12 sps:$4 sm:$0xff]  }
 0xd68   : > { %v4730_v38 = vadd.f32 %v10295_v57, %v4689_v2  ;;  %v4692_v36 = vadd.f32 %v10276_v33, %v4651_v52  ;;  %v11003_v52 = vld [vmem:[%s12468_s12 + $0x10c] ss:$12 sps:$4 sm:$0xff]   ;;  %v11011_v57 = vld [vmem:[%s12468_s12 + $0x13c] ss:$12 sps:$4 sm:$0xff]   ;;  %v11015_v61 = vld [vmem:[%s12468_s12 + $0x154] ss:$12 sps:$4 sm:$0xff]  }
 0xd69   : > { %5046 = vmatprep.subr.bf16.mxu0 %v11003_v52  ;;  %10648 = vmatpush3.bf16.msra.mxu1 %v11008_v56  ;;  %v11016_v2 = vld [vmem:[%s12468_s12 + $0x158] ss:$12 sps:$4 sm:$0xff]  }
 0xd6a   : > { %v4733_v39 = vadd.f32 %v10298_v3, %v4692_v36  ;;  %10649 = vmatprep.subr.bf16.mxu1 %v11761_v0  ;;  %v11019_v33 = vld [vmem:[%s12468_s12 + $0x16c] ss:$12 sps:$4 sm:$0xff]   ;;  %v11017_v3 = vld [vmem:[%s12468_s12 + $0x168] ss:$12 sps:$4 sm:$0xff]  }
 0xd6b   : > { %5047 = vmatpush1.bf16.msra.mxu0 %v11001_v53 }
 0xd6c   : > { %5048 = vmatprep.subr.bf16.mxu0 %v11007_v42 }
 0xd6d   : > { %10650 = vmatpush3.bf16.msra.mxu1 %v11012_v60 }
 0xd6e   : > { %10651 = vmatprep.subr.bf16.mxu1 %v11761_v0 }
 0xd6f   : > { %5049 = vmatpush1.bf16.msra.mxu0 %v11005_v55 }
 0xd70   : > { %5050 = vmatprep.subr.bf16.mxu0 %v11011_v57 }
 0xd71   : > { %10652 = vmatpush3.bf16.msra.mxu1 %v11016_v2 }
 0xd72   : > { %10653 = vmatprep.subr.bf16.mxu1 %v11761_v0 }
 0xd73   : > { %5051 = vmatpush1.bf16.msra.mxu0 %v11009_v59 }
 0xd74   : > { %5052 = vmatprep.subr.bf16.mxu0 %v11015_v61 }
 0xd77   : > { %5053 = vmatpush1.bf16.msra.mxu0 %v11013_v62 }
 0xd78   : > { %5054 = vmatprep.subr.bf16.mxu0 %v11019_v33 }
 0xd7b   : > { %5055 = vmatpush1.bf16.msra.mxu0 %v11017_v3 }
 0xd7c   : > { %10659 = vmatprep.subr.mxu0 %v11761_v0 }
 0xd82   : > { %v10315_v40 = vpop.f32.mrb[52].mxu0  ;;  %v10337_v5 = vpop.f32.mrb[40].mxu1 }
 0xd83   : > { %v10316_v6 = vpop.f32.mrb[53].mxu0  ;;  %v10338_v7 = vpop.f32.mrb[41].mxu1 }
 0xd84   : > { %v10317_v9 = vadd.f32 %v10316_v6, %v10315_v40  ;;  %v10339_v10 = vadd.f32 %v10338_v7, %v10337_v5  ;;  %v10318_v12 = vpop.f32.mrb[54].mxu0  ;;  %v10340_v35 = vpop.f32.mrb[42].mxu1 }
 0xd85   : > { %v10319_v13 = vpop.f32.mrb[55].mxu0  ;;  %v10341_v14 = vpop.f32.mrb[43].mxu1 }
 0xd86   : > { %v4771_v15 = vadd.f32 %v10317_v9, %v4730_v38  ;;  %v10320_v63 = vadd.f32 %v10319_v13, %v10318_v12  ;;  %v10342_v16 = vadd.f32 %v10341_v14, %v10340_v35  ;;  %v11020_v38 = vld [vmem:[%s12468_s12 + $0x170] ss:$12 sps:$4 sm:$0xff]   ;;  %s932_s12 = scalar_lea.vmem [#allocation27], %s12486_s21 }
 0xd87   : > { %10654 = vmatpush3.bf16.msra.mxu1 %v11020_v38 }
 0xd88   : > { %v4812_v17 = vadd.f32 %v10339_v10, %v4771_v15  ;;  %v4774_v18 = vadd.f32 %v10320_v63, %v4733_v39  ;;  %10699 = vmatprep.subr.bf16.mxu1 %v11761_v0  ;;  %v9367_v10 = vld [vmem:[%s923_s9] ss:$0 sm:$0xff]  ;;  %v9368_v15 = vld [vmem:[%s932_s12] ss:$0 sm:$0xff] }
 0xd8a   : > { %v4815_v19 = vadd.f32 %v10342_v16, %v4774_v18  ;;  %v4818_v20 = vadd.f32 %v4812_v17, %v12754_v34 }
 0xd8c   : > { %4822 = vadd.xlane.f32.xlu1 %v4818_v20  ;;  %v4819_v21 = vadd.f32 %v4815_v19, %v12756_v8  ;;  %v9401_v19 = vld [vmem:[%s12476_s20 + $0x3] sm:$0x7]  ;;  %s13687_s20 = sld [smem:[#allocation46_spill]] }
 0xd8d   : > { %v4900_v23 = vrot.slane %v9401_v19, %v12584_v43  ;;  %v4908_v24 = vrot.slane %v9401_v19, %v12592_v47 }
 0xd8e   : > { %4824 = vadd.xlane.f32.xlu0 %v4819_v21 }
 0xd92   : > { %p13689_p5 = scmp.ne.s32.totalorder %s13687_s20, 0 }
 0xe19   : > { %v4823_v34 = vpop.xlane.xlu1 %4822 }
 0xe1a   : > { %v4826_v8 = vmul.f32 0.0078125, %v4823_v34 }
 0xe1b   : > { %v4825_v28 = vpop.xlane.xlu0 %4824 }
 0xe1c   : > { %v4828_v29 = vsub.f32 %v4818_v20, %v4826_v8  ;;  %v4827_v31 = vmul.f32 0.0078125, %v4825_v28  ;;  %v4904_v20 = vrot.slane %v9401_v19, %v12588_v45 }
 0xe1e   : > { %v4829_v32 = vsub.f32 %v4819_v21, %v4827_v31  ;;  %v4830_v37 = vmul.f32 %v4828_v29, %v4828_v29 }
 0xe20   : > { %4832 = vadd.xlane.f32.xlu1 %v4830_v37  ;;  %v4831_v46 = vmul.f32 %v4829_v32, %v4829_v32 }
 0xe22   : > { %4834 = vadd.xlane.f32.xlu0 %v4831_v46 }
 0xead   : > { %v4833_v36 = vpop.xlane.xlu1 %4832 }
 0xeae   : > { %v4836_v39 = vmul.f32 0.0078125, %v4833_v36 }
 0xeaf   : > { %v4835_v40 = vpop.xlane.xlu0 %4834 }
 0xeb0   : > { %v4838_v5 = vadd.f32 1e-05, %v4836_v39  ;;  %v4837_v6 = vmul.f32 0.0078125, %v4835_v40 }
 0xeb2   : > { %11177 = vrsqrt.f32 %v4838_v5  ;;  %v4839_v7 = vadd.f32 1e-05, %v4837_v6 }
 0xeb4   : > { %11179 = vrsqrt.f32 %v4839_v7 }
 0xebc   : > { %v11178_v9 = vpop.eup %11177 }
 0xebd   : > { %v4842_v12 = vmul.f32 %v11178_v9, %v4828_v29 }
 0xebe   : > { %v11180_v35 = vpop.eup %11179 }
 0xebf   : > { %v4843_v13 = vmul.f32 %v11180_v35, %v4829_v32  ;;  %v4850_v14 = vmul.f32 %v9367_v10, %v4842_v12 }
 0xec1   : > { %v4851_v63 = vmul.f32 %v9367_v10, %v4843_v13  ;;  %v13091_v16 = vadd.f32 %v9368_v15, %v4850_v14 }
 0xec3   : > { %v13093_v17 = vadd.f32 %v9368_v15, %v4851_v63 }
 0xec5   : > { %v4860_v18 = vpack.c.bf16 %v13093_v17, %v13091_v16 }
 0xec7   : > { %5073 = vmatmul.mubr.bf16.vlgmr.msra.gmra.mrb[56].mxu0 %v4860_v18  ;;  %10656 = vmatmul.mubr.bf16.vlgmr.msra.gmra.mrb[44].mxu1 %v4860_v18 }
 0xec8   : > { %10661 = vmatprep.mubr.msk.f32.mxu0 %vm11762_vm0, %v11761_v0  ;;  %10715 = vmatprep.mubr.msk.bf16.mxu1 %vm11762_vm0, %v11761_v0 }
 0xf9a   : > { %v5074_v21 = vpop.f32.mrb[56].mxu0  ;;  %v5117_v22 = vpop.f32.mrb[44].mxu1 }
 0xf9b   : > { %v5076_v25 = vpop.f32.mrb[57].mxu0  ;;  %v10657_v26 = vpop.f32.mrb[45].mxu1  ;;  %v5075_v32 = vadd.f32 %v5074_v21, %v4900_v23  ;;  %v13114_v1 = vadd.f32 %v5117_v22, %v4908_v24 }
 0xf9c   : > { %v5077_v27 = vadd.f32 %v5076_v25, %v4904_v20  ;;  %v5078_v34 = vpop.f32.mrb[58].mxu0  ;;  %v5120_v8 = vpop.f32.mrb[46].mxu1 }
 0xf9d   : > { %v13105_v28 = vadd.f32 %v5120_v8, %v4908_v24  ;;  %v5080_v29 = vpop.f32.mrb[59].mxu0  ;;  %v10658_v31 = vpop.f32.mrb[47].mxu1  ;;  %v5079_v46 = vadd.f32 %v5078_v34, %v4900_v23 }
 0xf9e   : > { %10660 = vmatpush3.xpose.msk.msra.mxu0 %vm1383_vm3, %v5077_v27  ;;  %v5081_v37 = vadd.f32 %v5080_v29, %v4904_v20 }
 0xf9f   : > { %10664 = vmatprep.subr.mxu0 %v11761_v0 }
 0xfa1   : > { %10662 = vmatmul.mubr.msk.f32.vlgmr.msra.gmra.mrb[22].mxu0 %vm1383_vm3, %v5075_v32 }
 0xfa2   : > { %10665 = vmatpush3.xpose.msk.msra.mxu0 %vm1383_vm3, %v5081_v37  ;;  %10666 = vmatprep.mubr.msk.f32.mxu0 %vm11762_vm0, %v11761_v0 }
 0xfa3   : > { %10669 = vmatprep.subr.mxu0 %v11761_v0 }
 0xfa5   : > { %10667 = vmatmul.mubr.msk.f32.vlgmr.msra.gmra.mrb[60].mxu0 %vm1383_vm3, %v5079_v46 }
 0xfa6   : > { %10670 = vmatpush3.msra.mxu0 %v13114_v1  ;;  %10671 = vmatprep.mubr.msk.f32.mxu0 %vm11762_vm0, %v11761_v0 }
 0xfa7   : > { %10674 = vmatprep.subr.mxu0 %v11761_v0 }
0x1074   : > { %v5196_v51 = vpop.f32.mrb[22].mxu0 }
0x1075   : > { %v5276_v41 = vmul.f32 0.125, %v5196_v51  ;;  %v10663_v52 = vpop.f32.mrb[23].mxu0 }
0x1077   : > { %v5278_v53 = vsel %vm12614_vm4, %v5276_v41, -1e+30 }
0x1078   : > { %v5272_v54 = vpop.f32.mrb[60].mxu0  ;;  %v5280_v42 = vsel %vm1060_vm2, %v5278_v53, -inf }
0x1079   : > { %v5277_v55 = vmul.f32 0.125, %v5272_v54  ;;  %5281 = vmax.xlane.f32.xlu1 %v5280_v42  ;;  %v10668_v56 = vpop.f32.mrb[61].mxu0 }
0x107b   : > { %v5279_v57 = vsel %vm12621_vm5, %v5277_v55, -1e+30 }
0x107c   : > { %v5283_v59 = vsel %vm1060_vm2, %v5279_v57, -inf }
0x107d   : > { %5284 = vmax.xlane.f32.xlu0 %v5283_v59 }
0x1106   : > { %v5282_v60 = vpop.xlane.xlu1 %5281 }
0x1107   : > { %v5286_v61 = vsub.f32 %v5278_v53, %v5282_v60 }
0x1109   : > { %v5288_v62 = vmul.f32 1.442695, %v5286_v61  ;;  %v11022_v61 = vld [vmem:[%s12479_s1 + $0x48] sm:$0xff]  }
0x110a   : > { %v5285_v2 = vpop.xlane.xlu0 %5284 }
0x110b   : > { %11181 = vpow2.f32 %v5288_v62  ;;  %v5287_v33 = vsub.f32 %v5279_v57, %v5285_v2  ;;  %v11023_v62 = vld [vmem:[%s12479_s1 + $0x50] sm:$0xff]   ;;  %v11024_v2 = vld [vmem:[%s12479_s1 + $0x58] sm:$0xff]  }
0x110d   : > { %v5290_v3 = vmul.f32 1.442695, %v5287_v33  ;;  %v11025_v33 = vld [vmem:[%s12479_s1 + $0x60] sm:$0xff]  }
0x110f   : > { %11183 = vpow2.f32 %v5290_v3  ;;  %v11026_v3 = vld [vmem:[%s12479_s1 + $0x68] sm:$0xff]  }
0x1115   : > { %v11182_v38 = vpop.eup %11181 }
0x1116   : > { %v5292_v36 = vsel %vm1060_vm2, %v11182_v38, 0.0 }
0x1117   : > { %5293 = vadd.xlane.f32.xlu1 %v5292_v36  ;;  %v11028_v36 = vld [vmem:[%s12479_s1 + $0x78] sm:$0xff]  }
0x1119   : > { %v11184_v39 = vpop.eup %11183 }
0x111a   : > { %v5295_v40 = vsel %vm1060_vm2, %v11184_v39, 0.0 }
0x111b   : > { %5296 = vadd.xlane.f32.xlu0 %v5295_v40 }
0x1128   : > { %5450 = vrot.lane.b32.xlu1 %v5077_v27, %s11764_s2 }
0x112c   : > { %5528 = vrot.lane.b32.xlu1 %v5081_v37, %s11764_s2 }
0x1130   : > { %5526 = vrot.lane.b32.xlu1 %v5079_v46, %s11764_s2 }
0x1131   : > { %5448 = vrot.lane.b32.xlu0 %v5075_v32, %s11764_s2 }
0x11a4   : > { %v5294_v5 = vpop.xlane.xlu1 %5293 }
0x11a5   : > { %11185 = vrcp.f32 %v5294_v5 }
0x11a8   : > { %v5297_v6 = vpop.xlane.xlu0 %5296  ;;  %v5451_v12 = vpop.permute.xlu1 %5450 }
0x11a9   : > { %11187 = vrcp.f32 %v5297_v6 }
0x11ac   : > { %v5529_v13 = vpop.permute.xlu1 %5528  ;;  %v5449_v14 = vpop.permute.xlu0 %5448 }
0x11af   : > { %v11186_v7 = vpop.eup %11185 }
0x11b0   : > { %v5300_v9 = vmul.f32 %v11186_v7, %v11182_v38  ;;  %v5527_v15 = vpop.permute.xlu1 %5526  ;;  %v11027_v38 = vld [vmem:[%s12479_s1 + $0x70] sm:$0xff]  }
0x11b2   : > { %10672 = vmatmul.mubr.msk.f32.vlgmr.msra.gmra.mrb[62].mxu0 %vm1060_vm2, %v5300_v9 }
0x11b3   : > { %v11188_v10 = vpop.eup %11187  ;;  %10675 = vmatpush3.msra.mxu0 %v13105_v28  ;;  %10676 = vmatprep.mubr.msk.f32.mxu0 %vm11762_vm0, %v11761_v0 }
0x11b4   : > { %v5301_v35 = vmul.f32 %v11188_v10, %v11184_v39  ;;  %10679 = vmatprep.subr.mxu0 %v11761_v0 }
0x11b6   : > { %10677 = vmatmul.mubr.msk.f32.vlgmr.msra.gmra.mrb[64].mxu0 %vm1060_vm2, %v5301_v35 }
0x11b7   : > { %10681 = vmatprep.mubr.msk.f32.mxu0 %vm11762_vm0, %v11761_v0 }
0x11ba   : > { %10680 = vmatpush3.xpose.msk.msra.mxu0 %vm1383_vm3, %v5451_v12 }
0x11bb   : > { %10684 = vmatprep.subr.mxu0 %v11761_v0 }
0x11bd   : > { %10682 = vmatmul.mubr.msk.f32.vlgmr.msra.gmra.mrb[66].mxu0 %vm1383_vm3, %v5449_v14  ;;  %v9455_v14 = vld [vmem:[%s860_s27 + $0x1] ss:$0 sm:$0xff]  ;;  %s1047_s27 = scalar_lea.vmem [#allocation28], %s12486_s21 }
0x11be   : > { %10685 = vmatpush3.xpose.msk.msra.mxu0 %vm1383_vm3, %v5529_v13  ;;  %10686 = vmatprep.mubr.msk.f32.mxu0 %vm11762_vm0, %v11761_v0 }
0x11bf   : > { %10689 = vmatprep.subr.mxu0 %v11761_v0 }
0x11c1   : > { %10687 = vmatmul.mubr.msk.f32.vlgmr.msra.gmra.mrb[68].mxu0 %vm1383_vm3, %v5527_v15 }
0x11c2   : > { %10691 = vmatprep.mubr.msk.f32.mxu0 %vm11762_vm0, %v11761_v0 }
0x1285   : > { %v13151_v63 = vpop.f32.mrb[62].mxu0 }
0x1286   : > { %v10673_v18 = vpop.f32.mrb[63].mxu0 }
0x1289   : > { %v13153_v19 = vpop.f32.mrb[64].mxu0 }
0x128a   : > { %v10678_v20 = vpop.f32.mrb[65].mxu0 }
0x1290   : > { %v5522_v21 = vpop.f32.mrb[66].mxu0 }
0x1291   : > { %v5604_v22 = vmul.f32 0.125, %v5522_v21  ;;  %v10683_v23 = vpop.f32.mrb[67].mxu0 }
0x1293   : > { %v5606_v24 = vsel %vm12614_vm4, %v5604_v22, -1e+30 }
0x1294   : > { %v5600_v25 = vpop.f32.mrb[68].mxu0  ;;  %v5608_v26 = vsel %vm1060_vm2, %v5606_v24, -inf }
0x1295   : > { %v5605_v27 = vmul.f32 0.125, %v5600_v25  ;;  %5609 = vmax.xlane.f32.xlu1 %v5608_v26  ;;  %v10688_v34 = vpop.f32.mrb[69].mxu0  ;;  %v9476_v25 = vld [vmem:[%s12498_s10 + $0x440] sm:$0xff]  ;;  %v9469_v26 = vld [vmem:[%s12498_s10 + $0x408] sm:$0xff] }
0x1297   : > { %v5607_v8 = vsel %vm12621_vm5, %v5605_v27, -1e+30 }
0x1298   : > { %v5611_v29 = vsel %vm1060_vm2, %v5607_v8, -inf }
0x1299   : > { %5612 = vmax.xlane.f32.xlu0 %v5611_v29  ;;  %v9484_v29 = vld [vmem:[%s12498_s10 + $0x480] sm:$0xff] }
0x12a6   : > { %5631 = vrot.lane.b32.xlu1 %v13114_v1, %s11764_s2 }
0x1322   : > { %v5610_v31 = vpop.xlane.xlu1 %5609 }
0x1323   : > { %v5614_v32 = vsub.f32 %v5606_v24, %v5610_v31  ;;  %v9468_v24 = vld [vmem:[%s12498_s10 + $0x400] sm:$0xff] }
0x1324   : > { %v9598_v27 = vcombine.low %v9468_v24, %v9476_v25  ;;  %v9599_v34 = vcombine.high %v9468_v24, %v9476_v25  ;;  %v9492_v31 = vld [vmem:[%s12498_s10 + $0x4c0] sm:$0xff] }
0x1325   : > { %v5616_v37 = vmul.f32 1.442695, %v5614_v32  ;;  %v9564_v25 = vld [vmem:[%s12498_s10 + $0x700] sm:$0xff] }
0x1326   : > { %v5632_v4 = vpop.permute.xlu1 %5631  ;;  %v5613_v46 = vpop.xlane.xlu0 %5612 }
0x1327   : > { %11189 = vpow2.f32 %v5616_v37  ;;  %v5615_v51 = vsub.f32 %v5607_v8, %v5613_v46  ;;  %10690 = vmatpush3.msra.mxu0 %v5632_v4  ;;  %v9477_v8 = vld [vmem:[%s12498_s10 + $0x448] sm:$0xff]  ;;  %v9615_v4 = vcombine.high %v9484_v29, %v9492_v31 }
0x1328   : > { %10694 = vmatprep.subr.mxu0 %v11761_v0  ;;  %v9600_v32 = vcombine.low %v9469_v26, %v9477_v8  ;;  %v9601_v37 = vcombine.high %v9469_v26, %v9477_v8  ;;  %v9485_v46 = vld [vmem:[%s12498_s10 + $0x488] sm:$0xff]  ;;  %v9572_v26 = vld [vmem:[%s12498_s10 + $0x740] sm:$0xff] }
0x1329   : > { %v5618_v41 = vmul.f32 1.442695, %v5615_v51  ;;  %v9493_v51 = vld [vmem:[%s12498_s10 + $0x4c8] sm:$0xff] }
0x132a   : > { %v9573_v8 = vld [vmem:[%s12498_s10 + $0x748] sm:$0xff] }
0x132b   : > { %11191 = vpow2.f32 %v5618_v41  ;;  %v9614_v41 = vcombine.low %v9484_v29, %v9492_v31  ;;  %v9694_v29 = vcombine.low %v9564_v25, %v9572_v26 }
0x1331   : > { %v11190_v11 = vpop.eup %11189 }
0x1332   : > { %v5620_v52 = vsel %vm1060_vm2, %v11190_v11, 0.0 }
0x1333   : > { %5621 = vadd.xlane.f32.xlu0 %v5620_v52 }
0x1335   : > { %v11192_v53 = vpop.eup %11191 }
0x1336   : > { %v5623_v54 = vsel %vm1060_vm2, %v11192_v53, 0.0 }
0x1337   : > { %5624 = vadd.xlane.f32.xlu0 %v5623_v54 }
0x134d   : > { %5708 = vrot.lane.b32.xlu0 %v13105_v28, %s11764_s2  ;;  %v11021_v28 = vld [vmem:[%s12479_s1 + $0x40] sm:$0xff]   ;;  %s10117_s1 = sshll.u32 %s13682_s30, 5  ;;  %s11765_s30 = smov [#allocation28]  }
0x134e   : > { %10700 = vmatpush3.bf16.msra.mxu1 %v11021_v28  ;;  %s11639_s21 = sshll.u32 %s11765_s30, 4  ;;  %s11640_s21 = int_to_ptr.vmem [resolvable:$false] %s11639_s21 }
0x134f   : > { %10701 = vmatprep.subr.bf16.mxu1 %v11761_v0 }
0x1352   : > { %10702 = vmatpush3.bf16.msra.mxu1 %v11022_v61  ;;  %v9509_v61 = vld [vmem:[%s12498_s10 + $0x548] sm:$0xff] }
0x1353   : > { %10703 = vmatprep.subr.bf16.mxu1 %v11761_v0 }
0x1356   : > { %10704 = vmatpush3.bf16.msra.mxu1 %v11023_v62 }
0x1357   : > { %10705 = vmatprep.subr.bf16.mxu1 %v11761_v0 }
0x135a   : > { %10706 = vmatpush3.bf16.msra.mxu1 %v11024_v2 }
0x135b   : > { %10707 = vmatprep.subr.bf16.mxu1 %v11761_v0 }
0x135e   : > { %10708 = vmatpush3.bf16.msra.mxu1 %v11025_v33 }
0x135f   : > { %10709 = vmatprep.subr.bf16.mxu1 %v11761_v0 }
0x1362   : > { %10710 = vmatpush3.bf16.msra.mxu1 %v11026_v3  ;;  %v9516_v3 = vld [vmem:[%s12498_s10 + $0x580] sm:$0xff] }
0x1363   : > { %10711 = vmatprep.subr.bf16.mxu1 %v11761_v0 }
0x1366   : > { %10712 = vmatpush3.bf16.msra.mxu1 %v11027_v38  ;;  %v9524_v38 = vld [vmem:[%s12498_s10 + $0x5c0] sm:$0xff] }
0x1367   : > { %10713 = vmatprep.subr.bf16.mxu1 %v11761_v0 }
0x136a   : > { %10714 = vmatpush3.bf16.msra.mxu1 %v11028_v36  ;;  %v9517_v36 = vld [vmem:[%s12498_s10 + $0x588] sm:$0xff] }
0x136b   : > { %6851 = vmatprep.subr.bf16.mxu1 %v9601_v37  ;;  %v9580_v37 = vld [vmem:[%s12498_s10 + $0x780] sm:$0xff] }
0x13c0   : > { %v5622_v1 = vpop.xlane.xlu0 %5621 }
0x13c1   : > { %11193 = vrcp.f32 %v5622_v1 }
0x13c4   : > { %v5625_v42 = vpop.xlane.xlu0 %5624 }
0x13c5   : > { %11195 = vrcp.f32 %v5625_v42 }
0x13c8   : > { %v5709_v57 = vpop.permute.xlu0 %5708 }
0x13cb   : > { %v11194_v55 = vpop.eup %11193 }
0x13cc   : > { %v5628_v56 = vmul.f32 %v11194_v55, %v11190_v11 }
0x13ce   : > { %10692 = vmatmul.mubr.msk.f32.vlgmr.msra.gmra.mrb[70].mxu0 %vm1060_vm2, %v5628_v56 }
0x13cf   : > { %v11196_v59 = vpop.eup %11195  ;;  %10695 = vmatpush3.msra.mxu0 %v5709_v57  ;;  %10696 = vmatprep.mubr.msk.f32.mxu0 %vm11762_vm0, %v11761_v0  ;;  %v9500_v57 = vld [vmem:[%s12498_s10 + $0x500] sm:$0xff] }
0x13d0   : > { %v5629_v60 = vmul.f32 %v11196_v59, %v11192_v53  ;;  %6808 = vmatprep.subr.bf16.mxu0 %v9599_v34  ;;  %v9508_v59 = vld [vmem:[%s12498_s10 + $0x540] sm:$0xff]  ;;  %v9695_v34 = vcombine.high %v9564_v25, %v9572_v26  ;;  %v9518_v25 = vld [vmem:[%s12498_s10 + $0x590] sm:$0xff] }
0x13d1   : > { %v9631_v28 = vcombine.high %v9500_v57, %v9508_v59  ;;  %v9630_v62 = vcombine.low %v9500_v57, %v9508_v59  ;;  %v9479_v57 = vld [vmem:[%s12498_s10 + $0x458] sm:$0xff]  ;;  %v9526_v26 = vld [vmem:[%s12498_s10 + $0x5d0] sm:$0xff] }
0x13d2   : > { %10697 = vmatmul.mubr.msk.f32.vlgmr.msra.gmra.mrb[72].mxu0 %vm1060_vm2, %v5629_v60  ;;  %v9501_v60 = vld [vmem:[%s12498_s10 + $0x508] sm:$0xff] }
0x13d3   : > { %6840 = vmatprep.mubr.bf16.mxu0 %v11763_v30  ;;  %6809 = vmatpush1.bf16.msra.mxu0 %v9598_v27  ;;  %v9632_v2 = vcombine.low %v9501_v60, %v9509_v61  ;;  %v9633_v33 = vcombine.high %v9501_v60, %v9509_v61  ;;  %v9565_v27 = vld [vmem:[%s12498_s10 + $0x708] sm:$0xff] }
0x13d4   : > { %6810 = vmatprep.subr.bf16.mxu0 %v9615_v4  ;;  %v9696_v31 = vcombine.low %v9565_v27, %v9573_v8  ;;  %v9588_v4 = vld [vmem:[%s12498_s10 + $0x7c0] sm:$0xff] }
0x13d7   : > { %6811 = vmatpush1.bf16.msra.mxu0 %v9614_v41  ;;  %v9710_v41 = vcombine.low %v9580_v37, %v9588_v4 }
0x13d8   : > { %6812 = vmatprep.subr.bf16.mxu0 %v9631_v28 }
0x13db   : > { %6813 = vmatpush1.bf16.msra.mxu0 %v9630_v62 }
0x14a1   : > { %v5703_v39 = vpop.f32.mrb[70].mxu0 }
0x14a2   : > { %v10693_v40 = vpop.f32.mrb[71].mxu0 }
0x14a3   : > { %v9525_v40 = vld [vmem:[%s12498_s10 + $0x5c8] sm:$0xff] }
0x14a5   : > { %v5780_v5 = vpop.f32.mrb[72].mxu0 }
0x14a6   : > { %v10816_v6 = vpack.i.bf16 %v5780_v5, %v5703_v39  ;;  %v10698_v7 = vpop.f32.mrb[73].mxu0  ;;  %v9647_v39 = vcombine.high %v9516_v3, %v9524_v38  ;;  %v9646_v5 = vcombine.low %v9516_v3, %v9524_v38 }
0x14a7   : > { %v9649_v7 = vcombine.high %v9517_v36, %v9525_v40 }
0x14a8   : > { %10817 = vrot.lane.b32.xlu1 %v10816_v6, %s11764_s2  ;;  %v9648_v6 = vcombine.low %v9517_v36, %v9525_v40  ;;  %6814 = vmatprep.subr.bf16.mxu0 %v9647_v39  ;;  %v9466_v36 = vld [vmem:[%s869_s24 + $0x1] ss:$0 sm:$0xff]  ;;  %s8637_s24 = sshll.u32 %s1047_s27, 4  ;;  %s13543_s24 = int_to_ptr.vmem [resolvable:$true] %s8637_s24 }
0x14a9   : > { %6815 = vmatpush1.bf16.msra.mxu0 %v9646_v5  ;;  %s11635_s4 = scalar_lea.vmem %s13543_s24, 32  ;;  %p11642_p10 = scmp.lt.s32.totalorder %s13543_s24, %s11640_s21 }
0x14aa   : > { %p11636_p8 = scmp.ne.s32.totalorder %s13543_s24, %s11635_s4 }
0x14ac   : > { %p11637_p7 = pnand %p11636_p8, %p13689_p5 }
0x14ae   : > { %p11638_p2 = pneg %p11637_p7 }
0x151a   : > { %v10818_v9 = vpop.permute.xlu1 %10817 }
0x151b   : > { %v10820_v10 = vunpack.i.h.bf16 %v10818_v9  ;;  %v10819_v12 = vunpack.i.l.bf16 %v10818_v9  ;;  %v9532_v9 = vld [vmem:[%s12498_s10 + $0x600] sm:$0xff] }
0x151d   : > { %v5793_v35 = vsel %vm1383_vm3, %v13153_v19, %v10820_v10  ;;  %v5792_v0 = vsel %vm1383_vm3, %v13151_v63, %v10819_v12  ;;  %v9540_v10 = vld [vmem:[%s12498_s10 + $0x640] sm:$0xff]  ;;  %v9533_v12 = vld [vmem:[%s12498_s10 + $0x608] sm:$0xff] }
0x151e   : > { %v5794_v13 = vpack.c.bf16 %v5793_v35, %v5792_v0  ;;  %v9663_v35 = vcombine.high %v9532_v9, %v9540_v10  ;;  %v9541_v0 = vld [vmem:[%s12498_s10 + $0x648] sm:$0xff] }
0x1520   : > { %10716 = vmatmul.mubr.bf16.vlgmr.msra.gmra.mrb[48].mxu1 %v5794_v13  ;;  %v9662_v13 = vcombine.low %v9532_v9, %v9540_v10  ;;  %6816 = vmatprep.subr.bf16.mxu0 %v9663_v35  ;;  %v9486_v10 = vld [vmem:[%s12498_s10 + $0x490] sm:$0xff]  ;;  %v9487_v35 = vld [vmem:[%s12498_s10 + $0x498] sm:$0xff] }
0x1521   : > { %6883 = vmatprep.mubr.bf16.mxu1 %v11763_v30  ;;  %6852 = vmatpush1.bf16.msra.mxu1 %v9600_v32  ;;  %v9697_v32 = vcombine.high %v9565_v27, %v9573_v8  ;;  %v9519_v27 = vld [vmem:[%s12498_s10 + $0x598] sm:$0xff] }
0x1522   : > { %6817 = vmatpush1.bf16.msra.mxu0 %v9662_v13 }
0x15f3   : > { %v5902_v15 = vpop.f32.mrb[48].mxu1 }
0x15f4   : > { %v5903_v18 = vadd.f32 %v9455_v14, %v5902_v15  ;;  %v10717_v20 = vpop.f32.mrb[49].mxu1  ;;  %v9665_v15 = vcombine.high %v9533_v12, %v9541_v0 }
0x15f5   : > { %v5905_v21 = vpop.f32.mrb[50].mxu1  ;;  %v9556_v20 = vld [vmem:[%s12498_s10 + $0x6c0] sm:$0xff] }
0x15f6   : > { %v5906_v19 = vadd.f32 %v9455_v14, %v5905_v21  ;;  %v10718_v22 = vpop.f32.mrb[51].mxu1  ;;  %v5909_v63 = vadd.f32 %v5903_v18, %v13091_v16  ;;  %v9617_v16 = vcombine.high %v9485_v46, %v9493_v51  ;;  %v9664_v14 = vcombine.low %v9533_v12, %v9541_v0  ;;  %v9548_v18 = vld [vmem:[%s12498_s10 + $0x680] sm:$0xff]  ;;  %v9549_v21 = vld [vmem:[%s12498_s10 + $0x688] sm:$0xff]  ;;  %v9494_v12 = vld [vmem:[%s12498_s10 + $0x4d0] sm:$0xff] }
0x15f7   : > { %v9557_v22 = vld [vmem:[%s12498_s10 + $0x6c8] sm:$0xff]  ;;  %v9495_v0 = vld [vmem:[%s12498_s10 + $0x4d8] sm:$0xff] }
0x15f8   : > { %5915 = vadd.xlane.f32.xlu1 %v5909_v63  ;;  %v5910_v23 = vadd.f32 %v5906_v19, %v13093_v17  ;;  %v9616_v17 = vcombine.low %v9485_v46, %v9493_v51  ;;  %6853 = vmatprep.subr.bf16.mxu1 %v9617_v16  ;;  %v9679_v19 = vcombine.high %v9548_v18, %v9556_v20  ;;  %v9581_v46 = vld [vmem:[%s12498_s10 + $0x788] sm:$0xff] }
0x15f9   : > { %v9681_v24 = vcombine.high %v9549_v21, %v9557_v22  ;;  %v9711_v51 = vcombine.high %v9580_v37, %v9588_v4  ;;  %v9589_v16 = vld [vmem:[%s12498_s10 + $0x7c8] sm:$0xff]  ;;  %v9534_v37 = vld [vmem:[%s12498_s10 + $0x610] sm:$0xff] }
0x15fa   : > { %5917 = vadd.xlane.f32.xlu0 %v5910_v23  ;;  %6854 = vmatpush1.bf16.msra.mxu1 %v9616_v17  ;;  %v9712_v17 = vcombine.low %v9581_v46, %v9589_v16  ;;  %v9542_v4 = vld [vmem:[%s12498_s10 + $0x650] sm:$0xff] }
0x15fb   : > { %6855 = vmatprep.subr.bf16.mxu1 %v9633_v33  ;;  %6818 = vmatprep.subr.bf16.mxu0 %v9679_v19  ;;  %v9511_v19 = vld [vmem:[%s12498_s10 + $0x558] sm:$0xff] }
0x15fe   : > { %6856 = vmatpush1.bf16.msra.mxu1 %v9632_v2 }
0x15ff   : > { %6857 = vmatprep.subr.bf16.mxu1 %v9649_v7  ;;  %v9467_v7 = vld [vmem:[%s878_s6 + $0x1] ss:$0 sm:$0xff] }
0x1602   : > { %6858 = vmatpush1.bf16.msra.mxu1 %v9648_v6 }
0x1603   : > { %6859 = vmatprep.subr.bf16.mxu1 %v9665_v15  ;;  %v9619_v15 = vcombine.high %v9486_v10, %v9494_v12 }
0x1606   : > { %6860 = vmatpush1.bf16.msra.mxu1 %v9664_v14 }
0x1607   : > { %6861 = vmatprep.subr.bf16.mxu1 %v9681_v24 }
0x1685   : > { %v5916_v11 = vpop.xlane.xlu1 %5915 }
0x1686   : > { %v5919_v52 = vmul.f32 0.0078125, %v5916_v11  ;;  %v9713_v11 = vcombine.high %v9581_v46, %v9589_v16  ;;  %v9535_v46 = vld [vmem:[%s12498_s10 + $0x618] sm:$0xff]  ;;  %v9650_v16 = vcombine.low %v9518_v25, %v9526_v26 }
0x1687   : > { %v5918_v53 = vpop.xlane.xlu0 %5917 }
0x1688   : > { %v13206_v54 = vsub.f32 %v5909_v63, %v5919_v52  ;;  %v5920_v1 = vmul.f32 0.0078125, %v5918_v53  ;;  %v9678_v63 = vcombine.low %v9548_v18, %v9556_v20  ;;  %v9470_v52 = vld [vmem:[%s12498_s10 + $0x410] sm:$0xff]  ;;  %v9621_v18 = vcombine.high %v9487_v35, %v9495_v0 }
0x1689   : > { %v9478_v53 = vld [vmem:[%s12498_s10 + $0x450] sm:$0xff] }
0x168a   : > { %v13208_v42 = vsub.f32 %v5910_v23, %v5920_v1  ;;  %v5923_v55 = vmul.f32 %v13206_v54, %v13206_v54  ;;  %v9680_v23 = vcombine.low %v9549_v21, %v9557_v22  ;;  %6819 = vmatpush1.bf16.msra.mxu0 %v9678_v63  ;;  %v9471_v1 = vld [vmem:[%s12498_s10 + $0x418] sm:$0xff]  ;;  %v9510_v20 = vld [vmem:[%s12498_s10 + $0x550] sm:$0xff]  ;;  %v9618_v22 = vcombine.low %v9486_v10, %v9494_v12 }
0x168b   : > { %6820 = vmatprep.subr.bf16.mxu0 %v9695_v34  ;;  %v9604_v59 = vcombine.low %v9471_v1, %v9479_v57  ;;  %v9605_v60 = vcombine.high %v9471_v1, %v9479_v57  ;;  %v9503_v21 = vld [vmem:[%s12498_s10 + $0x518] sm:$0xff]  ;;  %v9620_v63 = vcombine.low %v9487_v35, %v9495_v0  ;;  %v9472_v35 = vld [vmem:[%s12498_s10 + $0x420] sm:$0xff] }
0x168c   : > { %5925 = vadd.xlane.f32.xlu0 %v5923_v55  ;;  %v5924_v56 = vmul.f32 %v13208_v42, %v13208_v42  ;;  %6862 = vmatpush1.bf16.msra.mxu1 %v9680_v23  ;;  %v9602_v55 = vcombine.low %v9470_v52, %v9478_v53  ;;  %v9637_v24 = vcombine.high %v9503_v21, %v9511_v19  ;;  %v9527_v34 = vld [vmem:[%s12498_s10 + $0x5d8] sm:$0xff]  ;;  %v9480_v0 = vld [vmem:[%s12498_s10 + $0x460] sm:$0xff] }
0x168d   : > { %6863 = vmatprep.subr.bf16.mxu1 %v9697_v32  ;;  %v9653_v32 = vcombine.high %v9519_v27, %v9527_v34  ;;  %v9551_v1 = vld [vmem:[%s12498_s10 + $0x698] sm:$0xff] }
0x168e   : > { %5927 = vadd.xlane.f32.xlu1 %v5924_v56  ;;  %6821 = vmatpush1.bf16.msra.mxu0 %v9694_v29  ;;  %v9603_v56 = vcombine.high %v9470_v52, %v9478_v53  ;;  %v9636_v29 = vcombine.low %v9503_v21, %v9511_v19  ;;  %v9550_v52 = vld [vmem:[%s12498_s10 + $0x690] sm:$0xff]  ;;  %v9607_v21 = vcombine.high %v9472_v35, %v9480_v0 }
0x168f   : > { %6822 = vmatprep.subr.bf16.mxu0 %v9711_v51  ;;  %v9543_v51 = vld [vmem:[%s12498_s10 + $0x658] sm:$0xff]  ;;  %v9558_v53 = vld [vmem:[%s12498_s10 + $0x6d0] sm:$0xff] }
0x1690   : > { %6864 = vmatpush1.bf16.msra.mxu1 %v9696_v31  ;;  %v9651_v31 = vcombine.high %v9518_v25, %v9526_v26  ;;  %v9668_v57 = vcombine.low %v9535_v46, %v9543_v51  ;;  %v9606_v25 = vcombine.low %v9472_v35, %v9480_v0 }
0x1691   : > { %6865 = vmatprep.subr.bf16.mxu1 %v9713_v11  ;;  %v9669_v11 = vcombine.high %v9535_v46, %v9543_v51 }
0x1692   : > { %6823 = vmatpush1.bf16.msra.mxu0 %v9710_v41  ;;  %v9652_v41 = vcombine.low %v9519_v27, %v9527_v34 }
0x1693   : > { %6894 = vmatprep.subr.bf16.mxu0 %v9603_v56  ;;  %v9666_v56 = vcombine.low %v9534_v37, %v9542_v4 }
0x1694   : > { %6866 = vmatpush1.bf16.msra.mxu1 %v9712_v17  ;;  %v9667_v17 = vcombine.high %v9534_v37, %v9542_v4 }
0x1695   : > { %6937 = vmatprep.subr.bf16.mxu1 %v9605_v60 }
0x1719   : > { %v5926_v28 = vpop.xlane.xlu0 %5925 }
0x171a   : > { %v5929_v61 = vmul.f32 0.0078125, %v5926_v28  ;;  %v9566_v28 = vld [vmem:[%s12498_s10 + $0x710] sm:$0xff] }
0x171b   : > { %v5928_v62 = vpop.xlane.xlu1 %5927 }
0x171c   : > { %v5931_v2 = vadd.f32 1e-05, %v5929_v61  ;;  %v5930_v33 = vmul.f32 0.0078125, %v5928_v62  ;;  %v9574_v61 = vld [vmem:[%s12498_s10 + $0x750] sm:$0xff]  ;;  %v9567_v62 = vld [vmem:[%s12498_s10 + $0x718] sm:$0xff] }
0x171e   : > { %11197 = vrsqrt.f32 %v5931_v2  ;;  %v5932_v3 = vadd.f32 1e-05, %v5930_v33  ;;  %v9575_v2 = vld [vmem:[%s12498_s10 + $0x758] sm:$0xff]  ;;  %v9682_v33 = vcombine.low %v9550_v52, %v9558_v53 }
0x1720   : > { %11199 = vrsqrt.f32 %v5932_v3 }
0x1728   : > { %v11198_v38 = vpop.eup %11197 }
0x1729   : > { %v5935_v39 = vmul.f32 %v11198_v38, %v13206_v54  ;;  %v9699_v38 = vcombine.high %v9566_v28, %v9574_v61 }
0x172a   : > { %v11200_v40 = vpop.eup %11199 }
0x172b   : > { %v5943_v5 = vmul.f32 %v9466_v36, %v5935_v39  ;;  %v5936_v6 = vmul.f32 %v11200_v40, %v13208_v42  ;;  %v9502_v42 = vld [vmem:[%s12498_s10 + $0x510] sm:$0xff] }
0x172c   : > { %v9635_v23 = vcombine.high %v9502_v42, %v9510_v20  ;;  %v9634_v8 = vcombine.low %v9502_v42, %v9510_v20  ;;  %v9582_v39 = vld [vmem:[%s12498_s10 + $0x790] sm:$0xff] }
0x172d   : > { %v5944_v9 = vmul.f32 %v9466_v36, %v5936_v6  ;;  %v13252_v13 = vadd.f32 %v9467_v7, %v5943_v5  ;;  %v9701_v36 = vcombine.high %v9567_v62, %v9575_v2  ;;  %v9590_v40 = vld [vmem:[%s12498_s10 + $0x7d0] sm:$0xff]  ;;  %v9583_v5 = vld [vmem:[%s12498_s10 + $0x798] sm:$0xff] }
0x172e   : > { %v9591_v6 = vld [vmem:[%s12498_s10 + $0x7d8] sm:$0xff]  ;;  %v9715_v10 = vcombine.high %v9582_v39, %v9590_v40  ;;  %v9714_v42 = vcombine.low %v9582_v39, %v9590_v40 }
0x172f   : > { %v13254_v14 = vadd.f32 %v9467_v7, %v5944_v9  ;;  %v9698_v7 = vcombine.low %v9566_v28, %v9574_v61  ;;  %v9700_v9 = vcombine.low %v9567_v62, %v9575_v2  ;;  %v9717_v12 = vcombine.high %v9583_v5, %v9591_v6 }
0x1730   : > { %v9716_v20 = vcombine.low %v9583_v5, %v9591_v6 }
0x1731   : > { %v13258_v54 = vpack.c.bf16 %v13254_v14, %v13252_v13 }
0x1733   : > { %6841 = vmatmul.mubr.bf16.vlgmr.msra.gmra.mrb[76].mxu0 %v13258_v54  ;;  %6884 = vmatmul.mubr.bf16.vlgmr.msra.gmra.mrb[52].mxu1 %v13258_v54 }
0x1734   : > { %6895 = vmatpush1.bf16.msra.mxu0 %v9602_v55  ;;  %6938 = vmatpush1.bf16.msra.mxu1 %v9604_v59  ;;  %v9559_v55 = vld [vmem:[%s12498_s10 + $0x6d8] sm:$0xff]  ;;  %v9683_v59 = vcombine.high %v9550_v52, %v9558_v53 }
0x1735   : > { %6896 = vmatprep.subr.bf16.mxu0 %v9619_v15  ;;  %6939 = vmatprep.subr.bf16.mxu1 %v9621_v18  ;;  %v9685_v60 = vcombine.high %v9551_v1, %v9559_v55  ;;  %v9684_v3 = vcombine.low %v9551_v1, %v9559_v55  ;;  %v9473_v15 = vld [vmem:[%s12498_s10 + $0x428] sm:$0xff] }
0x1736   : > { %6926 = vmatprep.mubr.bf16.mxu0 %v11763_v30  ;;  %6969 = vmatprep.mubr.bf16.mxu1 %v11763_v30  ;;  %v9481_v18 = vld [vmem:[%s12498_s10 + $0x468] sm:$0xff] }
0x1737   : > { %v9609_v19 = vcombine.high %v9473_v15, %v9481_v18  ;;  %v9608_v26 = vcombine.low %v9473_v15, %v9481_v18 }
0x1738   : > { %6897 = vmatpush1.bf16.msra.mxu0 %v9618_v22  ;;  %6940 = vmatpush1.bf16.msra.mxu1 %v9620_v63  ;;  %v9488_v22 = vld [vmem:[%s12498_s10 + $0x4a0] sm:$0xff] }
0x1739   : > { %6898 = vmatprep.subr.bf16.mxu0 %v9635_v23  ;;  %6941 = vmatprep.subr.bf16.mxu1 %v9637_v24  ;;  %v9496_v63 = vld [vmem:[%s12498_s10 + $0x4e0] sm:$0xff]  ;;  %v9489_v23 = vld [vmem:[%s12498_s10 + $0x4a8] sm:$0xff] }
0x173a   : > { %v9497_v24 = vld [vmem:[%s12498_s10 + $0x4e8] sm:$0xff]  ;;  %v9623_v27 = vcombine.high %v9488_v22, %v9496_v63  ;;  %v9622_v37 = vcombine.low %v9488_v22, %v9496_v63 }
0x173b   : > { %v9625_v34 = vcombine.high %v9489_v23, %v9497_v24  ;;  %v9624_v4 = vcombine.low %v9489_v23, %v9497_v24 }
0x173c   : > { %6899 = vmatpush1.bf16.msra.mxu0 %v9634_v8  ;;  %6942 = vmatpush1.bf16.msra.mxu1 %v9636_v29  ;;  %v9504_v8 = vld [vmem:[%s12498_s10 + $0x520] sm:$0xff] }
0x173d   : > { %6900 = vmatprep.subr.bf16.mxu0 %v9651_v31  ;;  %6943 = vmatprep.subr.bf16.mxu1 %v9653_v32  ;;  %v9512_v29 = vld [vmem:[%s12498_s10 + $0x560] sm:$0xff]  ;;  %v9505_v31 = vld [vmem:[%s12498_s10 + $0x528] sm:$0xff] }
0x173e   : > { %v9513_v32 = vld [vmem:[%s12498_s10 + $0x568] sm:$0xff]  ;;  %v9639_v46 = vcombine.high %v9504_v8, %v9512_v29  ;;  %v9638_v52 = vcombine.low %v9504_v8, %v9512_v29 }
0x173f   : > { %v9641_v51 = vcombine.high %v9505_v31, %v9513_v32  ;;  %v9640_v53 = vcombine.low %v9505_v31, %v9513_v32 }
0x1740   : > { %6901 = vmatpush1.bf16.msra.mxu0 %v9650_v16  ;;  %6944 = vmatpush1.bf16.msra.mxu1 %v9652_v41  ;;  %v9520_v16 = vld [vmem:[%s12498_s10 + $0x5a0] sm:$0xff] }
0x1741   : > { %6902 = vmatprep.subr.bf16.mxu0 %v9667_v17  ;;  %6945 = vmatprep.subr.bf16.mxu1 %v9669_v11  ;;  %v9528_v41 = vld [vmem:[%s12498_s10 + $0x5e0] sm:$0xff]  ;;  %v9521_v17 = vld [vmem:[%s12498_s10 + $0x5a8] sm:$0xff] }
0x1742   : > { %v9529_v11 = vld [vmem:[%s12498_s10 + $0x5e8] sm:$0xff]  ;;  %v9655_v1 = vcombine.high %v9520_v16, %v9528_v41  ;;  %v9654_v28 = vcombine.low %v9520_v16, %v9528_v41 }
0x1743   : > { %v9657_v55 = vcombine.high %v9521_v17, %v9529_v11  ;;  %v9656_v61 = vcombine.low %v9521_v17, %v9529_v11 }
0x1744   : > { %6903 = vmatpush1.bf16.msra.mxu0 %v9666_v56  ;;  %6946 = vmatpush1.bf16.msra.mxu1 %v9668_v57  ;;  %v9536_v56 = vld [vmem:[%s12498_s10 + $0x620] sm:$0xff] }
0x1745   : > { %6904 = vmatprep.subr.bf16.mxu0 %v9683_v59  ;;  %6947 = vmatprep.subr.bf16.mxu1 %v9685_v60  ;;  %v9544_v57 = vld [vmem:[%s12498_s10 + $0x660] sm:$0xff]  ;;  %v9537_v59 = vld [vmem:[%s12498_s10 + $0x628] sm:$0xff] }
0x1746   : > { %v9545_v60 = vld [vmem:[%s12498_s10 + $0x668] sm:$0xff]  ;;  %v9671_v62 = vcombine.high %v9536_v56, %v9544_v57  ;;  %v9670_v39 = vcombine.low %v9536_v56, %v9544_v57 }
0x1747   : > { %v9673_v2 = vcombine.high %v9537_v59, %v9545_v60  ;;  %v9672_v40 = vcombine.low %v9537_v59, %v9545_v60 }
0x1748   : > { %6905 = vmatpush1.bf16.msra.mxu0 %v9682_v33  ;;  %6948 = vmatpush1.bf16.msra.mxu1 %v9684_v3  ;;  %v9552_v33 = vld [vmem:[%s12498_s10 + $0x6a0] sm:$0xff] }
0x1749   : > { %6906 = vmatprep.subr.bf16.mxu0 %v9699_v38  ;;  %6949 = vmatprep.subr.bf16.mxu1 %v9701_v36  ;;  %v9560_v3 = vld [vmem:[%s12498_s10 + $0x6e0] sm:$0xff]  ;;  %v9553_v38 = vld [vmem:[%s12498_s10 + $0x6a8] sm:$0xff] }
0x174a   : > { %v9561_v36 = vld [vmem:[%s12498_s10 + $0x6e8] sm:$0xff]  ;;  %v9687_v5 = vcombine.high %v9552_v33, %v9560_v3  ;;  %v9686_v35 = vcombine.low %v9552_v33, %v9560_v3 }
0x174b   : > { %v9689_v6 = vcombine.high %v9553_v38, %v9561_v36  ;;  %v9688_v0 = vcombine.low %v9553_v38, %v9561_v36 }
0x174c   : > { %6907 = vmatpush1.bf16.msra.mxu0 %v9698_v7  ;;  %6950 = vmatpush1.bf16.msra.mxu1 %v9700_v9  ;;  %v9568_v7 = vld [vmem:[%s12498_s10 + $0x720] sm:$0xff] }
0x174d   : > { %6908 = vmatprep.subr.bf16.mxu0 %v9715_v10  ;;  %6951 = vmatprep.subr.bf16.mxu1 %v9717_v12  ;;  %v9576_v9 = vld [vmem:[%s12498_s10 + $0x760] sm:$0xff]  ;;  %v9569_v10 = vld [vmem:[%s12498_s10 + $0x728] sm:$0xff] }
0x174e   : > { %v9577_v12 = vld [vmem:[%s12498_s10 + $0x768] sm:$0xff]  ;;  %v9703_v15 = vcombine.high %v9568_v7, %v9576_v9  ;;  %v9702_v22 = vcombine.low %v9568_v7, %v9576_v9 }
0x174f   : > { %v9705_v18 = vcombine.high %v9569_v10, %v9577_v12  ;;  %v9704_v63 = vcombine.low %v9569_v10, %v9577_v12  ;;  %v9554_v12 = vld [vmem:[%s12498_s10 + $0x6b0] sm:$0xff] }
0x1750   : > { %6909 = vmatpush1.bf16.msra.mxu0 %v9714_v42  ;;  %6952 = vmatpush1.bf16.msra.mxu1 %v9716_v20  ;;  %v9584_v42 = vld [vmem:[%s12498_s10 + $0x7a0] sm:$0xff] }
0x1751   : > { %6980 = vmatprep.subr.bf16.mxu0 %v9607_v21  ;;  %7023 = vmatprep.subr.bf16.mxu1 %v9609_v19  ;;  %v9592_v20 = vld [vmem:[%s12498_s10 + $0x7e0] sm:$0xff]  ;;  %v9585_v21 = vld [vmem:[%s12498_s10 + $0x7a8] sm:$0xff] }
0x1752   : > { %v9593_v19 = vld [vmem:[%s12498_s10 + $0x7e8] sm:$0xff]  ;;  %v9719_v23 = vcombine.high %v9584_v42, %v9592_v20  ;;  %v9718_v8 = vcombine.low %v9584_v42, %v9592_v20 }
0x1753   : > { %6927 = vmatmul.mubr.bf16.vlgmr.msra.gmra.mrb[80].mxu0 %v13258_v54  ;;  %6970 = vmatmul.mubr.bf16.vlgmr.msra.gmra.mrb[56].mxu1 %v13258_v54  ;;  %v9721_v24 = vcombine.high %v9585_v21, %v9593_v19  ;;  %v9720_v29 = vcombine.low %v9585_v21, %v9593_v19  ;;  %v9570_v19 = vld [vmem:[%s12498_s10 + $0x730] sm:$0xff] }
0x1754   : > { %6981 = vmatpush1.bf16.msra.mxu0 %v9606_v25  ;;  %7024 = vmatpush1.bf16.msra.mxu1 %v9608_v26  ;;  %v9474_v25 = vld [vmem:[%s12498_s10 + $0x430] sm:$0xff] }
0x1755   : > { %6982 = vmatprep.subr.bf16.mxu0 %v9623_v27  ;;  %7025 = vmatprep.subr.bf16.mxu1 %v9625_v34  ;;  %v9482_v26 = vld [vmem:[%s12498_s10 + $0x470] sm:$0xff]  ;;  %v9475_v27 = vld [vmem:[%s12498_s10 + $0x438] sm:$0xff] }
0x1756   : > { %7012 = vmatprep.mubr.bf16.mxu0 %v11763_v30  ;;  %7055 = vmatprep.mubr.bf16.mxu1 %v11763_v30  ;;  %v9483_v34 = vld [vmem:[%s12498_s10 + $0x478] sm:$0xff]  ;;  %v9611_v31 = vcombine.high %v9474_v25, %v9482_v26  ;;  %v9610_v16 = vcombine.low %v9474_v25, %v9482_v26 }
0x1757   : > { %v9613_v32 = vcombine.high %v9475_v27, %v9483_v34  ;;  %v9612_v41 = vcombine.low %v9475_v27, %v9483_v34  ;;  %v9586_v34 = vld [vmem:[%s12498_s10 + $0x7b0] sm:$0xff] }
0x1758   : > { %6983 = vmatpush1.bf16.msra.mxu0 %v9622_v37  ;;  %7026 = vmatpush1.bf16.msra.mxu1 %v9624_v4  ;;  %v9490_v37 = vld [vmem:[%s12498_s10 + $0x4b0] sm:$0xff] }
0x1759   : > { %6984 = vmatprep.subr.bf16.mxu0 %v9639_v46  ;;  %7027 = vmatprep.subr.bf16.mxu1 %v9641_v51  ;;  %v9498_v4 = vld [vmem:[%s12498_s10 + $0x4f0] sm:$0xff]  ;;  %v9491_v46 = vld [vmem:[%s12498_s10 + $0x4b8] sm:$0xff] }
0x175a   : > { %v9499_v51 = vld [vmem:[%s12498_s10 + $0x4f8] sm:$0xff]  ;;  %v9627_v17 = vcombine.high %v9490_v37, %v9498_v4  ;;  %v9626_v56 = vcombine.low %v9490_v37, %v9498_v4 }
0x175b   : > { %v9629_v11 = vcombine.high %v9491_v46, %v9499_v51  ;;  %v9628_v57 = vcombine.low %v9491_v46, %v9499_v51 }
0x175c   : > { %6985 = vmatpush1.bf16.msra.mxu0 %v9638_v52  ;;  %7028 = vmatpush1.bf16.msra.mxu1 %v9640_v53  ;;  %v9506_v52 = vld [vmem:[%s12498_s10 + $0x530] sm:$0xff] }
0x175d   : > { %6986 = vmatprep.subr.bf16.mxu0 %v9655_v1  ;;  %7029 = vmatprep.subr.bf16.mxu1 %v9657_v55  ;;  %v9514_v53 = vld [vmem:[%s12498_s10 + $0x570] sm:$0xff]  ;;  %v9507_v1 = vld [vmem:[%s12498_s10 + $0x538] sm:$0xff] }
0x175e   : > { %v9515_v55 = vld [vmem:[%s12498_s10 + $0x578] sm:$0xff]  ;;  %v9643_v59 = vcombine.high %v9506_v52, %v9514_v53  ;;  %v9642_v33 = vcombine.low %v9506_v52, %v9514_v53  ;;  %v11032_v52 = vld [vmem:[%s12508_s14 + $0x480] sm:$0xff]   ;;  %v11033_v53 = vld [vmem:[%s12508_s14 + $0x448] sm:$0xff]  }
0x175f   : > { %v9645_v60 = vcombine.high %v9507_v1, %v9515_v55  ;;  %v9644_v3 = vcombine.low %v9507_v1, %v9515_v55  ;;  %v11034_v1 = vld [vmem:[%s12508_s14 + $0x4c8] sm:$0xff]  }
0x1760   : > { %6987 = vmatpush1.bf16.msra.mxu0 %v9654_v28  ;;  %7030 = vmatpush1.bf16.msra.mxu1 %v9656_v61  ;;  %v9522_v28 = vld [vmem:[%s12498_s10 + $0x5b0] sm:$0xff]  ;;  %v11035_v55 = vld [vmem:[%s12508_s14 + $0x408] sm:$0xff]  }
0x1761   : > { %6988 = vmatprep.subr.bf16.mxu0 %v9671_v62  ;;  %7031 = vmatprep.subr.bf16.mxu1 %v9673_v2  ;;  %v9530_v61 = vld [vmem:[%s12498_s10 + $0x5f0] sm:$0xff]  ;;  %v9523_v62 = vld [vmem:[%s12498_s10 + $0x5b8] sm:$0xff] }
0x1762   : > { %v9531_v2 = vld [vmem:[%s12498_s10 + $0x5f8] sm:$0xff]  ;;  %v9659_v38 = vcombine.high %v9522_v28, %v9530_v61  ;;  %v9658_v7 = vcombine.low %v9522_v28, %v9530_v61  ;;  %v11040_v28 = vld [vmem:[%s12508_s14 + $0x490] sm:$0xff]  }
0x1763   : > { %v9661_v36 = vcombine.high %v9523_v62, %v9531_v2  ;;  %v11042_v61 = vld [vmem:[%s12508_s14 + $0x4d8] sm:$0xff]  }
0x1764   : > { %6989 = vmatpush1.bf16.msra.mxu0 %v9670_v39  ;;  %7032 = vmatpush1.bf16.msra.mxu1 %v9672_v40  ;;  %v9538_v39 = vld [vmem:[%s12498_s10 + $0x630] sm:$0xff] }
0x1765   : > { %6990 = vmatprep.subr.bf16.mxu0 %v9687_v5  ;;  %7033 = vmatprep.subr.bf16.mxu1 %v9689_v6  ;;  %v9546_v40 = vld [vmem:[%s12498_s10 + $0x670] sm:$0xff]  ;;  %v9539_v5 = vld [vmem:[%s12498_s10 + $0x638] sm:$0xff] }
0x1766   : > { %v9547_v6 = vld [vmem:[%s12498_s10 + $0x678] sm:$0xff]  ;;  %v9675_v9 = vcombine.high %v9538_v39, %v9546_v40 }
0x1767   : > { %v9677_v10 = vcombine.high %v9539_v5, %v9547_v6  ;;  %v9676_v42 = vcombine.low %v9539_v5, %v9547_v6  ;;  %v11051_v5 = vld [vmem:[%s12508_s14 + $0x428] sm:$0xff]  }
0x1768   : > { %6991 = vmatpush1.bf16.msra.mxu0 %v9686_v35  ;;  %7034 = vmatpush1.bf16.msra.mxu1 %v9688_v0  ;;  %v9562_v35 = vld [vmem:[%s12498_s10 + $0x6f0] sm:$0xff]  ;;  %v9555_v0 = vld [vmem:[%s12498_s10 + $0x6b8] sm:$0xff]  ;;  %v11052_v6 = vld [vmem:[%s12508_s14 + $0x4a8] sm:$0xff]  }
0x1769   : > { %6992 = vmatprep.subr.bf16.mxu0 %v9703_v15  ;;  %7035 = vmatprep.subr.bf16.mxu1 %v9705_v18  ;;  %v9563_v15 = vld [vmem:[%s12498_s10 + $0x6f8] sm:$0xff]  ;;  %v9674_v18 = vcombine.low %v9538_v39, %v9546_v40  ;;  %v9691_v20 = vcombine.high %v9554_v12, %v9562_v35  ;;  %v11049_v39 = vld [vmem:[%s12508_s14 + $0x468] sm:$0xff]  }
0x176a   : > { %v9693_v21 = vcombine.high %v9555_v0, %v9563_v15  ;;  %v9692_v25 = vcombine.low %v9555_v0, %v9563_v15  ;;  %v11050_v40 = vld [vmem:[%s12508_s14 + $0x4e8] sm:$0xff]   ;;  %v11059_v0 = vld [vmem:[%s12508_s14 + $0x438] sm:$0xff]  }
0x176b   : > { %v11060_v15 = vld [vmem:[%s12508_s14 + $0x4b8] sm:$0xff]  }
0x176c   : > { %6993 = vmatpush1.bf16.msra.mxu0 %v9702_v22  ;;  %7036 = vmatpush1.bf16.msra.mxu1 %v9704_v63  ;;  %v9578_v22 = vld [vmem:[%s12498_s10 + $0x770] sm:$0xff]  ;;  %v9571_v63 = vld [vmem:[%s12498_s10 + $0x738] sm:$0xff] }
0x176d   : > { %6994 = vmatprep.subr.bf16.mxu0 %v9719_v23  ;;  %7037 = vmatprep.subr.bf16.mxu1 %v9721_v24  ;;  %v9579_v23 = vld [vmem:[%s12498_s10 + $0x778] sm:$0xff]  ;;  %v9690_v24 = vcombine.low %v9554_v12, %v9562_v35  ;;  %v9707_v26 = vcombine.high %v9570_v19, %v9578_v22 }
0x176e   : > { %v9709_v27 = vcombine.high %v9571_v63, %v9579_v23  ;;  %v9708_v37 = vcombine.low %v9571_v63, %v9579_v23  ;;  %v11057_v12 = vld [vmem:[%s12508_s14 + $0x478] sm:$0xff]  }
0x176f   : > { %v11058_v35 = vld [vmem:[%s12508_s14 + $0x4f8] sm:$0xff]  }
0x1770   : > { %6995 = vmatpush1.bf16.msra.mxu0 %v9718_v8  ;;  %7038 = vmatpush1.bf16.msra.mxu1 %v9720_v29  ;;  %v9594_v8 = vld [vmem:[%s12498_s10 + $0x7f0] sm:$0xff]  ;;  %v9587_v29 = vld [vmem:[%s12498_s10 + $0x7b8] sm:$0xff] }
0x1771   : > { %7066 = vmatprep.subr.bf16.mxu0 %v9611_v31  ;;  %7109 = vmatprep.subr.bf16.mxu1 %v9613_v32  ;;  %v9595_v31 = vld [vmem:[%s12498_s10 + $0x7f8] sm:$0xff]  ;;  %v9706_v32 = vcombine.low %v9570_v19, %v9578_v22  ;;  %v9723_v4 = vcombine.high %v9586_v34, %v9594_v8  ;;  %v9722_v51 = vcombine.low %v9586_v34, %v9594_v8  ;;  %s13688_s10 = sld [smem:[#allocation58_spill]] }
0x1772   : > { %v9725_v46 = vcombine.high %v9587_v29, %v9595_v31 }
0x1773   : > { %7013 = vmatmul.mubr.bf16.vlgmr.msra.gmra.mrb[84].mxu0 %v13258_v54  ;;  %7056 = vmatmul.mubr.bf16.vlgmr.msra.gmra.mrb[60].mxu1 %v13258_v54 }
0x1774   : > { %7067 = vmatpush1.bf16.msra.mxu0 %v9610_v16  ;;  %7110 = vmatpush1.bf16.msra.mxu1 %v9612_v41  ;;  %v9724_v16 = vcombine.low %v9587_v29, %v9595_v31  ;;  %v11029_v41 = vld [vmem:[%s12508_s14 + $0x440] sm:$0xff]  }
0x1775   : > { %7068 = vmatprep.subr.bf16.mxu0 %v9627_v17  ;;  %7111 = vmatprep.subr.bf16.mxu1 %v9629_v11  ;;  %v11030_v17 = vld [vmem:[%s12508_s14 + $0x4c0] sm:$0xff]  }
0x1776   : > { %7098 = vmatprep.mubr.bf16.mxu0 %v11763_v30  ;;  %7141 = vmatprep.mubr.bf16.mxu1 %v11763_v30  ;;  %v9660_v30 = vcombine.low %v9523_v62, %v9531_v2  ;;  %v11031_v11 = vld [vmem:[%s12508_s14 + $0x400] sm:$0xff]   ;;  %v11043_v62 = vld [vmem:[%s12508_s14 + $0x418] sm:$0xff]  }
0x1777   : > { %v11044_v2 = vld [vmem:[%s12508_s14 + $0x498] sm:$0xff]   ;;  %s13541_s29 = scalar_lea.hbm %s13688_s10, %s10117_s1 }
0x1778   : > { %7069 = vmatpush1.bf16.msra.mxu0 %v9626_v56  ;;  %7112 = vmatpush1.bf16.msra.mxu1 %v9628_v57  ;;  %v11036_v56 = vld [vmem:[%s12508_s14 + $0x488] sm:$0xff]   ;;  %v11037_v57 = vld [vmem:[%s12508_s14 + $0x450] sm:$0xff]  }
0x1779   : > { %7070 = vmatprep.subr.bf16.mxu0 %v9643_v59  ;;  %7113 = vmatprep.subr.bf16.mxu1 %v9645_v60  ;;  %v11038_v59 = vld [vmem:[%s12508_s14 + $0x4d0] sm:$0xff]  }
0x177a   : > { %v11039_v60 = vld [vmem:[%s12508_s14 + $0x410] sm:$0xff]  }
0x177c   : > { %7071 = vmatpush1.bf16.msra.mxu0 %v9642_v33  ;;  %7114 = vmatpush1.bf16.msra.mxu1 %v9644_v3  ;;  %v11045_v33 = vld [vmem:[%s12508_s14 + $0x460] sm:$0xff]  }
0x177d   : > { %7072 = vmatprep.subr.bf16.mxu0 %v9659_v38  ;;  %7115 = vmatprep.subr.bf16.mxu1 %v9661_v36  ;;  %v11046_v3 = vld [vmem:[%s12508_s14 + $0x4e0] sm:$0xff]  }
0x177e   : > { %v11047_v38 = vld [vmem:[%s12508_s14 + $0x420] sm:$0xff]  }
0x177f   : > { %v11048_v36 = vld [vmem:[%s12508_s14 + $0x4a0] sm:$0xff]  }
0x1780   : > { %7073 = vmatpush1.bf16.msra.mxu0 %v9658_v7  ;;  %7116 = vmatpush1.bf16.msra.mxu1 %v9660_v30  ;;  %v11053_v7 = vld [vmem:[%s12508_s14 + $0x470] sm:$0xff]  }
0x1781   : > { %7074 = vmatprep.subr.bf16.mxu0 %v9675_v9  ;;  %7117 = vmatprep.subr.bf16.mxu1 %v9677_v10  ;;  %v11054_v30 = vld [vmem:[%s12508_s14 + $0x4f0] sm:$0xff]  }
0x1782   : > { %v11055_v9 = vld [vmem:[%s12508_s14 + $0x430] sm:$0xff]  }
0x1783   : > { %v11056_v10 = vld [vmem:[%s12508_s14 + $0x4b0] sm:$0xff]  }
0x1784   : > { %7075 = vmatpush1.bf16.msra.mxu0 %v9674_v18  ;;  %7118 = vmatpush1.bf16.msra.mxu1 %v9676_v42  ;;  %v11061_v18 = vld [vmem:[%s12508_s14 + $0x540] sm:$0xff]  }
0x1785   : > { %7076 = vmatprep.subr.bf16.mxu0 %v9691_v20  ;;  %7119 = vmatprep.subr.bf16.mxu1 %v9693_v21  ;;  %v11062_v42 = vld [vmem:[%s12508_s14 + $0x5c0] sm:$0xff]   ;;  %v13397_v20 = vld [vmem:[%s12505_s8 + $0x10] sm:$0xff] }
0x1786   : > { %v6091_v21 = vrot.slane %v13397_v20, %v12584_v43  ;;  %v6099_v19 = vrot.slane %v13397_v20, %v12592_v47  ;;  %v6095_v22 = vrot.slane %v13397_v20, %v12588_v45  ;;  %v6103_v63 = vrot.slane %v13397_v20, %v12902_v58 }
0x1788   : > { %7077 = vmatpush1.bf16.msra.mxu0 %v9690_v24  ;;  %7120 = vmatpush1.bf16.msra.mxu1 %v9692_v25 }
0x1789   : > { %7078 = vmatprep.subr.bf16.mxu0 %v9707_v26  ;;  %7121 = vmatprep.subr.bf16.mxu1 %v9709_v27 }
0x178c   : > { %7079 = vmatpush1.bf16.msra.mxu0 %v9706_v32  ;;  %7122 = vmatpush1.bf16.msra.mxu1 %v9708_v37 }
0x178d   : > { %7080 = vmatprep.subr.bf16.mxu0 %v9723_v4  ;;  %7123 = vmatprep.subr.bf16.mxu1 %v9725_v46 }
0x1790   : > { %7081 = vmatpush1.bf16.msra.mxu0 %v9722_v51  ;;  %7124 = vmatpush1.bf16.msra.mxu1 %v9724_v16 }
0x1791   : > { %10377 = vmatprep.subr.bf16.mxu0 %v11029_v41  ;;  %10399 = vmatprep.subr.bf16.mxu1 %v11030_v17 }
0x1793   : > { %7099 = vmatmul.mubr.bf16.vlgmr.msra.gmra.mrb[88].mxu0 %v13258_v54  ;;  %7142 = vmatmul.mubr.bf16.vlgmr.msra.gmra.mrb[64].mxu1 %v13258_v54  ;;  %v11041_v54 = vld [vmem:[%s12508_s14 + $0x458] sm:$0xff]  }
0x1794   : > { %10378 = vmatpush3.bf16.msra.mxu0 %v11031_v11  ;;  %10400 = vmatpush3.bf16.msra.mxu1 %v11032_v52 }
0x1795   : > { %10379 = vmatprep.subr.bf16.mxu0 %v11033_v53  ;;  %10401 = vmatprep.subr.bf16.mxu1 %v11034_v1 }
0x1798   : > { %10380 = vmatpush3.bf16.msra.mxu0 %v11035_v55  ;;  %10402 = vmatpush3.bf16.msra.mxu1 %v11036_v56 }
0x1799   : > { %10381 = vmatprep.subr.bf16.mxu0 %v11037_v57  ;;  %10403 = vmatprep.subr.bf16.mxu1 %v11038_v59 }
0x179c   : > { %10382 = vmatpush3.bf16.msra.mxu0 %v11039_v60  ;;  %10404 = vmatpush3.bf16.msra.mxu1 %v11040_v28 }
0x179d   : > { %10383 = vmatprep.subr.bf16.mxu0 %v11041_v54  ;;  %10405 = vmatprep.subr.bf16.mxu1 %v11042_v61  ;;  %v11063_v61 = vld [vmem:[%s12508_s14 + $0x500] sm:$0xff]  }
0x17a0   : > { %10384 = vmatpush3.bf16.msra.mxu0 %v11043_v62  ;;  %10406 = vmatpush3.bf16.msra.mxu1 %v11044_v2  ;;  %v11064_v62 = vld [vmem:[%s12508_s14 + $0x580] sm:$0xff]   ;;  %v11065_v2 = vld [vmem:[%s12508_s14 + $0x548] sm:$0xff]  }
0x17a1   : > { %10385 = vmatprep.subr.bf16.mxu0 %v11045_v33  ;;  %10407 = vmatprep.subr.bf16.mxu1 %v11046_v3  ;;  %v11066_v33 = vld [vmem:[%s12508_s14 + $0x5c8] sm:$0xff]  }
0x17a2   : > { %v11067_v3 = vld [vmem:[%s12508_s14 + $0x508] sm:$0xff]  }
0x17a4   : > { %10386 = vmatpush3.bf16.msra.mxu0 %v11047_v38  ;;  %10408 = vmatpush3.bf16.msra.mxu1 %v11048_v36  ;;  %v11068_v38 = vld [vmem:[%s12508_s14 + $0x588] sm:$0xff]   ;;  %v11069_v36 = vld [vmem:[%s12508_s14 + $0x550] sm:$0xff]  }
0x17a5   : > { %10387 = vmatprep.subr.bf16.mxu0 %v11049_v39  ;;  %10409 = vmatprep.subr.bf16.mxu1 %v11050_v40  ;;  %v11070_v39 = vld [vmem:[%s12508_s14 + $0x5d0] sm:$0xff]  }
0x17a6   : > { %v11071_v40 = vld [vmem:[%s12508_s14 + $0x510] sm:$0xff]  }
0x17a8   : > { %10388 = vmatpush3.bf16.msra.mxu0 %v11051_v5  ;;  %10410 = vmatpush3.bf16.msra.mxu1 %v11052_v6  ;;  %v11072_v5 = vld [vmem:[%s12508_s14 + $0x590] sm:$0xff]   ;;  %v11073_v6 = vld [vmem:[%s12508_s14 + $0x558] sm:$0xff]  }
0x17a9   : > { %10389 = vmatprep.subr.bf16.mxu0 %v11053_v7  ;;  %10411 = vmatprep.subr.bf16.mxu1 %v11054_v30  ;;  %v11074_v7 = vld [vmem:[%s12508_s14 + $0x5d8] sm:$0xff]  }
0x17aa   : > { %v11075_v30 = vld [vmem:[%s12508_s14 + $0x518] sm:$0xff]  }
0x17ac   : > { %10390 = vmatpush3.bf16.msra.mxu0 %v11055_v9  ;;  %10412 = vmatpush3.bf16.msra.mxu1 %v11056_v10  ;;  %v11076_v9 = vld [vmem:[%s12508_s14 + $0x598] sm:$0xff]   ;;  %v11077_v10 = vld [vmem:[%s12508_s14 + $0x560] sm:$0xff]  }
0x17ad   : > { %10391 = vmatprep.subr.bf16.mxu0 %v11057_v12  ;;  %10413 = vmatprep.subr.bf16.mxu1 %v11058_v35  ;;  %v11078_v12 = vld [vmem:[%s12508_s14 + $0x5e0] sm:$0xff]  }
0x17ae   : > { %v11079_v35 = vld [vmem:[%s12508_s14 + $0x520] sm:$0xff]  }
0x17b0   : > { %10392 = vmatpush3.bf16.msra.mxu0 %v11059_v0  ;;  %10414 = vmatpush3.bf16.msra.mxu1 %v11060_v15  ;;  %v11080_v0 = vld [vmem:[%s12508_s14 + $0x5a0] sm:$0xff]   ;;  %v11081_v15 = vld [vmem:[%s12508_s14 + $0x568] sm:$0xff]  }
0x17b1   : > { %10421 = vmatprep.subr.bf16.mxu0 %v11061_v18  ;;  %10443 = vmatprep.subr.bf16.mxu1 %v11062_v42  ;;  %v11082_v18 = vld [vmem:[%s12508_s14 + $0x5e8] sm:$0xff]  }
0x17b2   : > { %v11083_v42 = vld [vmem:[%s12508_s14 + $0x528] sm:$0xff]  }
0x1806   : > { %v6842_v23 = vpop.f32.mrb[76].mxu0  ;;  %v6885_v24 = vpop.f32.mrb[52].mxu1 }
0x1807   : > { %v6843_v25 = vadd.f32 %v6842_v23, %v6091_v21  ;;  %v6886_v26 = vadd.f32 %v6885_v24, %v6099_v19  ;;  %v6844_v27 = vpop.f32.mrb[77].mxu0  ;;  %v6887_v34 = vpop.f32.mrb[53].mxu1  ;;  %v11086_v23 = vld [vmem:[%s12508_s14 + $0x5f0] sm:$0xff]   ;;  %v6111_v24 = vrot.slane %v13397_v20, %v12939_v49 }
0x1808   : > { %v6845_v8 = vadd.f32 %v6844_v27, %v6095_v22  ;;  %v6888_v29 = vadd.f32 %v6887_v34, %v6103_v63  ;;  %v6846_v31 = vpop.f32.mrb[78].mxu0  ;;  %v6889_v32 = vpop.f32.mrb[54].mxu1  ;;  %v11087_v34 = vld [vmem:[%s12508_s14 + $0x530] sm:$0xff]  }
0x1809   : > { %v6847_v37 = vadd.f32 %v6846_v31, %v6091_v21  ;;  %v6890_v4 = vadd.f32 %v6889_v32, %v6099_v19  ;;  %v6848_v46 = vpop.f32.mrb[79].mxu0  ;;  %v6891_v51 = vpop.f32.mrb[55].mxu1  ;;  %v7152_v17 = vmax.f32 %v6843_v25, 0.0  ;;  %v7154_v11 = vmax.f32 %v6886_v26, 0.0  ;;  %v11084_v21 = vld [vmem:[%s12508_s14 + $0x5a8] sm:$0xff]  }
0x180a   : > { %v6849_v16 = vadd.f32 %v6848_v46, %v6095_v22  ;;  %v6892_v41 = vadd.f32 %v6891_v51, %v6103_v63  ;;  %v7153_v1 = vmax.f32 %v6845_v8, 0.0  ;;  %v7155_v55 = vmax.f32 %v6888_v29, 0.0  ;;  %v11085_v63 = vld [vmem:[%s12508_s14 + $0x570] sm:$0xff]   ;;  %v11090_v46 = vld [vmem:[%s12508_s14 + $0x5f8] sm:$0xff]  }
0x180b   : > { %v7168_v52 = vmax.f32 %v6847_v37, 0.0  ;;  %v7170_v53 = vmax.f32 %v6890_v4, 0.0  ;;  %v6107_v19 = vrot.slane %v13397_v20, %v12933_v44  ;;  %v6115_v22 = vrot.slane %v13397_v20, %v12936_v48  ;;  %v11088_v8 = vld [vmem:[%s12508_s14 + $0x5b0] sm:$0xff]   ;;  %v11089_v4 = vld [vmem:[%s12508_s14 + $0x578] sm:$0xff]  }
0x180c   : > { %v7169_v56 = vmax.f32 %v6849_v16, 0.0  ;;  %v7171_v57 = vmax.f32 %v6892_v41, 0.0  ;;  %v6119_v25 = vrot.slane %v13397_v20, %v12942_v50 }
0x180d   : > { %v7184_v59 = vpack.c.bf16 %v7168_v52, %v7152_v17  ;;  %v7186_v60 = vpack.c.bf16 %v7170_v53, %v7154_v11 }
0x180e   : > { %v7185_v28 = vpack.c.bf16 %v7169_v56, %v7153_v1  ;;  %v7187_v54 = vpack.c.bf16 %v7171_v57, %v7155_v55  ;;  %v11091_v56 = vld [vmem:[%s12508_s14 + $0x538] sm:$0xff]  }
0x180f   : > { %v11092_v57 = vld [vmem:[%s12508_s14 + $0x5b8] sm:$0xff]  }
0x1810   : > { %8265 = vmatprep.mubr.bf16.mxu0 %v7185_v28  ;;  %8306 = vmatprep.mubr.bf16.mxu1 %v7187_v54 }
0x1811   : > { %8266 = vmatmul.mubr.bf16.vlgmr.msra.gmra.mrb[92].mxu0 %v7184_v59  ;;  %8307 = vmatmul.mubr.bf16.vlgmr.msra.gmra.mrb[68].mxu1 %v7186_v60 }
0x1812   : > { %10422 = vmatpush3.bf16.msra.mxu0 %v11063_v61  ;;  %10444 = vmatpush3.bf16.msra.mxu1 %v11064_v62  ;;  %v11093_v61 = vld [vmem:[%s12508_s14 + $0x640] sm:$0xff]  }
0x1813   : > { %10423 = vmatprep.subr.bf16.mxu0 %v11065_v2  ;;  %10445 = vmatprep.subr.bf16.mxu1 %v11066_v33  ;;  %v11094_v62 = vld [vmem:[%s12508_s14 + $0x6c0] sm:$0xff]  }
0x1816   : > { %10424 = vmatpush3.bf16.msra.mxu0 %v11067_v3  ;;  %10446 = vmatpush3.bf16.msra.mxu1 %v11068_v38 }
0x1817   : > { %10425 = vmatprep.subr.bf16.mxu0 %v11069_v36  ;;  %10447 = vmatprep.subr.bf16.mxu1 %v11070_v39 }
0x181a   : > { %10426 = vmatpush3.bf16.msra.mxu0 %v11071_v40  ;;  %10448 = vmatpush3.bf16.msra.mxu1 %v11072_v5 }
0x181b   : > { %10427 = vmatprep.subr.bf16.mxu0 %v11073_v6  ;;  %10449 = vmatprep.subr.bf16.mxu1 %v11074_v7  ;;  %v11095_v6 = vld [vmem:[%s12508_s14 + $0x600] sm:$0xff]  }
0x181c   : > { %v11096_v7 = vld [vmem:[%s12508_s14 + $0x680] sm:$0xff]  }
0x181e   : > { %10428 = vmatpush3.bf16.msra.mxu0 %v11075_v30  ;;  %10450 = vmatpush3.bf16.msra.mxu1 %v11076_v9  ;;  %v11097_v30 = vld [vmem:[%s12508_s14 + $0x648] sm:$0xff]  }
0x181f   : > { %10429 = vmatprep.subr.bf16.mxu0 %v11077_v10  ;;  %10451 = vmatprep.subr.bf16.mxu1 %v11078_v12  ;;  %v11098_v9 = vld [vmem:[%s12508_s14 + $0x6c8] sm:$0xff]  }
0x1820   : > { %v11099_v10 = vld [vmem:[%s12508_s14 + $0x608] sm:$0xff]  }
0x1821   : > { %v11100_v12 = vld [vmem:[%s12508_s14 + $0x688] sm:$0xff]  }
0x1822   : > { %10430 = vmatpush3.bf16.msra.mxu0 %v11079_v35  ;;  %10452 = vmatpush3.bf16.msra.mxu1 %v11080_v0  ;;  %v11101_v35 = vld [vmem:[%s12508_s14 + $0x650] sm:$0xff]  }
0x1823   : > { %10431 = vmatprep.subr.bf16.mxu0 %v11081_v15  ;;  %10453 = vmatprep.subr.bf16.mxu1 %v11082_v18  ;;  %v11102_v0 = vld [vmem:[%s12508_s14 + $0x6d0] sm:$0xff]  }
0x1824   : > { %v11103_v15 = vld [vmem:[%s12508_s14 + $0x610] sm:$0xff]  }
0x1825   : > { %v11104_v18 = vld [vmem:[%s12508_s14 + $0x690] sm:$0xff]  }
0x1826   : > { %v6928_v26 = vpop.f32.mrb[80].mxu0  ;;  %v6971_v27 = vpop.f32.mrb[56].mxu1  ;;  %10432 = vmatpush3.bf16.msra.mxu0 %v11083_v42  ;;  %10454 = vmatpush3.bf16.msra.mxu1 %v11084_v21  ;;  %v11105_v42 = vld [vmem:[%s12508_s14 + $0x658] sm:$0xff]  }
0x1827   : > { %v6929_v29 = vadd.f32 %v6928_v26, %v6107_v19  ;;  %v6972_v31 = vadd.f32 %v6971_v27, %v6115_v22  ;;  %v6930_v32 = vpop.f32.mrb[81].mxu0  ;;  %v6973_v37 = vpop.f32.mrb[57].mxu1  ;;  %10433 = vmatprep.subr.bf16.mxu0 %v11085_v63  ;;  %10455 = vmatprep.subr.bf16.mxu1 %v11086_v23  ;;  %v11106_v21 = vld [vmem:[%s12508_s14 + $0x6d8] sm:$0xff]   ;;  %v11109_v63 = vld [vmem:[%s12508_s14 + $0x660] sm:$0xff]   ;;  %v11113_v26 = vld [vmem:[%s12508_s14 + $0x668] sm:$0xff]  }
0x1828   : > { %v6931_v51 = vadd.f32 %v6930_v32, %v6111_v24  ;;  %v6974_v16 = vadd.f32 %v6973_v37, %v6119_v25  ;;  %v6932_v41 = vpop.f32.mrb[82].mxu0  ;;  %v6975_v20 = vpop.f32.mrb[58].mxu1  ;;  %v11110_v23 = vld [vmem:[%s12508_s14 + $0x6e0] sm:$0xff]   ;;  %v11114_v27 = vld [vmem:[%s12508_s14 + $0x6e8] sm:$0xff]   ;;  %v11117_v37 = vld [vmem:[%s12508_s14 + $0x670] sm:$0xff]  }
0x1829   : > { %v6933_v17 = vadd.f32 %v6932_v41, %v6107_v19  ;;  %v6976_v11 = vadd.f32 %v6975_v20, %v6115_v22  ;;  %v6934_v52 = vpop.f32.mrb[83].mxu0  ;;  %v6977_v53 = vpop.f32.mrb[59].mxu1  ;;  %v7156_v59 = vmax.f32 %v6929_v29, 0.0  ;;  %v7158_v60 = vmax.f32 %v6972_v31, 0.0  ;;  %v11107_v19 = vld [vmem:[%s12508_s14 + $0x618] sm:$0xff]   ;;  %v11116_v29 = vld [vmem:[%s12508_s14 + $0x6a8] sm:$0xff]  }
0x182a   : > { %v6935_v1 = vadd.f32 %v6934_v52, %v6111_v24  ;;  %v6978_v55 = vadd.f32 %v6977_v53, %v6119_v25  ;;  %10434 = vmatpush3.bf16.msra.mxu0 %v11087_v34  ;;  %10456 = vmatpush3.bf16.msra.mxu1 %v11088_v8  ;;  %v7157_v2 = vmax.f32 %v6931_v51, 0.0  ;;  %v7159_v33 = vmax.f32 %v6974_v16, 0.0  ;;  %v11108_v22 = vld [vmem:[%s12508_s14 + $0x698] sm:$0xff]   ;;  %v11111_v24 = vld [vmem:[%s12508_s14 + $0x620] sm:$0xff]   ;;  %v11115_v8 = vld [vmem:[%s12508_s14 + $0x628] sm:$0xff]  }
0x182b   : > { %v7172_v28 = vmax.f32 %v6933_v17, 0.0  ;;  %v7174_v54 = vmax.f32 %v6976_v11, 0.0  ;;  %10435 = vmatprep.subr.bf16.mxu0 %v11089_v4  ;;  %10457 = vmatprep.subr.bf16.mxu1 %v11090_v46  ;;  %v11112_v25 = vld [vmem:[%s12508_s14 + $0x6a0] sm:$0xff]   ;;  %v13468_v34 = vld [vmem:[%s12505_s8 + $0x18] sm:$0xff]  ;;  %v11118_v4 = vld [vmem:[%s12508_s14 + $0x6f0] sm:$0xff]   ;;  %s8624_s8 = scalar_lea.sflag [#allocation6], %s12444_s26 }
0x182c   : > { %v7173_v3 = vmax.f32 %v6935_v1, 0.0  ;;  %v7175_v38 = vmax.f32 %v6978_v55, 0.0  ;;  %v6123_v31 = vrot.slane %v13468_v34, %v12584_v43  ;;  %v6131_v32 = vrot.slane %v13468_v34, %v12592_v47  ;;  %v11119_v20 = vld [vmem:[%s12508_s14 + $0x630] sm:$0xff]   ;;  %v11121_v53 = vld [vmem:[%s12508_s14 + $0x678] sm:$0xff]  }
0x182d   : > { %v7188_v36 = vpack.c.bf16 %v7172_v28, %v7156_v59  ;;  %v7190_v39 = vpack.c.bf16 %v7174_v54, %v7158_v60  ;;  %v6127_v46 = vrot.slane %v13468_v34, %v12588_v45  ;;  %v6135_v51 = vrot.slane %v13468_v34, %v12902_v58  ;;  %v11120_v17 = vld [vmem:[%s12508_s14 + $0x6b0] sm:$0xff]   ;;  %v11122_v1 = vld [vmem:[%s12508_s14 + $0x6f8] sm:$0xff]  }
0x182e   : > { %v7189_v40 = vpack.c.bf16 %v7173_v3, %v7157_v2  ;;  %v7191_v5 = vpack.c.bf16 %v7175_v38, %v7159_v33  ;;  %10436 = vmatpush3.bf16.msra.mxu0 %v11091_v56  ;;  %10458 = vmatpush3.bf16.msra.mxu1 %v11092_v57  ;;  %v11124_v2 = vld [vmem:[%s12508_s14 + $0x6b8] sm:$0xff]  }
0x182f   : > { %10465 = vmatprep.subr.bf16.mxu0 %v11093_v61  ;;  %10487 = vmatprep.subr.bf16.mxu1 %v11094_v62  ;;  %v11123_v62 = vld [vmem:[%s12508_s14 + $0x638] sm:$0xff]  }
0x1830   : > { %8347 = vmatprep.mubr.bf16.mxu0 %v7189_v40  ;;  %8388 = vmatprep.mubr.bf16.mxu1 %v7191_v5  ;;  %v11126_v40 = vld [vmem:[%s12508_s14 + $0x7c0] sm:$0xff]  }
0x1831   : > { %8348 = vmatmul.mubr.bf16.vlgmr.msra.gmra.mrb[96].mxu0 %v7188_v36  ;;  %8389 = vmatmul.mubr.bf16.vlgmr.msra.gmra.mrb[72].mxu1 %v7190_v39  ;;  %v11125_v39 = vld [vmem:[%s12508_s14 + $0x740] sm:$0xff]  }
0x1832   : > { %10466 = vmatpush3.bf16.msra.mxu0 %v11095_v6  ;;  %10488 = vmatpush3.bf16.msra.mxu1 %v11096_v7 }
0x1833   : > { %10467 = vmatprep.subr.bf16.mxu0 %v11097_v30  ;;  %10489 = vmatprep.subr.bf16.mxu1 %v11098_v9 }
0x1836   : > { %10468 = vmatpush3.bf16.msra.mxu0 %v11099_v10  ;;  %10490 = vmatpush3.bf16.msra.mxu1 %v11100_v12 }
0x1837   : > { %10469 = vmatprep.subr.bf16.mxu0 %v11101_v35  ;;  %10491 = vmatprep.subr.bf16.mxu1 %v11102_v0  ;;  %v11127_v0 = vld [vmem:[%s12508_s14 + $0x700] sm:$0xff]  }
0x183a   : > { %10470 = vmatpush3.bf16.msra.mxu0 %v11103_v15  ;;  %10492 = vmatpush3.bf16.msra.mxu1 %v11104_v18  ;;  %v11128_v15 = vld [vmem:[%s12508_s14 + $0x780] sm:$0xff]   ;;  %v11129_v18 = vld [vmem:[%s12508_s14 + $0x748] sm:$0xff]  }
0x183b   : > { %10471 = vmatprep.subr.bf16.mxu0 %v11105_v42  ;;  %10493 = vmatprep.subr.bf16.mxu1 %v11106_v21  ;;  %v11130_v42 = vld [vmem:[%s12508_s14 + $0x7c8] sm:$0xff]  }
0x183c   : > { %v11131_v21 = vld [vmem:[%s12508_s14 + $0x708] sm:$0xff]  }
0x183e   : > { %10472 = vmatpush3.bf16.msra.mxu0 %v11107_v19  ;;  %10494 = vmatpush3.bf16.msra.mxu1 %v11108_v22  ;;  %v11132_v19 = vld [vmem:[%s12508_s14 + $0x788] sm:$0xff]   ;;  %v11133_v22 = vld [vmem:[%s12508_s14 + $0x750] sm:$0xff]  }
0x183f   : > { %10473 = vmatprep.subr.bf16.mxu0 %v11109_v63  ;;  %10495 = vmatprep.subr.bf16.mxu1 %v11110_v23  ;;  %v11134_v63 = vld [vmem:[%s12508_s14 + $0x7d0] sm:$0xff]  }
0x1840   : > { %v11135_v23 = vld [vmem:[%s12508_s14 + $0x710] sm:$0xff]  }
0x1842   : > { %10474 = vmatpush3.bf16.msra.mxu0 %v11111_v24  ;;  %10496 = vmatpush3.bf16.msra.mxu1 %v11112_v25  ;;  %v11136_v24 = vld [vmem:[%s12508_s14 + $0x790] sm:$0xff]   ;;  %v11137_v25 = vld [vmem:[%s12508_s14 + $0x758] sm:$0xff]  }
0x1843   : > { %10475 = vmatprep.subr.bf16.mxu0 %v11113_v26  ;;  %10497 = vmatprep.subr.bf16.mxu1 %v11114_v27  ;;  %v11138_v26 = vld [vmem:[%s12508_s14 + $0x7d8] sm:$0xff]  }
0x1844   : > { %v11139_v27 = vld [vmem:[%s12508_s14 + $0x718] sm:$0xff]  }
0x1846   : > { %v7014_v16 = vpop.f32.mrb[84].mxu0  ;;  %v7057_v41 = vpop.f32.mrb[60].mxu1  ;;  %10476 = vmatpush3.bf16.msra.mxu0 %v11115_v8  ;;  %10498 = vmatpush3.bf16.msra.mxu1 %v11116_v29  ;;  %v11140_v8 = vld [vmem:[%s12508_s14 + $0x798] sm:$0xff]   ;;  %v11141_v29 = vld [vmem:[%s12508_s14 + $0x760] sm:$0xff]  }
0x1847   : > { %v7015_v43 = vadd.f32 %v7014_v16, %v6123_v31  ;;  %v7058_v11 = vadd.f32 %v7057_v41, %v6131_v32  ;;  %v7016_v52 = vpop.f32.mrb[85].mxu0  ;;  %v7059_v47 = vpop.f32.mrb[61].mxu1  ;;  %10477 = vmatprep.subr.bf16.mxu0 %v11117_v37  ;;  %10499 = vmatprep.subr.bf16.mxu1 %v11118_v4  ;;  %v11144_v37 = vld [vmem:[%s12508_s14 + $0x7a0] sm:$0xff]   ;;  %v11145_v4 = vld [vmem:[%s12508_s14 + $0x768] sm:$0xff]   ;;  %v6139_v41 = vrot.slane %v13468_v34, %v12933_v44 }
0x1848   : > { %v7017_v45 = vadd.f32 %v7016_v52, %v6127_v46  ;;  %v7060_v55 = vadd.f32 %v7059_v47, %v6135_v51  ;;  %v7018_v56 = vpop.f32.mrb[86].mxu0  ;;  %v7061_v58 = vpop.f32.mrb[62].mxu1  ;;  %v11148_v16 = vld [vmem:[%s12508_s14 + $0x7a8] sm:$0xff]   ;;  %v6151_v52 = vrot.slane %v13468_v34, %v12942_v50 }
0x1849   : > { %v7019_v57 = vadd.f32 %v7018_v56, %v6123_v31  ;;  %v7062_v59 = vadd.f32 %v7061_v58, %v6131_v32  ;;  %v7020_v60 = vpop.f32.mrb[87].mxu0  ;;  %v7063_v28 = vpop.f32.mrb[63].mxu1  ;;  %v7160_v33 = vmax.f32 %v7015_v43, 0.0  ;;  %v7162_v3 = vmax.f32 %v7058_v11, 0.0  ;;  %v11142_v31 = vld [vmem:[%s12508_s14 + $0x7e0] sm:$0xff]   ;;  %v11150_v43 = vld [vmem:[%s12508_s14 + $0x7f0] sm:$0xff]  }
0x184a   : > { %v7021_v54 = vadd.f32 %v7020_v60, %v6127_v46  ;;  %v7064_v61 = vadd.f32 %v7063_v28, %v6135_v51  ;;  %10478 = vmatpush3.bf16.msra.mxu0 %v11119_v20  ;;  %10500 = vmatpush3.bf16.msra.mxu1 %v11120_v17  ;;  %v7161_v5 = vmax.f32 %v7017_v45, 0.0  ;;  %v7163_v6 = vmax.f32 %v7060_v55, 0.0  ;;  %v11143_v32 = vld [vmem:[%s12508_s14 + $0x720] sm:$0xff]   ;;  %v11146_v46 = vld [vmem:[%s12508_s14 + $0x7e8] sm:$0xff]   ;;  %v11149_v17 = vld [vmem:[%s12508_s14 + $0x770] sm:$0xff]  }
0x184b   : > { %v7176_v38 = vmax.f32 %v7019_v57, 0.0  ;;  %v7178_v36 = vmax.f32 %v7062_v59, 0.0  ;;  %10479 = vmatprep.subr.bf16.mxu0 %v11121_v53  ;;  %10501 = vmatprep.subr.bf16.mxu1 %v11122_v1  ;;  %v11147_v51 = vld [vmem:[%s12508_s14 + $0x728] sm:$0xff]   ;;  %v6147_v20 = vrot.slane %v13468_v34, %v12936_v48  ;;  %v6143_v11 = vrot.slane %v13468_v34, %v12939_v49  ;;  %v11151_v1 = vld [vmem:[%s12508_s14 + $0x730] sm:$0xff]   ;;  %v11153_v58 = vld [vmem:[%s12508_s14 + $0x778] sm:$0xff]  }
0x184c   : > { %v7177_v7 = vmax.f32 %v7021_v54, 0.0  ;;  %v7179_v30 = vmax.f32 %v7064_v61, 0.0  ;;  %v11152_v45 = vld [vmem:[%s12508_s14 + $0x7b0] sm:$0xff]   ;;  %v11154_v57 = vld [vmem:[%s12508_s14 + $0x7f8] sm:$0xff]  }
0x184d   : > { %v7192_v9 = vpack.c.bf16 %v7176_v38, %v7160_v33  ;;  %v7194_v10 = vpack.c.bf16 %v7178_v36, %v7162_v3  ;;  %v11155_v33 = vld [vmem:[%s12508_s14 + $0x738] sm:$0xff]  }
0x184e   : > { %v7193_v12 = vpack.c.bf16 %v7177_v7, %v7161_v5  ;;  %v7195_v35 = vpack.c.bf16 %v7179_v30, %v7163_v6  ;;  %10480 = vmatpush3.bf16.msra.mxu0 %v11123_v62  ;;  %10502 = vmatpush3.bf16.msra.mxu1 %v11124_v2  ;;  %v11156_v3 = vld [vmem:[%s12508_s14 + $0x7b8] sm:$0xff]   ;;  %s11641_s14 = scalar_lea.vmem %s11640_s21, 64 }
0x184f   : > { %10509 = vmatprep.subr.bf16.mxu0 %v11125_v39  ;;  %10531 = vmatprep.subr.bf16.mxu1 %v11126_v40  ;;  %p11643_p1 = scmp.lt.s32.totalorder %s11641_s14, %s11635_s4 }
0x1850   : > { %8429 = vmatprep.mubr.bf16.mxu0 %v7193_v12  ;;  %8470 = vmatprep.mubr.bf16.mxu1 %v7195_v35 }
0x1851   : > { %8430 = vmatmul.mubr.bf16.vlgmr.msra.gmra.mrb[100].mxu0 %v7192_v9  ;;  %8471 = vmatmul.mubr.bf16.vlgmr.msra.gmra.mrb[76].mxu1 %v7194_v10  ;;  %p11644_p0 = por %p11643_p1, %p11642_p10 }
0x1852   : > { %10510 = vmatpush3.bf16.msra.mxu0 %v11127_v0  ;;  %10532 = vmatpush3.bf16.msra.mxu1 %v11128_v15 }
0x1853   : > { %10511 = vmatprep.subr.bf16.mxu0 %v11129_v18  ;;  %10533 = vmatprep.subr.bf16.mxu1 %v11130_v42  ;;  %v9983_v18 = vld [vmem:[%s914_s17 + $0x1] ss:$0 sm:$0xff]  ;;  %p11645_p4 = pnand %p11644_p0, %p11638_p2 }
0x1856   : > { %10512 = vmatpush3.bf16.msra.mxu0 %v11131_v21  ;;  %10534 = vmatpush3.bf16.msra.mxu1 %v11132_v19 }
0x1857   : > { %10513 = vmatprep.subr.bf16.mxu0 %v11133_v22  ;;  %10535 = vmatprep.subr.bf16.mxu1 %v11134_v63 }
0x185a   : > { %10514 = vmatpush3.bf16.msra.mxu0 %v11135_v23  ;;  %10536 = vmatpush3.bf16.msra.mxu1 %v11136_v24 }
0x185b   : > { %10515 = vmatprep.subr.bf16.mxu0 %v11137_v25  ;;  %10537 = vmatprep.subr.bf16.mxu1 %v11138_v26 }
0x185e   : > { %10516 = vmatpush3.bf16.msra.mxu0 %v11139_v27  ;;  %10538 = vmatpush3.bf16.msra.mxu1 %v11140_v8 }
0x185f   : > { %10517 = vmatprep.subr.bf16.mxu0 %v11141_v29  ;;  %10539 = vmatprep.subr.bf16.mxu1 %v11142_v31 }
0x1862   : > { %10518 = vmatpush3.bf16.msra.mxu0 %v11143_v32  ;;  %10540 = vmatpush3.bf16.msra.mxu1 %v11144_v37 }
0x1863   : > { %10519 = vmatprep.subr.bf16.mxu0 %v11145_v4  ;;  %10541 = vmatprep.subr.bf16.mxu1 %v11146_v46 }
0x1866   : > { %v7100_v47 = vpop.f32.mrb[88].mxu0  ;;  %v7143_v53 = vpop.f32.mrb[64].mxu1  ;;  %10520 = vmatpush3.bf16.msra.mxu0 %v11147_v51  ;;  %10542 = vmatpush3.bf16.msra.mxu1 %v11148_v16 }
0x1867   : > { %v7101_v44 = vadd.f32 %v7100_v47, %v6139_v41  ;;  %v7144_v55 = vadd.f32 %v7143_v53, %v6147_v20  ;;  %v7102_v56 = vpop.f32.mrb[89].mxu0  ;;  %v7145_v48 = vpop.f32.mrb[65].mxu1  ;;  %10521 = vmatprep.subr.bf16.mxu0 %v11149_v17  ;;  %10543 = vmatprep.subr.bf16.mxu1 %v11150_v43 }
0x1868   : > { %v7103_v49 = vadd.f32 %v7102_v56, %v6143_v11  ;;  %v7146_v59 = vadd.f32 %v7145_v48, %v6151_v52  ;;  %v7104_v60 = vpop.f32.mrb[90].mxu0  ;;  %v7147_v50 = vpop.f32.mrb[66].mxu1 }
0x1869   : > { %v7105_v34 = vadd.f32 %v7104_v60, %v6139_v41  ;;  %v7148_v28 = vadd.f32 %v7147_v50, %v6147_v20  ;;  %v7106_v54 = vpop.f32.mrb[91].mxu0  ;;  %v7149_v61 = vpop.f32.mrb[67].mxu1  ;;  %v7164_v38 = vmax.f32 %v7101_v44, 0.0  ;;  %v7166_v36 = vmax.f32 %v7144_v55, 0.0 }
0x186a   : > { %v7107_v62 = vadd.f32 %v7106_v54, %v6143_v11  ;;  %v7150_v2 = vadd.f32 %v7149_v61, %v6151_v52  ;;  %10522 = vmatpush3.bf16.msra.mxu0 %v11151_v1  ;;  %10544 = vmatpush3.bf16.msra.mxu1 %v11152_v45  ;;  %v7165_v5 = vmax.f32 %v7103_v49, 0.0  ;;  %v7167_v6 = vmax.f32 %v7146_v59, 0.0 }
0x186b   : > { %v7180_v39 = vmax.f32 %v7105_v34, 0.0  ;;  %v7182_v40 = vmax.f32 %v7148_v28, 0.0  ;;  %10523 = vmatprep.subr.bf16.mxu0 %v11153_v58  ;;  %10545 = vmatprep.subr.bf16.mxu1 %v11154_v57 }
0x186c   : > { %v7181_v7 = vmax.f32 %v7107_v62, 0.0  ;;  %v7183_v30 = vmax.f32 %v7150_v2, 0.0 }
0x186d   : > { %v7196_v9 = vpack.c.bf16 %v7180_v39, %v7164_v38  ;;  %v7198_v10 = vpack.c.bf16 %v7182_v40, %v7166_v36 }
0x186e   : > { %v7197_v12 = vpack.c.bf16 %v7181_v7, %v7165_v5  ;;  %v7199_v35 = vpack.c.bf16 %v7183_v30, %v7167_v6  ;;  %10524 = vmatpush3.bf16.msra.mxu0 %v11155_v33  ;;  %10546 = vmatpush3.bf16.msra.mxu1 %v11156_v3 }
0x1870   : > { %8511 = vmatprep.mubr.bf16.mxu0 %v7197_v12  ;;  %8552 = vmatprep.mubr.bf16.mxu1 %v7199_v35 }
0x1871   : > { %8512 = vmatmul.mubr.bf16.vlgmr.msra.gmra.mrb[104].mxu0 %v7196_v9  ;;  %8553 = vmatmul.mubr.bf16.vlgmr.msra.gmra.mrb[80].mxu1 %v7198_v10 }
0x18e4   : > { %v10393_v0 = vpop.f32.mrb[92].mxu0  ;;  %v10415_v15 = vpop.f32.mrb[68].mxu1 }
0x18e5   : > { %v10394_v42 = vpop.f32.mrb[93].mxu0  ;;  %v10416_v21 = vpop.f32.mrb[69].mxu1 }
0x18e6   : > { %v10395_v19 = vadd.f32 %v10394_v42, %v10393_v0  ;;  %v10417_v22 = vadd.f32 %v10416_v21, %v10415_v15  ;;  %v10396_v63 = vpop.f32.mrb[94].mxu0  ;;  %v10418_v23 = vpop.f32.mrb[70].mxu1 }
0x18e7   : > { %v10397_v24 = vpop.f32.mrb[95].mxu0  ;;  %v10419_v25 = vpop.f32.mrb[71].mxu1 }
0x18e8   : > { %v8268_v26 = vadd.f32 %v10395_v19, %v9983_v18  ;;  %v10398_v27 = vadd.f32 %v10397_v24, %v10396_v63  ;;  %v10420_v8 = vadd.f32 %v10419_v25, %v10418_v23 }
0x18ea   : > { %v8309_v29 = vadd.f32 %v10417_v22, %v8268_v26  ;;  %v8271_v31 = vadd.f32 %v10398_v27, %v9983_v18 }
0x18ec   : > { %v8312_v32 = vadd.f32 %v10420_v8, %v8271_v31 }
0x1904   : > { %v10437_v37 = vpop.f32.mrb[96].mxu0  ;;  %v10459_v4 = vpop.f32.mrb[72].mxu1 }
0x1905   : > { %v10438_v46 = vpop.f32.mrb[97].mxu0  ;;  %v10460_v51 = vpop.f32.mrb[73].mxu1 }
0x1906   : > { %v10439_v16 = vadd.f32 %v10438_v46, %v10437_v37  ;;  %v10461_v41 = vadd.f32 %v10460_v51, %v10459_v4  ;;  %v10440_v20 = vpop.f32.mrb[98].mxu0  ;;  %v10462_v17 = vpop.f32.mrb[74].mxu1  ;;  %v10114_v4 = vld [vmem:[%s923_s9 + $0x1] ss:$0 sm:$0xff] }
0x1907   : > { %v10441_v43 = vpop.f32.mrb[99].mxu0  ;;  %v10463_v11 = vpop.f32.mrb[75].mxu1 }
0x1908   : > { %v8350_v52 = vadd.f32 %v10439_v16, %v8309_v29  ;;  %v10442_v47 = vadd.f32 %v10441_v43, %v10440_v20  ;;  %v10464_v53 = vadd.f32 %v10463_v11, %v10462_v17  ;;  %v10115_v16 = vld [vmem:[%s932_s12 + $0x1] ss:$0 sm:$0xff] }
0x190a   : > { %v8391_v1 = vadd.f32 %v10461_v41, %v8350_v52  ;;  %v8353_v45 = vadd.f32 %v10442_v47, %v8312_v32 }
0x190c   : > { %v8394_v44 = vadd.f32 %v10464_v53, %v8353_v45 }
0x1924   : > { %v10481_v55 = vpop.f32.mrb[100].mxu0  ;;  %v10503_v56 = vpop.f32.mrb[76].mxu1 }
0x1925   : > { %v10482_v48 = vpop.f32.mrb[101].mxu0  ;;  %v10504_v58 = vpop.f32.mrb[77].mxu1 }
0x1926   : > { %v10483_v57 = vadd.f32 %v10482_v48, %v10481_v55  ;;  %v10505_v49 = vadd.f32 %v10504_v58, %v10503_v56  ;;  %v10484_v59 = vpop.f32.mrb[102].mxu0  ;;  %v10506_v60 = vpop.f32.mrb[78].mxu1 }
0x1927   : > { %v10485_v50 = vpop.f32.mrb[103].mxu0  ;;  %v10507_v34 = vpop.f32.mrb[79].mxu1 }
0x1928   : > { %v8432_v28 = vadd.f32 %v10483_v57, %v8391_v1  ;;  %v10486_v54 = vadd.f32 %v10485_v50, %v10484_v59  ;;  %v10508_v61 = vadd.f32 %v10507_v34, %v10506_v60 }
0x192a   : > { %v8473_v62 = vadd.f32 %v10505_v49, %v8432_v28  ;;  %v8435_v2 = vadd.f32 %v10486_v54, %v8394_v44 }
0x192c   : > { %v8476_v33 = vadd.f32 %v10508_v61, %v8435_v2 }
0x1944   : > { %v10525_v3 = vpop.f32.mrb[104].mxu0  ;;  %v10547_v38 = vpop.f32.mrb[80].mxu1 }
0x1945   : > { %v10526_v36 = vpop.f32.mrb[105].mxu0  ;;  %v10548_v39 = vpop.f32.mrb[81].mxu1 }
0x1946   : > { %v10527_v40 = vadd.f32 %v10526_v36, %v10525_v3  ;;  %v10549_v5 = vadd.f32 %v10548_v39, %v10547_v38  ;;  %v10528_v6 = vpop.f32.mrb[106].mxu0  ;;  %v10550_v7 = vpop.f32.mrb[82].mxu1 }
0x1947   : > { %v10529_v30 = vpop.f32.mrb[107].mxu0  ;;  %v10551_v9 = vpop.f32.mrb[83].mxu1 }
0x1948   : > { %v8514_v10 = vadd.f32 %v10527_v40, %v8473_v62  ;;  %v10530_v12 = vadd.f32 %v10529_v30, %v10528_v6  ;;  %v10552_v35 = vadd.f32 %v10551_v9, %v10550_v7 }
0x194a   : > { %v8555_v0 = vadd.f32 %v10549_v5, %v8514_v10  ;;  %v8517_v15 = vadd.f32 %v10530_v12, %v8476_v33 }
0x194c   : > { %v8558_v18 = vadd.f32 %v10552_v35, %v8517_v15  ;;  %v8561_v42 = vadd.f32 %v8555_v0, %v13252_v13 }
0x194e   : > { %8567 = vadd.xlane.f32.xlu0 %v8561_v42  ;;  %v8562_v21 = vadd.f32 %v8558_v18, %v13254_v14 }
0x1950   : > { %8569 = vadd.xlane.f32.xlu1 %v8562_v21 }
0x19db   : > { %v8568_v19 = vpop.xlane.xlu0 %8567 }
0x19dc   : > { %v8571_v22 = vmul.f32 0.0078125, %v8568_v19 }
0x19dd   : > { %v8570_v63 = vpop.xlane.xlu1 %8569 }
0x19de   : > { %v8573_v23 = vsub.f32 %v8561_v42, %v8571_v22  ;;  %v8572_v24 = vmul.f32 0.0078125, %v8570_v63 }
0x19e0   : > { %v8574_v25 = vsub.f32 %v8562_v21, %v8572_v24  ;;  %v8575_v26 = vmul.f32 %v8573_v23, %v8573_v23 }
0x19e2   : > { %8577 = vadd.xlane.f32.xlu0 %v8575_v26  ;;  %v8576_v27 = vmul.f32 %v8574_v25, %v8574_v25 }
0x19e4   : > { %8579 = vadd.xlane.f32.xlu1 %v8576_v27 }
0x1a6f   : > { %v8578_v8 = vpop.xlane.xlu0 %8577 }
0x1a70   : > { %v8581_v29 = vmul.f32 0.0078125, %v8578_v8 }
0x1a71   : > { %v8580_v31 = vpop.xlane.xlu1 %8579 }
0x1a72   : > { %v8583_v13 = vadd.f32 1e-05, %v8581_v29  ;;  %v8582_v32 = vmul.f32 0.0078125, %v8580_v31 }
0x1a74   : > { %11201 = vrsqrt.f32 %v8583_v13  ;;  %v8584_v14 = vadd.f32 1e-05, %v8582_v32 }
0x1a76   : > { %11203 = vrsqrt.f32 %v8584_v14 }
0x1a7e   : > { %v11202_v37 = vpop.eup %11201 }
0x1a7f   : > { %v8587_v46 = vmul.f32 %v11202_v37, %v8573_v23 }
0x1a80   : > { %v11204_v51 = vpop.eup %11203 }
0x1a81   : > { %v8595_v41 = vmul.f32 %v10114_v4, %v8587_v46  ;;  %v8588_v20 = vmul.f32 %v11204_v51, %v8574_v25 }
0x1a83   : > { %v8603_v17 = vadd.f32 %v10115_v16, %v8595_v41  ;;  %v8596_v43 = vmul.f32 %v10114_v4, %v8588_v20 }
0x1a85   : > { %v8605_v11 = vrot.slane %v8603_v17, 4  ;;  %v8604_v52 = vadd.f32 %v10115_v16, %v8596_v43 }
0x1a87   : > { %v8611_v47 = vrot.slane %v8604_v52, 4  ;;  %v8606_v53 = vadd.f32 %v8605_v11, %v8603_v17 }
0x1a89   : > { %v8607_v1 = vrot.slane %v8606_v53, 2  ;;  %v8612_v45 = vadd.f32 %v8611_v47, %v8604_v52 }
0x1a8b   : > { %v8608_v44 = vadd.f32 %v8607_v1, %v8606_v53  ;;  %v8613_v55 = vrot.slane %v8612_v45, 2 }
0x1a8d   : > { %v8609_v56 = vrot.slane %v8608_v44, 1  ;;  %v8614_v48 = vadd.f32 %v8613_v55, %v8612_v45 }
0x1a8f   : > { %v8615_v58 = vrot.slane %v8614_v48, 1  ;;  %v8610_v57 = vadd.f32 %v8609_v56, %v8608_v44 }
0x1a91   : > { %v8616_v49 = vadd.f32 %v8615_v58, %v8614_v48 }
0x1a93   : > { %v8620_v59 = vsel %vm8619_vm6, %v8616_v49, %v8610_v57 }
0x1a94   : > { %8622 = vst [vmem:[%s1047_s27] sm:$0x3] %v8620_v59 }
0x1a95   : > { %11648 = shalt.err (!%p11645_p4)
}
0x1a96   : > { %s11649_s26 = scalar_lea.hbm %s13541_s29, 32  ;;  %s11653_s9 = scalar_lea.hbm %s13688_s10, 64 }
0x1a97   : > { %p11650_p9 = scmp.ne.s32.totalorder %s13541_s29, %s11649_s26  ;;  %p11654_p13 = scmp.lt.u32.totalorder %s13541_s29, %s13688_s10 }
0x1a98   : > { %p11655_p3 = scmp.lt.u32.totalorder %s11653_s9, %s11649_s26  ;;  %p11657_p8 = scmp.lt.u32.totalorder %s11649_s26, %s13541_s29 }
0x1a99   : > { %p11651_p6 = pnand %p11650_p9, %p13689_p5 }
0x1a9a   : > { %p11656_p11 = por %p11655_p3, %p11654_p13 }
0x1a9b   : > { %p11652_p12 = pneg %p11651_p6 }
0x1a9c   : > { %p11658_p7 = por %p11657_p8, %p11656_p11 }
0x1a9e   : > { %p11659_p2 = pnand %p11658_p7, %p11652_p12 }
0x1aa0   : > { %11662 = shalt.err (!%p11659_p2)
}
0x1aa1   : > { %10755 = dma.vmem_to_hbm [thread:$0]  (%p13689_p5), %s13543_s24, 32, %s13541_s29, %s8624_s8  }
0x1aa2 PF: > { %s13690_s22 = sld [smem:[#allocation39_spill]]  ;;  %s13691_s0 = sld [smem:[#allocation47_spill]] }
0x1aa3   : > { %p13693_p1 = scmp.ge.s32.totalorder %s11731_s18, 2 }
0x1aa8   : > { %s8649_s19 = sand.u32 1, %s13690_s22   ;;  %p13692_p10 = scmp.ne.s32.totalorder %s13691_s0, 0 }
0x1aa9   : > { %s8650_s12 = scalar_lea.sflag [#allocation6], %s8649_s19 }
0x1aaa   : > { %p10758_p0 = pnand %p13693_p1, %p13692_p10 }
0x1aac   : > { %11714 = dma.done.wait (!%p10758_p0), %s8650_s12, 32  }
0x1aad   : > { %11716 = vsyncadd (!%p10758_p0), %s8650_s12, 4294967264  ;;  %s13694_s18 = sld [smem:[#allocation43_spill]]  ;;  %s13695_s9 = sld [smem:[#allocation40_spill]] }
0x1aae   : > { %s13696_s0 = sld [smem:[#allocation41_spill]]  ;;  %s13697_s17 = sld [smem:[#allocation44_spill]] }
0x1ab3   : > { %p54_p4 = scmp.ge.s32.totalorder %s13694_s18, 4  }
0x1ab5   :  { %56 = sbr.rel (!%p54_p4) target bundleno = 39 (0x27), region = 305 }
0x1abc   :  { %8655 = vsyncpa [#allocation5], 1 }
0x1abd   :  { %8657 = vsyncpa [#allocation5 + $0x1], 1 }
0x1abe   :  { %8658 = vsyncpa [#allocation8], 1 }
0x1abf   :  { %8660 = vsyncpa [#allocation8 + $0x1], 1 }
0x1ac0   :  { %8661 = vsyncpa [#allocation11], 1 }
0x1ac1   :  { %8663 = vsyncpa [#allocation11 + $0x1], 1 }
0x1ac2   :  { %8664 = vsyncpa [#allocation14], 1 }
0x1ac3   :  { %8666 = vsyncpa [#allocation14 + $0x1], 1 }
0x1ac4   :  { %8667 = vsyncpa [#allocation17], 1 }
0x1ac5   :  { %8669 = vsyncpa [#allocation17 + $0x1], 1 }
0x1ac6   :  { %8670 = vsyncpa [#allocation20], 1 }
0x1ac7   :  { %8672 = vsyncpa [#allocation20 + $0x1], 1 }
0x1ac8   :  { %8673 = vsyncpa [#allocation23], 1 }
0x1ac9   :  { %8675 = vsyncpa [#allocation23 + $0x1], 1 }
0x1aca   :  { %8676 = vsyncpa [#allocation26], 1 }
0x1acb   :  { %8678 = vsyncpa [#allocation26 + $0x1], 1 }
0x1acc   :  { %8679 = vsyncpa [#allocation6], 1 }
0x1acd   :  { %8681 = vsyncpa [#allocation6 + $0x1], 1 }

</bundles_post_ra>
